<compile_context>
chip_gen: v6e
topology: v6e:2x2x1
jax: 0.10.0
libtpu: 0.0.40
codegen_flags: <defaults>
</compile_context>

<pallas_src>
import jax
import jax.numpy as jnp
from jax.experimental import pallas as pl
from jax.experimental.pallas import tpu as pltpu

_EPS = 1e-5


def _temporal_generator_kernel(
    z_ref,                               # (B, 128)          padded channels-last latent
    w1_ref, g1_ref, be1_ref,             # (128, 512), (1, 512), (1, 512)
    w2_ref, g2_ref, be2_ref,             # (512, 1024), (1, 256), (1, 256)
    w3_ref, g3_ref, be3_ref,             # (256, 512), (1, 128), (1, 128)
    w4_ref, g4_ref, be4_ref,             # (128, 512), (1, 128), (1, 128)
    w5_ref, g5_ref, be5_ref,             # (128, 512), (1, 128), (1, 128)  (Cout padded 100->128)
    out_ref,                             # (B*16, 128)        lane-dense output slab
):
    relu = lambda v: jnp.maximum(v, 0.0)

    def bn_act(x, g_ref, be_ref, act):
        # Train-mode BatchNorm1d: per-channel stats over batch*time (axis 0), biased var.
        inv_n = 1.0 / float(x.shape[0])
        mean = jnp.sum(x, axis=0, keepdims=True) * inv_n                 # (1, C)
        var = jnp.sum((x - mean) ** 2, axis=0, keepdims=True) * inv_n    # (1, C) biased
        scale = g_ref[...] * jax.lax.rsqrt(var + _EPS)                   # (1, C)
        shift = be_ref[...] - mean * scale                               # (1, C)
        return act(x * scale + shift)

    def convT_s2(x, w_ref, lin, cout):
        # ConvTranspose1d(kernel=4, stride=2, padding=1) with batch folded on axis 0.
        #   x: (B*lin, Cin), w packed (Cin, 4*Cout) -> (B*2*lin, Cout)
        # PyTorch index bookkeeping:
        #   even t=2m : x[m] @ W[:,:,1] + x[m-1] @ W[:,:,3]
        #   odd  t=2m+1: x[m] @ W[:,:,2] + x[m+1] @ W[:,:,0]
        n = x.shape[0]
        y = jnp.dot(x, w_ref[...], preferred_element_type=jnp.float32)   # (n, 4*cout)
        y0 = y[:, 0 * cout:1 * cout]
        y1 = y[:, 1 * cout:2 * cout]
        y2 = y[:, 2 * cout:3 * cout]
        y3 = y[:, 3 * cout:4 * cout]
        if lin == 1:
            even, odd = y1, y2
        else:
            # lin is a power of two here (2, 4, 8): local time index via bit mask.
            t = jax.lax.broadcasted_iota(jnp.int32, (n, cout), 0) & (lin - 1)
            prev = jnp.roll(y3, 1, axis=0)       # row i <- y3[i-1] (wrap masked below)
            nxt = jnp.roll(y0, -1, axis=0)       # row i <- y0[i+1] (wrap masked below)
            even = y1 + jnp.where(t == 0, 0.0, prev)
            odd = y2 + jnp.where(t == lin - 1, 0.0, nxt)
        # Interleave rows: out[2i] = even[i], out[2i+1] = odd[i].
        pair = jnp.concatenate(
            [even.reshape(n, 1, cout), odd.reshape(n, 1, cout)], axis=1)  # (n, 2, cout)
        return pair.reshape(2 * n, cout)

    # Layer 1: 100(pad 128) -> 512, L 1 -> 1   (convT k=1 == channel matmul)
    x = jnp.dot(z_ref[...], w1_ref[...], preferred_element_type=jnp.float32)   # (B, 512)
    x = bn_act(x, g1_ref, be1_ref, relu)
    # Layer 2: 512 -> 256, L 1 -> 2
    x = bn_act(convT_s2(x, w2_ref, 1, 256), g2_ref, be2_ref, relu)              # (2B, 256)
    # Layer 3: 256 -> 128, L 2 -> 4
    x = bn_act(convT_s2(x, w3_ref, 2, 128), g3_ref, be3_ref, relu)              # (4B, 128)
    # Layer 4: 128 -> 128, L 4 -> 8
    x = bn_act(convT_s2(x, w4_ref, 4, 128), g4_ref, be4_ref, relu)              # (8B, 128)
    # Layer 5: 128 -> 100(pad 128), L 8 -> 16, tanh
    x = bn_act(convT_s2(x, w5_ref, 8, 128), g5_ref, be5_ref, jnp.tanh)          # (16B, 128)

    out_ref[...] = x


def init_params(key):
    """Deterministic synthetic parameters, pre-packed / pre-padded for the kernel.

    ConvTranspose1d weight (Cin, Cout, K) is stored as (Cin_pad, K*Cout_pad): tap k lives
    in lane block [k*Cout_pad, (k+1)*Cout_pad).  100-wide channel dims are zero-padded to
    128.  Conv biases are omitted (exactly cancelled by train-mode BN mean subtraction).
    BatchNorm gamma=1 / beta=0 (PyTorch default init); padded output channels get
    gamma=beta=0 so they stay exactly zero through BN and tanh.
    """
    specs = [
        # (Cin, Cout, K, Cin_pad, Cout_pad)
        (100, 512, 1, 128, 512),
        (512, 256, 4, 512, 256),
        (256, 128, 4, 256, 128),
        (128, 128, 4, 128, 128),
        (128, 100, 4, 128, 128),
    ]
    params = []
    for (cin, cout, k, cin_p, cout_p) in specs:
        key, kw = jax.random.split(key)
        w = jax.random.normal(kw, (k, cin, cout), jnp.float32) / jnp.sqrt(float(cin * k))
        w = jnp.pad(w, ((0, 0), (0, cin_p - cin), (0, cout_p - cout)))       # zero-pad channels
        w_packed = jnp.transpose(w, (1, 0, 2)).reshape(cin_p, k * cout_p)    # (Cin_pad, K*Cout_pad)
        gamma = jnp.pad(jnp.ones((1, cout), jnp.float32), ((0, 0), (0, cout_p - cout)))
        beta = jnp.zeros((1, cout_p), jnp.float32)
        params.append((w_packed, gamma, beta))
    return params


def temporal_generator(z0, params):
    """z0: (B, 100, 1) PyTorch NCL layout. Returns (B, 100, 16) NCL float32."""
    B = z0.shape[0]
    z = z0.astype(jnp.float32)[:, :, 0]                 # (B, 100) channels-last
    z = jnp.pad(z, ((0, 0), (0, 128 - 100)))            # lane-pad 100 -> 128

    inputs = [z]
    for (w, gamma, beta) in params:
        inputs.extend([w, gamma, beta])

    vmem = pl.BlockSpec(memory_space=pltpu.MemorySpace.VMEM)
    out = pl.pallas_call(
        _temporal_generator_kernel,
        out_shape=jax.ShapeDtypeStruct((B * 16, 128), jnp.float32),
        in_specs=[vmem] * len(inputs),
        out_specs=vmem,
    )(*inputs)

    out = out.reshape(B, 16, 128)[:, :, :100]           # drop padded channels
    return jnp.transpose(out, (0, 2, 1))                # (B, 100, 16) NCL


if __name__ == "__main__":
    key = jax.random.PRNGKey(0)
    kz, kp = jax.random.split(key)

    B = 2
    z0 = jax.random.normal(kz, (B, 100, 1), jnp.float32)   # matches PyTorch input
    params = init_params(kp)

    out = temporal_generator(z0, params)
    out = jax.block_until_ready(out)

    assert out.shape == (B, 100, 16), out.shape
    assert out.dtype == jnp.float32
    assert bool(jnp.all(jnp.isfinite(out)))
    assert bool(jnp.all(jnp.abs(out) <= 1.0 + 1e-6))        # tanh range
    print("KERNEL_OK")
</pallas_src>

<mosaic_0001>
module attributes {stable_mosaic.version = 11 : i64} {
  func.func @_temporal_generator_kernel(%arg0: memref<2x128xf32, #tpu.memory_space<vmem>>, %arg1: memref<128x512xf32, #tpu.memory_space<vmem>>, %arg2: memref<1x512xf32, #tpu.memory_space<vmem>>, %arg3: memref<1x512xf32, #tpu.memory_space<vmem>>, %arg4: memref<512x1024xf32, #tpu.memory_space<vmem>>, %arg5: memref<1x256xf32, #tpu.memory_space<vmem>>, %arg6: memref<1x256xf32, #tpu.memory_space<vmem>>, %arg7: memref<256x512xf32, #tpu.memory_space<vmem>>, %arg8: memref<1x128xf32, #tpu.memory_space<vmem>>, %arg9: memref<1x128xf32, #tpu.memory_space<vmem>>, %arg10: memref<128x512xf32, #tpu.memory_space<vmem>>, %arg11: memref<1x128xf32, #tpu.memory_space<vmem>>, %arg12: memref<1x128xf32, #tpu.memory_space<vmem>>, %arg13: memref<128x512xf32, #tpu.memory_space<vmem>>, %arg14: memref<1x128xf32, #tpu.memory_space<vmem>>, %arg15: memref<1x128xf32, #tpu.memory_space<vmem>>, %arg16: memref<32x128xf32, #tpu.memory_space<vmem>>) attributes {dimension_semantics = [], scalar_prefetch = 0 : i64, scratch_operands = 0 : i64, tpu.core_type = #tpu.core_type<tc>} {
    %c0 = arith.constant 0 : index
    %c0_0 = arith.constant 0 : index
    %0 = vector.load %arg0[%c0, %c0_0] : memref<2x128xf32, #tpu.memory_space<vmem>>, vector<2x128xf32>
    %c0_1 = arith.constant 0 : index
    %c0_2 = arith.constant 0 : index
    %1 = vector.load %arg1[%c0_1, %c0_2] : memref<128x512xf32, #tpu.memory_space<vmem>>, vector<128x512xf32>
    %cst = arith.constant dense<0.000000e+00> : vector<2x512xf32>
    %2 = tpu.matmul %0, %1, %cst {dimension_numbers = #tpu.dot_dimension_numbers<[1], [0], [0], [1], [0, 0, 1, 1], [], []>} : vector<2x128xf32>, vector<128x512xf32>, vector<2x512xf32> -> vector<2x512xf32>
    %cst_3 = arith.constant dense<0.000000e+00> : vector<512xf32>
    %3 = vector.multi_reduction <add>, %2, %cst_3 [0] : vector<2x512xf32> to vector<512xf32>
    %4 = vector.shape_cast %3 : vector<512xf32> to vector<1x512xf32>
    %cst_4 = arith.constant 5.000000e-01 : f32
    %5 = vector.broadcast %cst_4 : f32 to vector<1x512xf32>
    %6 = arith.mulf %4, %5 : vector<1x512xf32>
    %7 = vector.broadcast %6 : vector<1x512xf32> to vector<2x512xf32>
    %8 = arith.subf %2, %7 : vector<2x512xf32>
    %9 = arith.mulf %8, %8 : vector<2x512xf32>
    %cst_5 = arith.constant dense<0.000000e+00> : vector<512xf32>
    %10 = vector.multi_reduction <add>, %9, %cst_5 [0] : vector<2x512xf32> to vector<512xf32>
    %11 = vector.shape_cast %10 : vector<512xf32> to vector<1x512xf32>
    %cst_6 = arith.constant 5.000000e-01 : f32
    %12 = vector.broadcast %cst_6 : f32 to vector<1x512xf32>
    %13 = arith.mulf %11, %12 : vector<1x512xf32>
    %c0_7 = arith.constant 0 : index
    %c0_8 = arith.constant 0 : index
    %14 = vector.load %arg2[%c0_7, %c0_8] : memref<1x512xf32, #tpu.memory_space<vmem>>, vector<1x512xf32>
    %cst_9 = arith.constant 9.99999974E-6 : f32
    %15 = vector.broadcast %cst_9 : f32 to vector<1x512xf32>
    %16 = arith.addf %13, %15 : vector<1x512xf32>
    %17 = math.rsqrt %16 : vector<1x512xf32>
    %18 = arith.mulf %14, %17 : vector<1x512xf32>
    %c0_10 = arith.constant 0 : index
    %c0_11 = arith.constant 0 : index
    %19 = vector.load %arg3[%c0_10, %c0_11] : memref<1x512xf32, #tpu.memory_space<vmem>>, vector<1x512xf32>
    %20 = arith.mulf %6, %18 : vector<1x512xf32>
    %21 = arith.subf %19, %20 : vector<1x512xf32>
    %22 = vector.broadcast %18 : vector<1x512xf32> to vector<2x512xf32>
    %23 = arith.mulf %2, %22 : vector<2x512xf32>
    %24 = vector.broadcast %21 : vector<1x512xf32> to vector<2x512xf32>
    %25 = arith.addf %23, %24 : vector<2x512xf32>
    %cst_12 = arith.constant 0.000000e+00 : f32
    %26 = vector.broadcast %cst_12 : f32 to vector<2x512xf32>
    %27 = arith.maximumf %25, %26 : vector<2x512xf32>
    %c0_13 = arith.constant 0 : index
    %c0_14 = arith.constant 0 : index
    %28 = vector.load %arg4[%c0_13, %c0_14] : memref<512x1024xf32, #tpu.memory_space<vmem>>, vector<512x1024xf32>
    %cst_15 = arith.constant dense<0.000000e+00> : vector<2x1024xf32>
    %29 = tpu.matmul %27, %28, %cst_15 {dimension_numbers = #tpu.dot_dimension_numbers<[1], [0], [0], [1], [0, 0, 1, 1], [], []>} : vector<2x512xf32>, vector<512x1024xf32>, vector<2x1024xf32> -> vector<2x1024xf32>
    %30 = vector.extract_strided_slice %29 {offsets = [0, 256], sizes = [2, 256], strides = [1, 1]} : vector<2x1024xf32> to vector<2x256xf32>
    %31 = vector.extract_strided_slice %29 {offsets = [0, 512], sizes = [2, 256], strides = [1, 1]} : vector<2x1024xf32> to vector<2x256xf32>
    %32 = vector.shape_cast %30 : vector<2x256xf32> to vector<2x1x256xf32>
    %33 = vector.shape_cast %31 : vector<2x256xf32> to vector<2x1x256xf32>
    %34 = tpu.concatenate %32, %33 in 1 : vector<2x1x256xf32>, vector<2x1x256xf32> -> vector<2x2x256xf32>
    %35 = vector.shape_cast %34 : vector<2x2x256xf32> to vector<4x256xf32>
    %cst_16 = arith.constant dense<0.000000e+00> : vector<256xf32>
    %36 = vector.multi_reduction <add>, %35, %cst_16 [0] : vector<4x256xf32> to vector<256xf32>
    %37 = vector.shape_cast %36 : vector<256xf32> to vector<1x256xf32>
    %cst_17 = arith.constant 2.500000e-01 : f32
    %38 = vector.broadcast %cst_17 : f32 to vector<1x256xf32>
    %39 = arith.mulf %37, %38 : vector<1x256xf32>
    %40 = vector.broadcast %39 : vector<1x256xf32> to vector<4x256xf32>
    %41 = arith.subf %35, %40 : vector<4x256xf32>
    %42 = arith.mulf %41, %41 : vector<4x256xf32>
    %cst_18 = arith.constant dense<0.000000e+00> : vector<256xf32>
    %43 = vector.multi_reduction <add>, %42, %cst_18 [0] : vector<4x256xf32> to vector<256xf32>
    %44 = vector.shape_cast %43 : vector<256xf32> to vector<1x256xf32>
    %cst_19 = arith.constant 2.500000e-01 : f32
    %45 = vector.broadcast %cst_19 : f32 to vector<1x256xf32>
    %46 = arith.mulf %44, %45 : vector<1x256xf32>
    %c0_20 = arith.constant 0 : index
    %c0_21 = arith.constant 0 : index
    %47 = vector.load %arg5[%c0_20, %c0_21] : memref<1x256xf32, #tpu.memory_space<vmem>>, vector<1x256xf32>
    %cst_22 = arith.constant 9.99999974E-6 : f32
    %48 = vector.broadcast %cst_22 : f32 to vector<1x256xf32>
    %49 = arith.addf %46, %48 : vector<1x256xf32>
    %50 = math.rsqrt %49 : vector<1x256xf32>
    %51 = arith.mulf %47, %50 : vector<1x256xf32>
    %c0_23 = arith.constant 0 : index
    %c0_24 = arith.constant 0 : index
    %52 = vector.load %arg6[%c0_23, %c0_24] : memref<1x256xf32, #tpu.memory_space<vmem>>, vector<1x256xf32>
    %53 = arith.mulf %39, %51 : vector<1x256xf32>
    %54 = arith.subf %52, %53 : vector<1x256xf32>
    %55 = vector.broadcast %51 : vector<1x256xf32> to vector<4x256xf32>
    %56 = arith.mulf %35, %55 : vector<4x256xf32>
    %57 = vector.broadcast %54 : vector<1x256xf32> to vector<4x256xf32>
    %58 = arith.addf %56, %57 : vector<4x256xf32>
    %cst_25 = arith.constant 0.000000e+00 : f32
    %59 = vector.broadcast %cst_25 : f32 to vector<4x256xf32>
    %60 = arith.maximumf %58, %59 : vector<4x256xf32>
    %c0_26 = arith.constant 0 : index
    %c0_27 = arith.constant 0 : index
    %61 = vector.load %arg7[%c0_26, %c0_27] : memref<256x512xf32, #tpu.memory_space<vmem>>, vector<256x512xf32>
    %cst_28 = arith.constant dense<0.000000e+00> : vector<4x512xf32>
    %62 = tpu.matmul %60, %61, %cst_28 {dimension_numbers = #tpu.dot_dimension_numbers<[1], [0], [0], [1], [0, 0, 1, 1], [], []>} : vector<4x256xf32>, vector<256x512xf32>, vector<4x512xf32> -> vector<4x512xf32>
    %63 = vector.extract_strided_slice %62 {offsets = [0, 0], sizes = [4, 128], strides = [1, 1]} : vector<4x512xf32> to vector<4x128xf32>
    %64 = vector.extract_strided_slice %62 {offsets = [0, 128], sizes = [4, 128], strides = [1, 1]} : vector<4x512xf32> to vector<4x128xf32>
    %65 = vector.extract_strided_slice %62 {offsets = [0, 256], sizes = [4, 128], strides = [1, 1]} : vector<4x512xf32> to vector<4x128xf32>
    %66 = vector.extract_strided_slice %62 {offsets = [0, 384], sizes = [4, 128], strides = [1, 1]} : vector<4x512xf32> to vector<4x128xf32>
    %67 = tpu.iota {dimensions = array<i32: 0>} : vector<4x128xi32>
    %c1_i32 = arith.constant 1 : i32
    %68 = vector.broadcast %c1_i32 : i32 to vector<4x128xi32>
    %69 = arith.andi %67, %68 : vector<4x128xi32>
    %70 = vector.extract_strided_slice %66 {offsets = [3, 0], sizes = [1, 128], strides = [1, 1]} : vector<4x128xf32> to vector<1x128xf32>
    %71 = vector.extract_strided_slice %66 {offsets = [0, 0], sizes = [3, 128], strides = [1, 1]} : vector<4x128xf32> to vector<3x128xf32>
    %72 = tpu.concatenate %70, %71 in 0 : vector<1x128xf32>, vector<3x128xf32> -> vector<4x128xf32>
    %73 = vector.extract_strided_slice %63 {offsets = [1, 0], sizes = [3, 128], strides = [1, 1]} : vector<4x128xf32> to vector<3x128xf32>
    %74 = vector.extract_strided_slice %63 {offsets = [0, 0], sizes = [1, 128], strides = [1, 1]} : vector<4x128xf32> to vector<1x128xf32>
    %75 = tpu.concatenate %73, %74 in 0 : vector<3x128xf32>, vector<1x128xf32> -> vector<4x128xf32>
    %c0_i32 = arith.constant 0 : i32
    %76 = vector.broadcast %c0_i32 : i32 to vector<4x128xi32>
    %77 = arith.cmpi eq, %69, %76 : vector<4x128xi32>
    %cst_29 = arith.constant 0.000000e+00 : f32
    %78 = vector.broadcast %cst_29 : f32 to vector<4x128xf32>
    %79 = arith.select %77, %78, %72 : vector<4x128xi1>, vector<4x128xf32>
    %80 = arith.addf %64, %79 : vector<4x128xf32>
    %c1_i32_30 = arith.constant 1 : i32
    %81 = vector.broadcast %c1_i32_30 : i32 to vector<4x128xi32>
    %82 = arith.cmpi eq, %69, %81 : vector<4x128xi32>
    %cst_31 = arith.constant 0.000000e+00 : f32
    %83 = vector.broadcast %cst_31 : f32 to vector<4x128xf32>
    %84 = arith.select %82, %83, %75 : vector<4x128xi1>, vector<4x128xf32>
    %85 = arith.addf %65, %84 : vector<4x128xf32>
    %86 = vector.shape_cast %80 : vector<4x128xf32> to vector<4x1x128xf32>
    %87 = vector.shape_cast %85 : vector<4x128xf32> to vector<4x1x128xf32>
    %88 = tpu.concatenate %86, %87 in 1 : vector<4x1x128xf32>, vector<4x1x128xf32> -> vector<4x2x128xf32>
    %89 = vector.shape_cast %88 : vector<4x2x128xf32> to vector<8x128xf32>
    %cst_32 = arith.constant dense<0.000000e+00> : vector<128xf32>
    %90 = vector.multi_reduction <add>, %89, %cst_32 [0] : vector<8x128xf32> to vector<128xf32>
    %91 = vector.shape_cast %90 : vector<128xf32> to vector<1x128xf32>
    %cst_33 = arith.constant 1.250000e-01 : f32
    %92 = vector.broadcast %cst_33 : f32 to vector<1x128xf32>
    %93 = arith.mulf %91, %92 : vector<1x128xf32>
    %94 = vector.broadcast %93 : vector<1x128xf32> to vector<8x128xf32>
    %95 = arith.subf %89, %94 : vector<8x128xf32>
    %96 = arith.mulf %95, %95 : vector<8x128xf32>
    %cst_34 = arith.constant dense<0.000000e+00> : vector<128xf32>
    %97 = vector.multi_reduction <add>, %96, %cst_34 [0] : vector<8x128xf32> to vector<128xf32>
    %98 = vector.shape_cast %97 : vector<128xf32> to vector<1x128xf32>
    %cst_35 = arith.constant 1.250000e-01 : f32
    %99 = vector.broadcast %cst_35 : f32 to vector<1x128xf32>
    %100 = arith.mulf %98, %99 : vector<1x128xf32>
    %c0_36 = arith.constant 0 : index
    %c0_37 = arith.constant 0 : index
    %101 = vector.load %arg8[%c0_36, %c0_37] : memref<1x128xf32, #tpu.memory_space<vmem>>, vector<1x128xf32>
    %cst_38 = arith.constant 9.99999974E-6 : f32
    %102 = vector.broadcast %cst_38 : f32 to vector<1x128xf32>
    %103 = arith.addf %100, %102 : vector<1x128xf32>
    %104 = math.rsqrt %103 : vector<1x128xf32>
    %105 = arith.mulf %101, %104 : vector<1x128xf32>
    %c0_39 = arith.constant 0 : index
    %c0_40 = arith.constant 0 : index
    %106 = vector.load %arg9[%c0_39, %c0_40] : memref<1x128xf32, #tpu.memory_space<vmem>>, vector<1x128xf32>
    %107 = arith.mulf %93, %105 : vector<1x128xf32>
    %108 = arith.subf %106, %107 : vector<1x128xf32>
    %109 = vector.broadcast %105 : vector<1x128xf32> to vector<8x128xf32>
    %110 = arith.mulf %89, %109 : vector<8x128xf32>
    %111 = vector.broadcast %108 : vector<1x128xf32> to vector<8x128xf32>
    %112 = arith.addf %110, %111 : vector<8x128xf32>
    %cst_41 = arith.constant 0.000000e+00 : f32
    %113 = vector.broadcast %cst_41 : f32 to vector<8x128xf32>
    %114 = arith.maximumf %112, %113 : vector<8x128xf32>
    %c0_42 = arith.constant 0 : index
    %c0_43 = arith.constant 0 : index
    %115 = vector.load %arg10[%c0_42, %c0_43] : memref<128x512xf32, #tpu.memory_space<vmem>>, vector<128x512xf32>
    %cst_44 = arith.constant dense<0.000000e+00> : vector<8x512xf32>
    %116 = tpu.matmul %114, %115, %cst_44 {dimension_numbers = #tpu.dot_dimension_numbers<[1], [0], [0], [1], [0, 0, 1, 1], [], []>} : vector<8x128xf32>, vector<128x512xf32>, vector<8x512xf32> -> vector<8x512xf32>
    %117 = vector.extract_strided_slice %116 {offsets = [0, 0], sizes = [8, 128], strides = [1, 1]} : vector<8x512xf32> to vector<8x128xf32>
    %118 = vector.extract_strided_slice %116 {offsets = [0, 128], sizes = [8, 128], strides = [1, 1]} : vector<8x512xf32> to vector<8x128xf32>
    %119 = vector.extract_strided_slice %116 {offsets = [0, 256], sizes = [8, 128], strides = [1, 1]} : vector<8x512xf32> to vector<8x128xf32>
    %120 = vector.extract_strided_slice %116 {offsets = [0, 384], sizes = [8, 128], strides = [1, 1]} : vector<8x512xf32> to vector<8x128xf32>
    %121 = tpu.iota {dimensions = array<i32: 0>} : vector<8x128xi32>
    %c3_i32 = arith.constant 3 : i32
    %122 = vector.broadcast %c3_i32 : i32 to vector<8x128xi32>
    %123 = arith.andi %121, %122 : vector<8x128xi32>
    %124 = vector.extract_strided_slice %120 {offsets = [7, 0], sizes = [1, 128], strides = [1, 1]} : vector<8x128xf32> to vector<1x128xf32>
    %125 = vector.extract_strided_slice %120 {offsets = [0, 0], sizes = [7, 128], strides = [1, 1]} : vector<8x128xf32> to vector<7x128xf32>
    %126 = tpu.concatenate %124, %125 in 0 : vector<1x128xf32>, vector<7x128xf32> -> vector<8x128xf32>
    %127 = vector.extract_strided_slice %117 {offsets = [1, 0], sizes = [7, 128], strides = [1, 1]} : vector<8x128xf32> to vector<7x128xf32>
    %128 = vector.extract_strided_slice %117 {offsets = [0, 0], sizes = [1, 128], strides = [1, 1]} : vector<8x128xf32> to vector<1x128xf32>
    %129 = tpu.concatenate %127, %128 in 0 : vector<7x128xf32>, vector<1x128xf32> -> vector<8x128xf32>
    %c0_i32_45 = arith.constant 0 : i32
    %130 = vector.broadcast %c0_i32_45 : i32 to vector<8x128xi32>
    %131 = arith.cmpi eq, %123, %130 : vector<8x128xi32>
    %cst_46 = arith.constant 0.000000e+00 : f32
    %132 = vector.broadcast %cst_46 : f32 to vector<8x128xf32>
    %133 = arith.select %131, %132, %126 : vector<8x128xi1>, vector<8x128xf32>
    %134 = arith.addf %118, %133 : vector<8x128xf32>
    %c3_i32_47 = arith.constant 3 : i32
    %135 = vector.broadcast %c3_i32_47 : i32 to vector<8x128xi32>
    %136 = arith.cmpi eq, %123, %135 : vector<8x128xi32>
    %cst_48 = arith.constant 0.000000e+00 : f32
    %137 = vector.broadcast %cst_48 : f32 to vector<8x128xf32>
    %138 = arith.select %136, %137, %129 : vector<8x128xi1>, vector<8x128xf32>
    %139 = arith.addf %119, %138 : vector<8x128xf32>
    %140 = vector.shape_cast %134 : vector<8x128xf32> to vector<8x1x128xf32>
    %141 = vector.shape_cast %139 : vector<8x128xf32> to vector<8x1x128xf32>
    %142 = tpu.concatenate %140, %141 in 1 : vector<8x1x128xf32>, vector<8x1x128xf32> -> vector<8x2x128xf32>
    %143 = vector.shape_cast %142 : vector<8x2x128xf32> to vector<16x128xf32>
    %cst_49 = arith.constant dense<0.000000e+00> : vector<128xf32>
    %144 = vector.multi_reduction <add>, %143, %cst_49 [0] : vector<16x128xf32> to vector<128xf32>
    %145 = vector.shape_cast %144 : vector<128xf32> to vector<1x128xf32>
    %cst_50 = arith.constant 6.250000e-02 : f32
    %146 = vector.broadcast %cst_50 : f32 to vector<1x128xf32>
    %147 = arith.mulf %145, %146 : vector<1x128xf32>
    %148 = vector.broadcast %147 : vector<1x128xf32> to vector<16x128xf32>
    %149 = arith.subf %143, %148 : vector<16x128xf32>
    %150 = arith.mulf %149, %149 : vector<16x128xf32>
    %cst_51 = arith.constant dense<0.000000e+00> : vector<128xf32>
    %151 = vector.multi_reduction <add>, %150, %cst_51 [0] : vector<16x128xf32> to vector<128xf32>
    %152 = vector.shape_cast %151 : vector<128xf32> to vector<1x128xf32>
    %cst_52 = arith.constant 6.250000e-02 : f32
    %153 = vector.broadcast %cst_52 : f32 to vector<1x128xf32>
    %154 = arith.mulf %152, %153 : vector<1x128xf32>
    %c0_53 = arith.constant 0 : index
    %c0_54 = arith.constant 0 : index
    %155 = vector.load %arg11[%c0_53, %c0_54] : memref<1x128xf32, #tpu.memory_space<vmem>>, vector<1x128xf32>
    %cst_55 = arith.constant 9.99999974E-6 : f32
    %156 = vector.broadcast %cst_55 : f32 to vector<1x128xf32>
    %157 = arith.addf %154, %156 : vector<1x128xf32>
    %158 = math.rsqrt %157 : vector<1x128xf32>
    %159 = arith.mulf %155, %158 : vector<1x128xf32>
    %c0_56 = arith.constant 0 : index
    %c0_57 = arith.constant 0 : index
    %160 = vector.load %arg12[%c0_56, %c0_57] : memref<1x128xf32, #tpu.memory_space<vmem>>, vector<1x128xf32>
    %161 = arith.mulf %147, %159 : vector<1x128xf32>
    %162 = arith.subf %160, %161 : vector<1x128xf32>
    %163 = vector.broadcast %159 : vector<1x128xf32> to vector<16x128xf32>
    %164 = arith.mulf %143, %163 : vector<16x128xf32>
    %165 = vector.broadcast %162 : vector<1x128xf32> to vector<16x128xf32>
    %166 = arith.addf %164, %165 : vector<16x128xf32>
    %cst_58 = arith.constant 0.000000e+00 : f32
    %167 = vector.broadcast %cst_58 : f32 to vector<16x128xf32>
    %168 = arith.maximumf %166, %167 : vector<16x128xf32>
    %c0_59 = arith.constant 0 : index
    %c0_60 = arith.constant 0 : index
    %169 = vector.load %arg13[%c0_59, %c0_60] : memref<128x512xf32, #tpu.memory_space<vmem>>, vector<128x512xf32>
    %cst_61 = arith.constant dense<0.000000e+00> : vector<16x512xf32>
    %170 = tpu.matmul %168, %169, %cst_61 {dimension_numbers = #tpu.dot_dimension_numbers<[1], [0], [0], [1], [0, 0, 1, 1], [], []>} : vector<16x128xf32>, vector<128x512xf32>, vector<16x512xf32> -> vector<16x512xf32>
    %171 = vector.extract_strided_slice %170 {offsets = [0, 0], sizes = [16, 128], strides = [1, 1]} : vector<16x512xf32> to vector<16x128xf32>
    %172 = vector.extract_strided_slice %170 {offsets = [0, 128], sizes = [16, 128], strides = [1, 1]} : vector<16x512xf32> to vector<16x128xf32>
    %173 = vector.extract_strided_slice %170 {offsets = [0, 256], sizes = [16, 128], strides = [1, 1]} : vector<16x512xf32> to vector<16x128xf32>
    %174 = vector.extract_strided_slice %170 {offsets = [0, 384], sizes = [16, 128], strides = [1, 1]} : vector<16x512xf32> to vector<16x128xf32>
    %175 = tpu.iota {dimensions = array<i32: 0>} : vector<16x128xi32>
    %c7_i32 = arith.constant 7 : i32
    %176 = vector.broadcast %c7_i32 : i32 to vector<16x128xi32>
    %177 = arith.andi %175, %176 : vector<16x128xi32>
    %178 = vector.extract_strided_slice %174 {offsets = [15, 0], sizes = [1, 128], strides = [1, 1]} : vector<16x128xf32> to vector<1x128xf32>
    %179 = vector.extract_strided_slice %174 {offsets = [0, 0], sizes = [15, 128], strides = [1, 1]} : vector<16x128xf32> to vector<15x128xf32>
    %180 = tpu.concatenate %178, %179 in 0 : vector<1x128xf32>, vector<15x128xf32> -> vector<16x128xf32>
    %181 = vector.extract_strided_slice %171 {offsets = [1, 0], sizes = [15, 128], strides = [1, 1]} : vector<16x128xf32> to vector<15x128xf32>
    %182 = vector.extract_strided_slice %171 {offsets = [0, 0], sizes = [1, 128], strides = [1, 1]} : vector<16x128xf32> to vector<1x128xf32>
    %183 = tpu.concatenate %181, %182 in 0 : vector<15x128xf32>, vector<1x128xf32> -> vector<16x128xf32>
    %c0_i32_62 = arith.constant 0 : i32
    %184 = vector.broadcast %c0_i32_62 : i32 to vector<16x128xi32>
    %185 = arith.cmpi eq, %177, %184 : vector<16x128xi32>
    %cst_63 = arith.constant 0.000000e+00 : f32
    %186 = vector.broadcast %cst_63 : f32 to vector<16x128xf32>
    %187 = arith.select %185, %186, %180 : vector<16x128xi1>, vector<16x128xf32>
    %188 = arith.addf %172, %187 : vector<16x128xf32>
    %c7_i32_64 = arith.constant 7 : i32
    %189 = vector.broadcast %c7_i32_64 : i32 to vector<16x128xi32>
    %190 = arith.cmpi eq, %177, %189 : vector<16x128xi32>
    %cst_65 = arith.constant 0.000000e+00 : f32
    %191 = vector.broadcast %cst_65 : f32 to vector<16x128xf32>
    %192 = arith.select %190, %191, %183 : vector<16x128xi1>, vector<16x128xf32>
    %193 = arith.addf %173, %192 : vector<16x128xf32>
    %194 = vector.shape_cast %188 : vector<16x128xf32> to vector<16x1x128xf32>
    %195 = vector.shape_cast %193 : vector<16x128xf32> to vector<16x1x128xf32>
    %196 = tpu.concatenate %194, %195 in 1 : vector<16x1x128xf32>, vector<16x1x128xf32> -> vector<16x2x128xf32>
    %197 = vector.shape_cast %196 : vector<16x2x128xf32> to vector<32x128xf32>
    %cst_66 = arith.constant dense<0.000000e+00> : vector<128xf32>
    %198 = vector.multi_reduction <add>, %197, %cst_66 [0] : vector<32x128xf32> to vector<128xf32>
    %199 = vector.shape_cast %198 : vector<128xf32> to vector<1x128xf32>
    %cst_67 = arith.constant 3.125000e-02 : f32
    %200 = vector.broadcast %cst_67 : f32 to vector<1x128xf32>
    %201 = arith.mulf %199, %200 : vector<1x128xf32>
    %202 = vector.broadcast %201 : vector<1x128xf32> to vector<32x128xf32>
    %203 = arith.subf %197, %202 : vector<32x128xf32>
    %204 = arith.mulf %203, %203 : vector<32x128xf32>
    %cst_68 = arith.constant dense<0.000000e+00> : vector<128xf32>
    %205 = vector.multi_reduction <add>, %204, %cst_68 [0] : vector<32x128xf32> to vector<128xf32>
    %206 = vector.shape_cast %205 : vector<128xf32> to vector<1x128xf32>
    %cst_69 = arith.constant 3.125000e-02 : f32
    %207 = vector.broadcast %cst_69 : f32 to vector<1x128xf32>
    %208 = arith.mulf %206, %207 : vector<1x128xf32>
    %c0_70 = arith.constant 0 : index
    %c0_71 = arith.constant 0 : index
    %209 = vector.load %arg14[%c0_70, %c0_71] : memref<1x128xf32, #tpu.memory_space<vmem>>, vector<1x128xf32>
    %cst_72 = arith.constant 9.99999974E-6 : f32
    %210 = vector.broadcast %cst_72 : f32 to vector<1x128xf32>
    %211 = arith.addf %208, %210 : vector<1x128xf32>
    %212 = math.rsqrt %211 : vector<1x128xf32>
    %213 = arith.mulf %209, %212 : vector<1x128xf32>
    %c0_73 = arith.constant 0 : index
    %c0_74 = arith.constant 0 : index
    %214 = vector.load %arg15[%c0_73, %c0_74] : memref<1x128xf32, #tpu.memory_space<vmem>>, vector<1x128xf32>
    %215 = arith.mulf %201, %213 : vector<1x128xf32>
    %216 = arith.subf %214, %215 : vector<1x128xf32>
    %217 = vector.broadcast %213 : vector<1x128xf32> to vector<32x128xf32>
    %218 = arith.mulf %197, %217 : vector<32x128xf32>
    %219 = vector.broadcast %216 : vector<1x128xf32> to vector<32x128xf32>
    %220 = arith.addf %218, %219 : vector<32x128xf32>
    %221 = math.tanh %220 : vector<32x128xf32>
    %c0_75 = arith.constant 0 : index
    %c0_76 = arith.constant 0 : index
    %222 = vector.load %arg16[%c0_75, %c0_76] : memref<32x128xf32, #tpu.memory_space<vmem>>, vector<32x128xf32>
    tpu.vector_store %arg16[%c0_75, %c0_76], %221 {strides = array<i32>} : memref<32x128xf32, #tpu.memory_space<vmem>>, vector<32x128xf32>,
    return
  }
}

</mosaic_0001>

<bundles_post_ra>
// kernel: tpu_custom_call.1
= control target key start
LH: loop header
LB: loop body
LE: loop exit
PB: predicated region body
PF: predicated region fallthrough
CT: control target
= control target key end

     0   :  { %s4814_s0 = inlined_call_operand.hbm [shape: f32[2,128], index: 0, kind: input, shape index: {}]   ;;  %s4815_s1 = inlined_call_operand.hbm [shape: f32[128,512], index: 1, kind: input, shape index: {}]   ;;  %s4816_s2 = inlined_call_operand.hbm [shape: f32[1,512], index: 2, kind: input, shape index: {}]   ;;  %s4817_s3 = inlined_call_operand.hbm [shape: f32[1,512], index: 3, kind: input, shape index: {}]   ;;  %s4818_s4 = inlined_call_operand.hbm [shape: f32[512,1024], index: 4, kind: input, shape index: {}]   ;;  %s4819_s5 = inlined_call_operand.hbm [shape: f32[1,256], index: 5, kind: input, shape index: {}]   ;;  %s4820_s6 = inlined_call_operand.hbm [shape: f32[1,256], index: 6, kind: input, shape index: {}]   ;;  %s4821_s7 = inlined_call_operand.hbm [shape: f32[256,512], index: 7, kind: input, shape index: {}]   ;;  %s4822_s8 = inlined_call_operand.hbm [shape: f32[1,128], index: 8, kind: input, shape index: {}]   ;;  %s4823_s9 = inlined_call_operand.hbm [shape: f32[1,128], index: 9, kind: input, shape index: {}]   ;;  %s4824_s10 = inlined_call_operand.hbm [shape: f32[128,512], index: 10, kind: input, shape index: {}]   ;;  %s4825_s11 = inlined_call_operand.hbm [shape: f32[1,128], index: 11, kind: input, shape index: {}]   ;;  %s4826_s12 = inlined_call_operand.hbm [shape: f32[1,128], index: 12, kind: input, shape index: {}]   ;;  %s4827_s13 = inlined_call_operand.hbm [shape: f32[128,512], index: 13, kind: input, shape index: {}]   ;;  %s4828_s14 = inlined_call_operand.hbm [shape: f32[1,128], index: 14, kind: input, shape index: {}]   ;;  %s4829_s15 = inlined_call_operand.hbm [shape: f32[1,128], index: 15, kind: input, shape index: {}]   ;;  %s4830_s16 = inlined_call_operand.hbm [shape: f32[32,128], index: 16, kind: output, shape index: {}]  }
   0x1   :  { %4831 = sst [smem:[#allocation39_spill]] %s4814_s0 }
   0x2   :  { %21 = vsyncpa [#allocation3], 0 }
   0x3   :  { %22 = vsyncpa [#allocation6], 0 }
   0x4   :  { %23 = vsyncpa [#allocation9], 0 }
   0x5   :  { %24 = vsyncpa [#allocation12], 0 }
   0x6   :  { %25 = vsyncpa [#allocation15], 0 }
   0x7   :  { %26 = vsyncpa [#allocation18], 0 }
   0x8   :  { %27 = vsyncpa [#allocation21], 0 }
   0x9   :  { %28 = vsyncpa [#allocation24], 0 }
   0xa   :  { %29 = vsyncpa [#allocation27], 0 }
   0xb   :  { %30 = vsyncpa [#allocation4], 0  ;;  %s4166_s21 = smov [#allocation5]  }
   0xc   :  { %s46_s22 = sshll.u32 %s4166_s21, 4  ;;  %s47_s22 = int_to_ptr.vmem [resolvable:$true] %s46_s22 }
   0xd   :  { %s3814_s23 = scalar_lea.vmem %s47_s22, 8192  ;;  %p3819_p1 = scmp.lt.s32.totalorder %s47_s22, %s47_s22 }
   0xe   :  { %p3815_p0 = scmp.ne.s32.totalorder %s47_s22, %s3814_s23  ;;  %p3820_p2 = scmp.lt.s32.totalorder %s3814_s23, %s3814_s23 }
  0x10   :  { %p3821_p3 = por %p3820_p2, %p3819_p1 }
  0x12   :  { %p3822_p4 = pnand %p3821_p3, %p3815_p0 }
  0x14   :  { %3825 = shalt.err (!%p3822_p4)
}
  0x15   :  { %s4167_s24 = smov 512   ;;  %s4168_s25 = smov 32  }
  0x16   :  { %52 = dma.hbm_to_vmem [thread:$0]  %s4815_s1, 8192, %s47_s22, [#allocation6], %s4167_s24, %s4167_s24, %s4168_s25  }
  0x17   :  { %s4169_s28 = smov [#allocation8]   ;;  %s4170_s30 = smov [#allocation11]  }
  0x18   :  { %s69_s29 = sshll.u32 %s4169_s28, 4  ;;  %s91_s0 = sshll.u32 %s4170_s30, 4  ;;  %s70_s29 = int_to_ptr.vmem [resolvable:$true] %s69_s29  ;;  %s92_s0 = int_to_ptr.vmem [resolvable:$true] %s91_s0 }
  0x19   :  { %s3834_s17 = scalar_lea.vmem %s70_s29, 64  ;;  %p3839_p6 = scmp.lt.s32.totalorder %s70_s29, %s70_s29 }
  0x1a   :  { %p3835_p5 = scmp.ne.s32.totalorder %s70_s29, %s3834_s17  ;;  %p3840_p7 = scmp.lt.s32.totalorder %s3834_s17, %s3834_s17 }
  0x1c   :  { %p3841_p8 = por %p3840_p7, %p3839_p6 }
  0x1e   :  { %p3842_p9 = pnand %p3841_p8, %p3835_p5 }
  0x20   :  { %3845 = shalt.err (!%p3842_p9)
}
  0x21   :  { %72 = dma.hbm_to_vmem [thread:$0]  %s4817_s3, 64, %s70_s29, [#allocation9]  }
  0x22   :  { %s3854_s20 = scalar_lea.vmem %s92_s0, 32  ;;  %p3859_p11 = scmp.lt.s32.totalorder %s92_s0, %s92_s0 }
  0x23   :  { %p3855_p10 = scmp.ne.s32.totalorder %s92_s0, %s3854_s20  ;;  %p3860_p12 = scmp.lt.s32.totalorder %s3854_s20, %s3854_s20 }
  0x25   :  { %p3861_p13 = por %p3860_p12, %p3859_p11 }
  0x27   :  { %p3862_p0 = pnand %p3861_p13, %p3855_p10 }
  0x29   :  { %3865 = shalt.err (!%p3862_p0)
}
  0x2a   :  { %94 = dma.hbm_to_vmem [thread:$0]  %s4819_s5, 32, %s92_s0, [#allocation12]  }
  0x2b   :  { %s4171_s22 = smov [#allocation14]   ;;  %s4172_s26 = smov [#allocation17]  }
  0x2c   :  { %s110_s23 = sshll.u32 %s4171_s22, 4  ;;  %s133_s27 = sshll.u32 %s4172_s26, 4  ;;  %s111_s23 = int_to_ptr.vmem [resolvable:$true] %s110_s23  ;;  %s134_s27 = int_to_ptr.vmem [resolvable:$true] %s133_s27 }
  0x2d   :  { %s3874_s28 = scalar_lea.vmem %s111_s23, 16384  ;;  %p3879_p2 = scmp.lt.s32.totalorder %s111_s23, %s111_s23 }
  0x2e   :  { %p3875_p1 = scmp.ne.s32.totalorder %s111_s23, %s3874_s28  ;;  %p3880_p3 = scmp.lt.s32.totalorder %s3874_s28, %s3874_s28 }
  0x30   :  { %p3881_p4 = por %p3880_p3, %p3879_p2 }
  0x32   :  { %p3882_p5 = pnand %p3881_p4, %p3875_p1 }
  0x34   :  { %3885 = shalt.err (!%p3882_p5)
}
  0x35   :  { %116 = dma.hbm_to_vmem [thread:$0]  %s4821_s7, 16384, %s111_s23, [#allocation15], %s4167_s24, %s4167_s24, %s4168_s25  }
  0x36   :  { %s3894_s5 = scalar_lea.vmem %s134_s27, 16  ;;  %s3898_s30 = scalar_lea.vmem %s134_s27, 32 }
  0x37   :  { %p3895_p6 = scmp.ne.s32.totalorder %s134_s27, %s3894_s5  ;;  %p3899_p7 = scmp.lt.s32.totalorder %s134_s27, %s134_s27 }
  0x38   :  { %p3900_p8 = scmp.lt.s32.totalorder %s3898_s30, %s3894_s5 }
  0x3a   :  { %p3901_p9 = por %p3900_p8, %p3899_p7 }
  0x3c   :  { %p3902_p10 = pnand %p3901_p9, %p3895_p6 }
  0x3e   :  { %3905 = shalt.err (!%p3902_p10)
}
  0x3f   :  { %136 = dma.hbm_to_vmem [thread:$0]  %s4823_s9, 16, %s134_s27, [#allocation18]  }
  0x40   :  { %s4173_s18 = smov [#allocation20]   ;;  %s4174_s20 = smov [#allocation23]  }
  0x41   :  { %s155_s19 = sshll.u32 %s4173_s18, 4  ;;  %s174_s1 = sshll.u32 %s4174_s20, 4  ;;  %s156_s19 = int_to_ptr.vmem [resolvable:$true] %s155_s19  ;;  %s175_s1 = int_to_ptr.vmem [resolvable:$true] %s174_s1 }
  0x42   :  { %s3914_s21 = scalar_lea.vmem %s156_s19, 16  ;;  %s3918_s7 = scalar_lea.vmem %s156_s19, 32 }
  0x43   :  { %p3915_p11 = scmp.ne.s32.totalorder %s156_s19, %s3914_s21  ;;  %p3919_p12 = scmp.lt.s32.totalorder %s156_s19, %s156_s19 }
  0x44   :  { %p3920_p13 = scmp.lt.s32.totalorder %s3918_s7, %s3914_s21 }
  0x46   :  { %p3921_p0 = por %p3920_p13, %p3919_p12 }
  0x48   :  { %p3922_p1 = pnand %p3921_p0, %p3915_p11 }
  0x4a   :  { %3925 = shalt.err (!%p3922_p1)
}
  0x4b   :  { %158 = dma.hbm_to_vmem [thread:$0]  %s4825_s11, 16, %s156_s19, [#allocation21]  }
  0x4c   :  { %s3934_s26 = scalar_lea.vmem %s175_s1, 8192  ;;  %p3939_p3 = scmp.lt.s32.totalorder %s175_s1, %s175_s1 }
  0x4d   :  { %p3935_p2 = scmp.ne.s32.totalorder %s175_s1, %s3934_s26  ;;  %p3940_p4 = scmp.lt.s32.totalorder %s3934_s26, %s3934_s26 }
  0x4f   :  { %p3941_p5 = por %p3940_p4, %p3939_p3 }
  0x51   :  { %p3942_p6 = pnand %p3941_p5, %p3935_p2 }
  0x53   :  { %3945 = shalt.err (!%p3942_p6)
}
  0x54   :  { %180 = dma.hbm_to_vmem [thread:$0]  %s4827_s13, 8192, %s175_s1, [#allocation24], %s4167_s24, %s4167_s24, %s4168_s25  }
  0x55   :  { %s4175_s28 = smov [#allocation2]   ;;  %s4176_s29 = smov [#allocation7]  }
  0x56   :  { %s37_s3 = sshll.u32 %s4175_s28, 4  ;;  %s59_s11 = sshll.u32 %s4176_s29, 4  ;;  %s38_s3 = int_to_ptr.vmem [resolvable:$true] %s37_s3  ;;  %s60_s11 = int_to_ptr.vmem [resolvable:$true] %s59_s11 }
  0x57   :  { %s3954_s5 = scalar_lea.vmem %s38_s3, 32  ;;  %p3959_p8 = scmp.lt.s32.totalorder %s38_s3, %s38_s3 }
  0x58   :  { %p3955_p7 = scmp.ne.s32.totalorder %s38_s3, %s3954_s5  ;;  %p3960_p9 = scmp.lt.s32.totalorder %s3954_s5, %s3954_s5 }
  0x5a   :  { %p3961_p10 = por %p3960_p9, %p3959_p8 }
  0x5c   :  { %p3962_p11 = pnand %p3961_p10, %p3955_p7 }
  0x5e   :  { %3965 = shalt.err (!%p3962_p11)
}
  0x5f   :  { %s4832_s17 = sld [smem:[#allocation39_spill]]  ;;  %s3974_s18 = scalar_lea.vmem %s60_s11, 64 }
  0x60   :  { %p3975_p12 = scmp.ne.s32.totalorder %s60_s11, %s3974_s18  ;;  %p3979_p13 = scmp.lt.s32.totalorder %s60_s11, %s60_s11 }
  0x61   :  { %p3980_p0 = scmp.lt.s32.totalorder %s3974_s18, %s3974_s18 }
  0x63   :  { %p3981_p1 = por %p3980_p0, %p3979_p13 }
  0x65   :  { %40 = dma.hbm_to_vmem [thread:$0]  %s4832_s17, 32, %s38_s3, [#allocation3]  }
  0x66   :  { %p3982_p2 = pnand %p3981_p1, %p3975_p12 }
  0x68   :  { %3985 = shalt.err (!%p3982_p2)
}
  0x69   :  { %62 = dma.hbm_to_vmem [thread:$0]  %s4816_s2, 64, %s60_s11, [#allocation6]  }
  0x6a   :  { %s4177_s20 = smov [#allocation10]  }
  0x6b   :  { %s78_s1 = sshll.u32 %s4177_s20, 4  ;;  %s79_s1 = int_to_ptr.vmem [resolvable:$true] %s78_s1 }
  0x6c   :  { %s3994_s21 = scalar_lea.vmem %s79_s1, 65536  ;;  %p3999_p4 = scmp.lt.s32.totalorder %s79_s1, %s79_s1 }
  0x6d   :  { %p3995_p3 = scmp.ne.s32.totalorder %s79_s1, %s3994_s21  ;;  %p4000_p5 = scmp.lt.s32.totalorder %s3994_s21, %s3994_s21 }
  0x6f   :  { %p4001_p6 = por %p4000_p5, %p3999_p4 }
  0x71   :  { %p4002_p7 = pnand %p4001_p6, %p3995_p3 }
  0x73   :  { %4005 = shalt.err (!%p4002_p7)
}
  0x74   :  { %s4178_s7 = smov 1024   ;;  %s4179_s22 = smov 64  }
  0x75   :  { %84 = dma.hbm_to_vmem [thread:$0]  %s4818_s4, 65536, %s79_s1, [#allocation9], %s4178_s7, %s4178_s7, %s4179_s22  }
  0x76   :  { %s4180_s9 = smov [#allocation13]   ;;  %s4181_s28 = smov [#allocation16]  }
  0x77   :  { %s101_s27 = sshll.u32 %s4180_s9, 4  ;;  %s123_s2 = sshll.u32 %s4181_s28, 4  ;;  %s102_s27 = int_to_ptr.vmem [resolvable:$true] %s101_s27  ;;  %s124_s2 = int_to_ptr.vmem [resolvable:$true] %s123_s2 }
  0x78   :  { %s4014_s3 = scalar_lea.vmem %s102_s27, 32  ;;  %p4019_p9 = scmp.lt.s32.totalorder %s102_s27, %s102_s27 }
  0x79   :  { %p4015_p8 = scmp.ne.s32.totalorder %s102_s27, %s4014_s3  ;;  %p4020_p10 = scmp.lt.s32.totalorder %s4014_s3, %s4014_s3 }
  0x7b   :  { %p4021_p11 = por %p4020_p10, %p4019_p9 }
  0x7d   :  { %p4022_p12 = pnand %p4021_p11, %p4015_p8 }
  0x7f   :  { %4025 = shalt.err (!%p4022_p12)
}
  0x80   :  { %104 = dma.hbm_to_vmem [thread:$0]  %s4820_s6, 32, %s102_s27, [#allocation12]  }
  0x81   :  { %s4034_s5 = scalar_lea.vmem %s124_s2, 16  ;;  %s4038_s4 = scalar_lea.vmem %s124_s2, 32 }
  0x82   :  { %p4035_p13 = scmp.ne.s32.totalorder %s124_s2, %s4034_s5  ;;  %p4039_p0 = scmp.lt.s32.totalorder %s124_s2, %s124_s2 }
  0x83   :  { %p4040_p1 = scmp.lt.s32.totalorder %s4038_s4, %s4034_s5 }
  0x85   :  { %p4041_p2 = por %p4040_p1, %p4039_p0 }
  0x87   :  { %p4042_p3 = pnand %p4041_p2, %p4035_p13 }
  0x89   :  { %4045 = shalt.err (!%p4042_p3)
}
  0x8a   :  { %126 = dma.hbm_to_vmem [thread:$0]  %s4822_s8, 16, %s124_s2, [#allocation15]  }
  0x8b   :  { %s4182_s17 = smov [#allocation19]   ;;  %s4183_s13 = smov [#allocation22]  }
  0x8c   :  { %s142_s18 = sshll.u32 %s4182_s17, 4  ;;  %s165_s19 = sshll.u32 %s4183_s13, 4  ;;  %s143_s18 = int_to_ptr.vmem [resolvable:$true] %s142_s18  ;;  %s166_s19 = int_to_ptr.vmem [resolvable:$true] %s165_s19 }
  0x8d   :  { %s4054_s20 = scalar_lea.vmem %s143_s18, 8192  ;;  %p4059_p5 = scmp.lt.s32.totalorder %s143_s18, %s143_s18 }
  0x8e   :  { %p4055_p4 = scmp.ne.s32.totalorder %s143_s18, %s4054_s20  ;;  %p4060_p6 = scmp.lt.s32.totalorder %s4054_s20, %s4054_s20 }
  0x90   :  { %p4061_p7 = por %p4060_p6, %p4059_p5 }
  0x92   :  { %p4062_p8 = pnand %p4061_p7, %p4055_p4 }
  0x94   :  { %4065 = shalt.err (!%p4062_p8)
}
  0x95   :  { %148 = dma.hbm_to_vmem [thread:$0]  %s4824_s10, 8192, %s143_s18, [#allocation18], %s4167_s24, %s4167_s24, %s4168_s25  }
  0x96   :  { %s4074_s8 = scalar_lea.vmem %s166_s19, 16  ;;  %s4078_s21 = scalar_lea.vmem %s166_s19, 32 }
  0x97   :  { %p4075_p9 = scmp.ne.s32.totalorder %s166_s19, %s4074_s8  ;;  %p4079_p10 = scmp.lt.s32.totalorder %s166_s19, %s166_s19 }
  0x98   :  { %p4080_p11 = scmp.lt.s32.totalorder %s4078_s21, %s4074_s8 }
  0x9a   :  { %p4081_p12 = por %p4080_p11, %p4079_p10 }
  0x9c   :  { %p4082_p13 = pnand %p4081_p12, %p4075_p9 }
  0x9e   :  { %4085 = shalt.err (!%p4082_p13)
}
  0x9f   :  { %168 = dma.hbm_to_vmem [thread:$0]  %s4826_s12, 16, %s166_s19, [#allocation21]  }
  0xa0   :  { %s4184_s23 = smov [#allocation25]   ;;  %s4185_s9 = smov [#allocation26]  }
  0xa1   :  { %s187_s26 = sshll.u32 %s4184_s23, 4  ;;  %s197_s27 = sshll.u32 %s4185_s9, 4  ;;  %s188_s26 = int_to_ptr.vmem [resolvable:$true] %s187_s26  ;;  %s198_s27 = int_to_ptr.vmem [resolvable:$true] %s197_s27 }
  0xa2   :  { %s4094_s28 = scalar_lea.vmem %s188_s26, 16  ;;  %s4098_s10 = scalar_lea.vmem %s188_s26, 32 }
  0xa3   :  { %p4095_p0 = scmp.ne.s32.totalorder %s188_s26, %s4094_s28  ;;  %p4099_p1 = scmp.lt.s32.totalorder %s188_s26, %s188_s26 }
  0xa4   :  { %p4100_p2 = scmp.lt.s32.totalorder %s4098_s10, %s4094_s28 }
  0xa6   :  { %p4101_p3 = por %p4100_p2, %p4099_p1 }
  0xa8   :  { %p4102_p4 = pnand %p4101_p3, %p4095_p0 }
  0xaa   :  { %4105 = shalt.err (!%p4102_p4)
}
  0xab   :  { %190 = dma.hbm_to_vmem [thread:$0]  %s4828_s14, 16, %s188_s26, [#allocation24]  }
  0xac   :  { %s4114_s2 = scalar_lea.vmem %s198_s27, 16  ;;  %s4118_s12 = scalar_lea.vmem %s198_s27, 32 }
  0xad   :  { %p4115_p5 = scmp.ne.s32.totalorder %s198_s27, %s4114_s2  ;;  %p4119_p6 = scmp.lt.s32.totalorder %s198_s27, %s198_s27 }
  0xae   :  { %p4120_p7 = scmp.lt.s32.totalorder %s4118_s12, %s4114_s2 }
  0xb0   :  { %p4121_p8 = por %p4120_p7, %p4119_p6 }
  0xb2   :  { %p4122_p9 = pnand %p4121_p8, %p4115_p5 }
  0xb4   :  { %4125 = shalt.err (!%p4122_p9)
}
  0xb5   :  { %200 = dma.hbm_to_vmem [thread:$0]  %s4829_s15, 16, %s198_s27, [#allocation27]  }
  0xb6   :  { %4146 = dma.done.wait [#allocation3], 32  }
  0xb7   :  { %4147 = vsyncadd [#allocation3], 4294967264 }
  0xb8   :  { %4148 = dma.done.wait [#allocation6], 8256  }
  0xb9   :  { %4149 = vsyncadd [#allocation6], 4294959040 }
  0xba   :  { %4150 = dma.done.wait [#allocation9], 65600  }
  0xbb   :  { %4151 = vsyncadd [#allocation9], 4294901696 }
  0xbc   :  { %4152 = dma.done.wait [#allocation12], 64  }
  0xbd   :  { %4153 = vsyncadd [#allocation12], 4294967232 }
  0xbe   :  { %4154 = dma.done.wait [#allocation15], 16400  }
  0xbf   :  { %4155 = vsyncadd [#allocation15], 4294950896 }
  0xc0   :  { %4156 = dma.done.wait [#allocation18], 8208  }
  0xc1   :  { %4157 = vsyncadd [#allocation18], 4294959088 }
  0xc2   :  { %4158 = dma.done.wait [#allocation21], 32  }
  0xc3   :  { %4159 = vsyncadd [#allocation21], 4294967264 }
  0xc4   :  { %4160 = dma.done.wait [#allocation24], 8208  }
  0xc5   :  { %4161 = vsyncadd [#allocation24], 4294959088 }
  0xc6   :  { %4162 = dma.done.wait [#allocation27], 16  }
  0xc7   :  { %4163 = vsyncadd [#allocation27], 4294967280  ;;  %v4186_v0 = vmov 0.0   ;;  %v311_v1 = vld [vmem:[#allocation5 + $0x1e8] sm:$0xff]  ;;  %v313_v2 = vld [vmem:[#allocation5 + $0x1f8] sm:$0xff]  ;;  %vm456_vm0 = vcmask 1041408  }
  0xc8   :  { %378 = vmatprep.mubr.f32.mxu0 %v4186_v0  ;;  %449 = vmatprep.mubr.f32.mxu1 %v4186_v0  ;;  %v310_v3 = vld [vmem:[#allocation5 + $0x1e0] sm:$0xff]  ;;  %v312_v4 = vld [vmem:[#allocation5 + $0x1f0] sm:$0xff]  ;;  %v307_v5 = vld [vmem:[#allocation5 + $0x1c8] sm:$0xff]  ;;  %vm1287_vm1 = vcmask 1040384   ;;  %vm1325_vm2 = vcmask 1043456   ;;  %vm1779_vm3 = vcmask 1042432  }
  0xc9   :  { %314 = vmatprep.subr.mxu0 %v311_v1  ;;  %385 = vmatprep.subr.mxu1 %v313_v2  ;;  %v309_v6 = vld [vmem:[#allocation5 + $0x1d8] sm:$0xff]  ;;  %v306_v7 = vld [vmem:[#allocation5 + $0x1c0] sm:$0xff]  ;;  %v308_v8 = vld [vmem:[#allocation5 + $0x1d0] sm:$0xff]  ;;  %vm2260_vm8 = vcmask 1046528   ;;  %s4189_s14 = smov [#allocation28]  }
  0xca   :  { %315 = vmatpush1.msra.mxu0 %v310_v3  ;;  %386 = vmatpush1.msra.mxu1 %v312_v4  ;;  %v303_v9 = vld [vmem:[#allocation5 + $0x1a8] sm:$0xff]  ;;  %v305_v10 = vld [vmem:[#allocation5 + $0x1b8] sm:$0xff]  ;;  %v302_v11 = vld [vmem:[#allocation5 + $0x1a0] sm:$0xff]  ;;  %s3710_s15 = sshll.u32 %s4189_s14, 4  ;;  %s3711_s15 = int_to_ptr.vmem [resolvable:$true] %s3710_s15 }
  0xcb   :  { %316 = vmatprep.subr.mxu0 %v307_v5  ;;  %387 = vmatprep.subr.mxu1 %v309_v6  ;;  %v304_v12 = vld [vmem:[#allocation5 + $0x1b0] sm:$0xff]  ;;  %v299_v13 = vld [vmem:[#allocation5 + $0x188] sm:$0xff]  ;;  %v301_v14 = vld [vmem:[#allocation5 + $0x198] sm:$0xff]  ;;  %s4126_s11 = scalar_lea.vmem %s3711_s15, 512  ;;  %p4131_p11 = scmp.lt.s32.totalorder %s3711_s15, %s3711_s15 }
  0xcc   :  { %317 = vmatpush1.msra.mxu0 %v306_v7  ;;  %388 = vmatpush1.msra.mxu1 %v308_v8  ;;  %v298_v15 = vld [vmem:[#allocation5 + $0x180] sm:$0xff]  ;;  %v300_v16 = vld [vmem:[#allocation5 + $0x190] sm:$0xff]  ;;  %v295_v17 = vld [vmem:[#allocation5 + $0x168] sm:$0xff]  ;;  %p4127_p10 = scmp.ne.s32.totalorder %s3711_s15, %s4126_s11  ;;  %p4132_p12 = scmp.lt.s32.totalorder %s4126_s11, %s4126_s11 }
  0xcd   :  { %318 = vmatprep.subr.mxu0 %v303_v9  ;;  %389 = vmatprep.subr.mxu1 %v305_v10  ;;  %v297_v18 = vld [vmem:[#allocation5 + $0x178] sm:$0xff]  ;;  %v294_v19 = vld [vmem:[#allocation5 + $0x160] sm:$0xff]  ;;  %v296_v20 = vld [vmem:[#allocation5 + $0x170] sm:$0xff] }
  0xce   :  { %319 = vmatpush1.msra.mxu0 %v302_v11  ;;  %390 = vmatpush1.msra.mxu1 %v304_v12  ;;  %v291_v21 = vld [vmem:[#allocation5 + $0x148] sm:$0xff]  ;;  %v293_v22 = vld [vmem:[#allocation5 + $0x158] sm:$0xff]  ;;  %v290_v23 = vld [vmem:[#allocation5 + $0x140] sm:$0xff]  ;;  %p4133_p13 = por %p4132_p12, %p4131_p11 }
  0xcf   :  { %320 = vmatprep.subr.mxu0 %v299_v13  ;;  %391 = vmatprep.subr.mxu1 %v301_v14  ;;  %v292_v24 = vld [vmem:[#allocation5 + $0x150] sm:$0xff]  ;;  %v287_v25 = vld [vmem:[#allocation5 + $0x128] sm:$0xff]  ;;  %v289_v26 = vld [vmem:[#allocation5 + $0x138] sm:$0xff] }
  0xd0   :  { %321 = vmatpush1.msra.mxu0 %v298_v15  ;;  %392 = vmatpush1.msra.mxu1 %v300_v16  ;;  %v286_v27 = vld [vmem:[#allocation5 + $0x120] sm:$0xff]  ;;  %v288_v28 = vld [vmem:[#allocation5 + $0x130] sm:$0xff]  ;;  %v283_v29 = vld [vmem:[#allocation5 + $0x108] sm:$0xff]  ;;  %p4134_p0 = pnand %p4133_p13, %p4127_p10 }
  0xd1   :  { %322 = vmatprep.subr.mxu0 %v295_v17  ;;  %393 = vmatprep.subr.mxu1 %v297_v18  ;;  %v285_v30 = vld [vmem:[#allocation5 + $0x118] sm:$0xff]  ;;  %v282_v31 = vld [vmem:[#allocation5 + $0x100] sm:$0xff]  ;;  %v284_v32 = vld [vmem:[#allocation5 + $0x110] sm:$0xff] }
  0xd2   :  { %323 = vmatpush1.msra.mxu0 %v294_v19  ;;  %394 = vmatpush1.msra.mxu1 %v296_v20  ;;  %v279_v33 = vld [vmem:[#allocation5 + $0xe8] sm:$0xff]  ;;  %v281_v34 = vld [vmem:[#allocation5 + $0xf8] sm:$0xff]  ;;  %v278_v35 = vld [vmem:[#allocation5 + $0xe0] sm:$0xff] }
  0xd3   :  { %324 = vmatprep.subr.mxu0 %v291_v21  ;;  %395 = vmatprep.subr.mxu1 %v293_v22  ;;  %v280_v36 = vld [vmem:[#allocation5 + $0xf0] sm:$0xff]  ;;  %v275_v37 = vld [vmem:[#allocation5 + $0xc8] sm:$0xff]  ;;  %v277_v38 = vld [vmem:[#allocation5 + $0xd8] sm:$0xff] }
  0xd4   :  { %325 = vmatpush1.msra.mxu0 %v290_v23  ;;  %396 = vmatpush1.msra.mxu1 %v292_v24  ;;  %v274_v39 = vld [vmem:[#allocation5 + $0xc0] sm:$0xff]  ;;  %v276_v40 = vld [vmem:[#allocation5 + $0xd0] sm:$0xff]  ;;  %v271_v41 = vld [vmem:[#allocation5 + $0xa8] sm:$0xff] }
  0xd5   :  { %326 = vmatprep.subr.mxu0 %v287_v25  ;;  %397 = vmatprep.subr.mxu1 %v289_v26  ;;  %v273_v42 = vld [vmem:[#allocation5 + $0xb8] sm:$0xff]  ;;  %v270_v43 = vld [vmem:[#allocation5 + $0xa0] sm:$0xff]  ;;  %v272_v44 = vld [vmem:[#allocation5 + $0xb0] sm:$0xff] }
  0xd6   :  { %327 = vmatpush1.msra.mxu0 %v286_v27  ;;  %398 = vmatpush1.msra.mxu1 %v288_v28  ;;  %v267_v45 = vld [vmem:[#allocation5 + $0x88] sm:$0xff]  ;;  %v269_v46 = vld [vmem:[#allocation5 + $0x98] sm:$0xff]  ;;  %v266_v47 = vld [vmem:[#allocation5 + $0x80] sm:$0xff] }
  0xd7   :  { %328 = vmatprep.subr.mxu0 %v283_v29  ;;  %399 = vmatprep.subr.mxu1 %v285_v30  ;;  %v268_v48 = vld [vmem:[#allocation5 + $0x90] sm:$0xff]  ;;  %v263_v49 = vld [vmem:[#allocation5 + $0x68] sm:$0xff]  ;;  %v265_v50 = vld [vmem:[#allocation5 + $0x78] sm:$0xff] }
  0xd8   :  { %329 = vmatpush1.msra.mxu0 %v282_v31  ;;  %400 = vmatpush1.msra.mxu1 %v284_v32  ;;  %v262_v51 = vld [vmem:[#allocation5 + $0x60] sm:$0xff]  ;;  %v264_v52 = vld [vmem:[#allocation5 + $0x70] sm:$0xff]  ;;  %v259_v53 = vld [vmem:[#allocation5 + $0x48] sm:$0xff] }
  0xd9   :  { %330 = vmatprep.subr.mxu0 %v279_v33  ;;  %401 = vmatprep.subr.mxu1 %v281_v34  ;;  %v261_v54 = vld [vmem:[#allocation5 + $0x58] sm:$0xff]  ;;  %v258_v55 = vld [vmem:[#allocation5 + $0x40] sm:$0xff]  ;;  %v260_v56 = vld [vmem:[#allocation5 + $0x50] sm:$0xff] }
  0xda   :  { %331 = vmatpush1.msra.mxu0 %v278_v35  ;;  %402 = vmatpush1.msra.mxu1 %v280_v36  ;;  %v255_v57 = vld [vmem:[#allocation5 + $0x28] sm:$0xff]  ;;  %v257_v58 = vld [vmem:[#allocation5 + $0x38] sm:$0xff]  ;;  %v254_v59 = vld [vmem:[#allocation5 + $0x20] sm:$0xff] }
  0xdb   :  { %332 = vmatprep.subr.mxu0 %v275_v37  ;;  %403 = vmatprep.subr.mxu1 %v277_v38  ;;  %v256_v60 = vld [vmem:[#allocation5 + $0x30] sm:$0xff]  ;;  %v251_v61 = vld [vmem:[#allocation5 + $0x8] sm:$0xff]  ;;  %v253_v62 = vld [vmem:[#allocation5 + $0x18] sm:$0xff] }
  0xdc   :  { %333 = vmatpush1.msra.mxu0 %v274_v39  ;;  %404 = vmatpush1.msra.mxu1 %v276_v40  ;;  %v250_v63 = vld [vmem:[#allocation5] sm:$0xff]  ;;  %v252_v1 = vld [vmem:[#allocation5 + $0x10] sm:$0xff]  ;;  %v249_v2 = vld [vmem:[#allocation2] sm:$0x3] }
  0xdd   :  { %334 = vmatprep.subr.mxu0 %v271_v41  ;;  %405 = vmatprep.subr.mxu1 %v273_v42  ;;  %v718_v3 = vld [vmem:[#allocation10 + $0x3d8] sm:$0xff]  ;;  %v717_v5 = vld [vmem:[#allocation10 + $0x3d0] sm:$0xff] }
  0xde   :  { %335 = vmatpush1.msra.mxu0 %v270_v43  ;;  %406 = vmatpush1.msra.mxu1 %v272_v44  ;;  %v846_v4 = vld [vmem:[#allocation10 + $0xbd8] sm:$0xff]  ;;  %v845_v6 = vld [vmem:[#allocation10 + $0xbd0] sm:$0xff] }
  0xdf   :  { %336 = vmatprep.subr.mxu0 %v267_v45  ;;  %407 = vmatprep.subr.mxu1 %v269_v46  ;;  %v714_v7 = vld [vmem:[#allocation10 + $0x398] sm:$0xff]  ;;  %v713_v9 = vld [vmem:[#allocation10 + $0x390] sm:$0xff] }
  0xe0   :  { %337 = vmatpush1.msra.mxu0 %v266_v47  ;;  %408 = vmatpush1.msra.mxu1 %v268_v48  ;;  %v842_v8 = vld [vmem:[#allocation10 + $0xb98] sm:$0xff]  ;;  %v841_v10 = vld [vmem:[#allocation10 + $0xb90] sm:$0xff] }
  0xe1   :  { %338 = vmatprep.subr.mxu0 %v263_v49  ;;  %409 = vmatprep.subr.mxu1 %v265_v50  ;;  %v710_v11 = vld [vmem:[#allocation10 + $0x358] sm:$0xff]  ;;  %v709_v13 = vld [vmem:[#allocation10 + $0x350] sm:$0xff] }
  0xe2   :  { %339 = vmatpush1.msra.mxu0 %v262_v51  ;;  %410 = vmatpush1.msra.mxu1 %v264_v52  ;;  %v838_v12 = vld [vmem:[#allocation10 + $0xb58] sm:$0xff]  ;;  %v837_v14 = vld [vmem:[#allocation10 + $0xb50] sm:$0xff] }
  0xe3   :  { %340 = vmatprep.subr.mxu0 %v259_v53  ;;  %411 = vmatprep.subr.mxu1 %v261_v54  ;;  %v706_v15 = vld [vmem:[#allocation10 + $0x318] sm:$0xff]  ;;  %v705_v17 = vld [vmem:[#allocation10 + $0x310] sm:$0xff] }
  0xe4   :  { %341 = vmatpush1.msra.mxu0 %v258_v55  ;;  %412 = vmatpush1.msra.mxu1 %v260_v56  ;;  %v834_v16 = vld [vmem:[#allocation10 + $0xb18] sm:$0xff]  ;;  %v833_v18 = vld [vmem:[#allocation10 + $0xb10] sm:$0xff] }
  0xe5   :  { %342 = vmatprep.subr.mxu0 %v255_v57  ;;  %413 = vmatprep.subr.mxu1 %v257_v58  ;;  %v702_v19 = vld [vmem:[#allocation10 + $0x2d8] sm:$0xff]  ;;  %v701_v21 = vld [vmem:[#allocation10 + $0x2d0] sm:$0xff] }
  0xe6   :  { %343 = vmatpush1.msra.mxu0 %v254_v59  ;;  %414 = vmatpush1.msra.mxu1 %v256_v60  ;;  %v830_v20 = vld [vmem:[#allocation10 + $0xad8] sm:$0xff]  ;;  %v829_v22 = vld [vmem:[#allocation10 + $0xad0] sm:$0xff] }
  0xe7   :  { %344 = vmatprep.subr.mxu0 %v251_v61  ;;  %415 = vmatprep.subr.mxu1 %v253_v62  ;;  %v698_v23 = vld [vmem:[#allocation10 + $0x298] sm:$0xff]  ;;  %v697_v25 = vld [vmem:[#allocation10 + $0x290] sm:$0xff] }
  0xe8   :  { %345 = vmatpush1.msra.mxu0 %v250_v63  ;;  %416 = vmatpush1.msra.mxu1 %v252_v1  ;;  %v826_v24 = vld [vmem:[#allocation10 + $0xa98] sm:$0xff]  ;;  %v825_v26 = vld [vmem:[#allocation10 + $0xa90] sm:$0xff] }
  0xe9   :  { %379 = vmatmul.mubr.f32.vlgmr.msra.gmra.mxu0 %v249_v2  ;;  %450 = vmatmul.mubr.f32.vlgmr.msra.gmra.mxu1 %v249_v2  ;;  %v694_v27 = vld [vmem:[#allocation10 + $0x258] sm:$0xff]  ;;  %v693_v29 = vld [vmem:[#allocation10 + $0x250] sm:$0xff] }
  0xea   :  { %913 = vmatprep.subr.mxu0 %v718_v3  ;;  %984 = vmatprep.subr.mxu1 %v846_v4  ;;  %v822_v28 = vld [vmem:[#allocation10 + $0xa58] sm:$0xff]  ;;  %v821_v30 = vld [vmem:[#allocation10 + $0xa50] sm:$0xff] }
  0xeb   :  { %914 = vmatpush1.msra.mxu0 %v717_v5  ;;  %985 = vmatpush1.msra.mxu1 %v845_v6  ;;  %v690_v31 = vld [vmem:[#allocation10 + $0x218] sm:$0xff]  ;;  %v689_v33 = vld [vmem:[#allocation10 + $0x210] sm:$0xff] }
  0xec   :  { %915 = vmatprep.subr.mxu0 %v714_v7  ;;  %986 = vmatprep.subr.mxu1 %v842_v8  ;;  %v818_v32 = vld [vmem:[#allocation10 + $0xa18] sm:$0xff]  ;;  %v817_v34 = vld [vmem:[#allocation10 + $0xa10] sm:$0xff] }
  0xed   :  { %916 = vmatpush1.msra.mxu0 %v713_v9  ;;  %987 = vmatpush1.msra.mxu1 %v841_v10  ;;  %v686_v35 = vld [vmem:[#allocation10 + $0x1d8] sm:$0xff]  ;;  %v685_v37 = vld [vmem:[#allocation10 + $0x1d0] sm:$0xff] }
  0xee   :  { %917 = vmatprep.subr.mxu0 %v710_v11  ;;  %988 = vmatprep.subr.mxu1 %v838_v12  ;;  %v814_v36 = vld [vmem:[#allocation10 + $0x9d8] sm:$0xff]  ;;  %v813_v38 = vld [vmem:[#allocation10 + $0x9d0] sm:$0xff] }
  0xef   :  { %918 = vmatpush1.msra.mxu0 %v709_v13  ;;  %989 = vmatpush1.msra.mxu1 %v837_v14  ;;  %v682_v39 = vld [vmem:[#allocation10 + $0x198] sm:$0xff]  ;;  %v681_v41 = vld [vmem:[#allocation10 + $0x190] sm:$0xff] }
  0xf0   :  { %919 = vmatprep.subr.mxu0 %v706_v15  ;;  %990 = vmatprep.subr.mxu1 %v834_v16  ;;  %v810_v40 = vld [vmem:[#allocation10 + $0x998] sm:$0xff]  ;;  %v809_v42 = vld [vmem:[#allocation10 + $0x990] sm:$0xff] }
  0xf1   :  { %920 = vmatpush1.msra.mxu0 %v705_v17  ;;  %991 = vmatpush1.msra.mxu1 %v833_v18  ;;  %v678_v43 = vld [vmem:[#allocation10 + $0x158] sm:$0xff]  ;;  %v677_v45 = vld [vmem:[#allocation10 + $0x150] sm:$0xff] }
  0xf2   :  { %921 = vmatprep.subr.mxu0 %v702_v19  ;;  %992 = vmatprep.subr.mxu1 %v830_v20  ;;  %v806_v44 = vld [vmem:[#allocation10 + $0x958] sm:$0xff]  ;;  %v805_v46 = vld [vmem:[#allocation10 + $0x950] sm:$0xff] }
  0xf3   :  { %922 = vmatpush1.msra.mxu0 %v701_v21  ;;  %993 = vmatpush1.msra.mxu1 %v829_v22  ;;  %v674_v47 = vld [vmem:[#allocation10 + $0x118] sm:$0xff]  ;;  %v673_v49 = vld [vmem:[#allocation10 + $0x110] sm:$0xff] }
  0xf4   :  { %923 = vmatprep.subr.mxu0 %v698_v23  ;;  %994 = vmatprep.subr.mxu1 %v826_v24  ;;  %v802_v48 = vld [vmem:[#allocation10 + $0x918] sm:$0xff]  ;;  %v801_v50 = vld [vmem:[#allocation10 + $0x910] sm:$0xff] }
  0xf5   :  { %924 = vmatpush1.msra.mxu0 %v697_v25  ;;  %995 = vmatpush1.msra.mxu1 %v825_v26  ;;  %v670_v51 = vld [vmem:[#allocation10 + $0xd8] sm:$0xff]  ;;  %v669_v53 = vld [vmem:[#allocation10 + $0xd0] sm:$0xff] }
  0xf6   :  { %925 = vmatprep.subr.mxu0 %v694_v27  ;;  %996 = vmatprep.subr.mxu1 %v822_v28  ;;  %v798_v52 = vld [vmem:[#allocation10 + $0x8d8] sm:$0xff]  ;;  %v797_v54 = vld [vmem:[#allocation10 + $0x8d0] sm:$0xff] }
  0xf7   :  { %926 = vmatpush1.msra.mxu0 %v693_v29  ;;  %997 = vmatpush1.msra.mxu1 %v821_v30  ;;  %v666_v55 = vld [vmem:[#allocation10 + $0x98] sm:$0xff]  ;;  %v665_v57 = vld [vmem:[#allocation10 + $0x90] sm:$0xff] }
  0xf8   :  { %927 = vmatprep.subr.mxu0 %v690_v31  ;;  %998 = vmatprep.subr.mxu1 %v818_v32  ;;  %v794_v56 = vld [vmem:[#allocation10 + $0x898] sm:$0xff]  ;;  %v793_v58 = vld [vmem:[#allocation10 + $0x890] sm:$0xff] }
  0xf9   :  { %928 = vmatpush1.msra.mxu0 %v689_v33  ;;  %999 = vmatpush1.msra.mxu1 %v817_v34  ;;  %v662_v59 = vld [vmem:[#allocation10 + $0x58] sm:$0xff]  ;;  %v661_v61 = vld [vmem:[#allocation10 + $0x50] sm:$0xff] }
  0xfa   :  { %929 = vmatprep.subr.mxu0 %v686_v35  ;;  %1000 = vmatprep.subr.mxu1 %v814_v36  ;;  %v790_v60 = vld [vmem:[#allocation10 + $0x858] sm:$0xff]  ;;  %v789_v62 = vld [vmem:[#allocation10 + $0x850] sm:$0xff] }
  0xfb   :  { %930 = vmatpush1.msra.mxu0 %v685_v37  ;;  %1001 = vmatpush1.msra.mxu1 %v813_v38  ;;  %v658_v63 = vld [vmem:[#allocation10 + $0x18] sm:$0xff]  ;;  %v657_v2 = vld [vmem:[#allocation10 + $0x10] sm:$0xff] }
  0xfc   :  { %931 = vmatprep.subr.mxu0 %v682_v39  ;;  %1002 = vmatprep.subr.mxu1 %v810_v40  ;;  %v786_v1 = vld [vmem:[#allocation10 + $0x818] sm:$0xff]  ;;  %v785_v3 = vld [vmem:[#allocation10 + $0x810] sm:$0xff] }
  0xfd   :  { %932 = vmatpush1.msra.mxu0 %v681_v41  ;;  %1003 = vmatpush1.msra.mxu1 %v809_v42  ;;  %v782_v4 = vld [vmem:[#allocation10 + $0x7d8] sm:$0xff]  ;;  %v781_v6 = vld [vmem:[#allocation10 + $0x7d0] sm:$0xff] }
  0xfe   :  { %933 = vmatprep.subr.mxu0 %v678_v43  ;;  %1004 = vmatprep.subr.mxu1 %v806_v44  ;;  %v910_v5 = vld [vmem:[#allocation10 + $0xfd8] sm:$0xff]  ;;  %v909_v7 = vld [vmem:[#allocation10 + $0xfd0] sm:$0xff] }
  0xff   :  { %934 = vmatpush1.msra.mxu0 %v677_v45  ;;  %1005 = vmatpush1.msra.mxu1 %v805_v46  ;;  %v778_v8 = vld [vmem:[#allocation10 + $0x798] sm:$0xff]  ;;  %v777_v10 = vld [vmem:[#allocation10 + $0x790] sm:$0xff] }
 0x100   :  { %935 = vmatprep.subr.mxu0 %v674_v47  ;;  %1006 = vmatprep.subr.mxu1 %v802_v48  ;;  %v906_v9 = vld [vmem:[#allocation10 + $0xf98] sm:$0xff]  ;;  %v905_v11 = vld [vmem:[#allocation10 + $0xf90] sm:$0xff] }
 0x101   :  { %936 = vmatpush1.msra.mxu0 %v673_v49  ;;  %1007 = vmatpush1.msra.mxu1 %v801_v50  ;;  %v774_v12 = vld [vmem:[#allocation10 + $0x758] sm:$0xff]  ;;  %v773_v14 = vld [vmem:[#allocation10 + $0x750] sm:$0xff] }
 0x102   :  { %937 = vmatprep.subr.mxu0 %v670_v51  ;;  %1008 = vmatprep.subr.mxu1 %v798_v52  ;;  %v902_v13 = vld [vmem:[#allocation10 + $0xf58] sm:$0xff]  ;;  %v901_v15 = vld [vmem:[#allocation10 + $0xf50] sm:$0xff] }
 0x103   :  { %938 = vmatpush1.msra.mxu0 %v669_v53  ;;  %1009 = vmatpush1.msra.mxu1 %v797_v54  ;;  %v770_v16 = vld [vmem:[#allocation10 + $0x718] sm:$0xff]  ;;  %v769_v18 = vld [vmem:[#allocation10 + $0x710] sm:$0xff] }
 0x104   :  { %939 = vmatprep.subr.mxu0 %v666_v55  ;;  %1010 = vmatprep.subr.mxu1 %v794_v56  ;;  %v898_v17 = vld [vmem:[#allocation10 + $0xf18] sm:$0xff]  ;;  %v897_v19 = vld [vmem:[#allocation10 + $0xf10] sm:$0xff] }
 0x105   :  { %940 = vmatpush1.msra.mxu0 %v665_v57  ;;  %1011 = vmatpush1.msra.mxu1 %v793_v58  ;;  %v766_v20 = vld [vmem:[#allocation10 + $0x6d8] sm:$0xff]  ;;  %v765_v22 = vld [vmem:[#allocation10 + $0x6d0] sm:$0xff] }
 0x106   :  { %941 = vmatprep.subr.mxu0 %v662_v59  ;;  %1012 = vmatprep.subr.mxu1 %v790_v60  ;;  %v894_v21 = vld [vmem:[#allocation10 + $0xed8] sm:$0xff]  ;;  %v893_v23 = vld [vmem:[#allocation10 + $0xed0] sm:$0xff] }
 0x107   :  { %942 = vmatpush1.msra.mxu0 %v661_v61  ;;  %1013 = vmatpush1.msra.mxu1 %v789_v62  ;;  %v762_v24 = vld [vmem:[#allocation10 + $0x698] sm:$0xff]  ;;  %v761_v26 = vld [vmem:[#allocation10 + $0x690] sm:$0xff] }
 0x108   :  { %943 = vmatprep.subr.mxu0 %v658_v63  ;;  %1014 = vmatprep.subr.mxu1 %v786_v1  ;;  %v890_v25 = vld [vmem:[#allocation10 + $0xe98] sm:$0xff]  ;;  %v889_v27 = vld [vmem:[#allocation10 + $0xe90] sm:$0xff] }
 0x109   :  { %944 = vmatpush1.msra.mxu0 %v657_v2  ;;  %1015 = vmatpush1.msra.mxu1 %v785_v3  ;;  %v758_v28 = vld [vmem:[#allocation10 + $0x658] sm:$0xff]  ;;  %v757_v30 = vld [vmem:[#allocation10 + $0x650] sm:$0xff] }
 0x10a   :  { %945 = vmatprep.subr.mxu0 %v782_v4  ;;  %1016 = vmatprep.subr.mxu1 %v910_v5  ;;  %v886_v29 = vld [vmem:[#allocation10 + $0xe58] sm:$0xff]  ;;  %v885_v31 = vld [vmem:[#allocation10 + $0xe50] sm:$0xff]  ;;  %v720_v5 = vld [vmem:[#allocation10 + $0x3e8] sm:$0xff] }
 0x10b   :  { %946 = vmatpush2.msra.mxu0 %v781_v6  ;;  %1017 = vmatpush2.msra.mxu1 %v909_v7  ;;  %v754_v32 = vld [vmem:[#allocation10 + $0x618] sm:$0xff]  ;;  %v753_v34 = vld [vmem:[#allocation10 + $0x610] sm:$0xff]  ;;  %v848_v6 = vld [vmem:[#allocation10 + $0xbe8] sm:$0xff] }
 0x10c   :  { %947 = vmatprep.subr.mxu0 %v778_v8  ;;  %1018 = vmatprep.subr.mxu1 %v906_v9  ;;  %v882_v33 = vld [vmem:[#allocation10 + $0xe18] sm:$0xff]  ;;  %v881_v35 = vld [vmem:[#allocation10 + $0xe10] sm:$0xff] }
 0x10d   :  { %948 = vmatpush2.msra.mxu0 %v777_v10  ;;  %1019 = vmatpush2.msra.mxu1 %v905_v11  ;;  %v750_v36 = vld [vmem:[#allocation10 + $0x5d8] sm:$0xff]  ;;  %v749_v38 = vld [vmem:[#allocation10 + $0x5d0] sm:$0xff] }
 0x10e   :  { %949 = vmatprep.subr.mxu0 %v774_v12  ;;  %1020 = vmatprep.subr.mxu1 %v902_v13  ;;  %v878_v37 = vld [vmem:[#allocation10 + $0xdd8] sm:$0xff]  ;;  %v877_v39 = vld [vmem:[#allocation10 + $0xdd0] sm:$0xff] }
 0x10f   :  { %950 = vmatpush2.msra.mxu0 %v773_v14  ;;  %1021 = vmatpush2.msra.mxu1 %v901_v15  ;;  %v746_v40 = vld [vmem:[#allocation10 + $0x598] sm:$0xff]  ;;  %v745_v42 = vld [vmem:[#allocation10 + $0x590] sm:$0xff] }
 0x110   :  { %951 = vmatprep.subr.mxu0 %v770_v16  ;;  %1022 = vmatprep.subr.mxu1 %v898_v17  ;;  %v874_v41 = vld [vmem:[#allocation10 + $0xd98] sm:$0xff]  ;;  %v873_v43 = vld [vmem:[#allocation10 + $0xd90] sm:$0xff] }
 0x111   :  { %952 = vmatpush2.msra.mxu0 %v769_v18  ;;  %1023 = vmatpush2.msra.mxu1 %v897_v19  ;;  %v742_v44 = vld [vmem:[#allocation10 + $0x558] sm:$0xff]  ;;  %v741_v46 = vld [vmem:[#allocation10 + $0x550] sm:$0xff] }
 0x112   :  { %953 = vmatprep.subr.mxu0 %v766_v20  ;;  %1024 = vmatprep.subr.mxu1 %v894_v21  ;;  %v870_v45 = vld [vmem:[#allocation10 + $0xd58] sm:$0xff]  ;;  %v869_v47 = vld [vmem:[#allocation10 + $0xd50] sm:$0xff] }
 0x113   :  { %954 = vmatpush2.msra.mxu0 %v765_v22  ;;  %1025 = vmatpush2.msra.mxu1 %v893_v23  ;;  %v738_v48 = vld [vmem:[#allocation10 + $0x518] sm:$0xff]  ;;  %v737_v50 = vld [vmem:[#allocation10 + $0x510] sm:$0xff] }
 0x114   :  { %955 = vmatprep.subr.mxu0 %v762_v24  ;;  %1026 = vmatprep.subr.mxu1 %v890_v25  ;;  %v866_v49 = vld [vmem:[#allocation10 + $0xd18] sm:$0xff]  ;;  %v865_v51 = vld [vmem:[#allocation10 + $0xd10] sm:$0xff] }
 0x115   :  { %956 = vmatpush2.msra.mxu0 %v761_v26  ;;  %1027 = vmatpush2.msra.mxu1 %v889_v27  ;;  %v734_v52 = vld [vmem:[#allocation10 + $0x4d8] sm:$0xff]  ;;  %v733_v54 = vld [vmem:[#allocation10 + $0x4d0] sm:$0xff] }
 0x116   :  { %957 = vmatprep.subr.mxu0 %v758_v28  ;;  %1028 = vmatprep.subr.mxu1 %v886_v29  ;;  %v862_v53 = vld [vmem:[#allocation10 + $0xcd8] sm:$0xff]  ;;  %v861_v55 = vld [vmem:[#allocation10 + $0xcd0] sm:$0xff] }
 0x117   :  { %958 = vmatpush2.msra.mxu0 %v757_v30  ;;  %1029 = vmatpush2.msra.mxu1 %v885_v31  ;;  %v730_v56 = vld [vmem:[#allocation10 + $0x498] sm:$0xff]  ;;  %v729_v58 = vld [vmem:[#allocation10 + $0x490] sm:$0xff] }
 0x118   :  { %959 = vmatprep.subr.mxu0 %v754_v32  ;;  %1030 = vmatprep.subr.mxu1 %v882_v33  ;;  %v858_v57 = vld [vmem:[#allocation10 + $0xc98] sm:$0xff]  ;;  %v857_v59 = vld [vmem:[#allocation10 + $0xc90] sm:$0xff] }
 0x119   :  { %960 = vmatpush2.msra.mxu0 %v753_v34  ;;  %1031 = vmatpush2.msra.mxu1 %v881_v35  ;;  %v726_v60 = vld [vmem:[#allocation10 + $0x458] sm:$0xff]  ;;  %v725_v62 = vld [vmem:[#allocation10 + $0x450] sm:$0xff] }
 0x11a   :  { %961 = vmatprep.subr.mxu0 %v750_v36  ;;  %1032 = vmatprep.subr.mxu1 %v878_v37  ;;  %v854_v61 = vld [vmem:[#allocation10 + $0xc58] sm:$0xff]  ;;  %v853_v63 = vld [vmem:[#allocation10 + $0xc50] sm:$0xff] }
 0x11b   :  { %962 = vmatpush2.msra.mxu0 %v749_v38  ;;  %1033 = vmatpush2.msra.mxu1 %v877_v39  ;;  %v722_v1 = vld [vmem:[#allocation10 + $0x418] sm:$0xff]  ;;  %v721_v3 = vld [vmem:[#allocation10 + $0x410] sm:$0xff] }
 0x11c   :  { %963 = vmatprep.subr.mxu0 %v746_v40  ;;  %1034 = vmatprep.subr.mxu1 %v874_v41  ;;  %v850_v2 = vld [vmem:[#allocation10 + $0xc18] sm:$0xff]  ;;  %v849_v4 = vld [vmem:[#allocation10 + $0xc10] sm:$0xff] }
 0x11d   :  { %964 = vmatpush2.msra.mxu0 %v745_v42  ;;  %1035 = vmatpush2.msra.mxu1 %v873_v43 }
 0x11e   :  { %965 = vmatprep.subr.mxu0 %v742_v44  ;;  %1036 = vmatprep.subr.mxu1 %v870_v45 }
 0x11f   :  { %966 = vmatpush2.msra.mxu0 %v741_v46  ;;  %1037 = vmatpush2.msra.mxu1 %v869_v47 }
 0x120   :  { %967 = vmatprep.subr.mxu0 %v738_v48  ;;  %1038 = vmatprep.subr.mxu1 %v866_v49 }
 0x121   :  { %968 = vmatpush2.msra.mxu0 %v737_v50  ;;  %1039 = vmatpush2.msra.mxu1 %v865_v51 }
 0x122   :  { %969 = vmatprep.subr.mxu0 %v734_v52  ;;  %1040 = vmatprep.subr.mxu1 %v862_v53 }
 0x123   :  { %970 = vmatpush2.msra.mxu0 %v733_v54  ;;  %1041 = vmatpush2.msra.mxu1 %v861_v55 }
 0x124   :  { %971 = vmatprep.subr.mxu0 %v730_v56  ;;  %1042 = vmatprep.subr.mxu1 %v858_v57 }
 0x125   :  { %972 = vmatpush2.msra.mxu0 %v729_v58  ;;  %1043 = vmatpush2.msra.mxu1 %v857_v59 }
 0x126   :  { %973 = vmatprep.subr.mxu0 %v726_v60  ;;  %1044 = vmatprep.subr.mxu1 %v854_v61 }
 0x127   :  { %974 = vmatpush2.msra.mxu0 %v725_v62  ;;  %1045 = vmatpush2.msra.mxu1 %v853_v63 }
 0x128   :  { %975 = vmatprep.subr.mxu0 %v722_v1  ;;  %1046 = vmatprep.subr.mxu1 %v850_v2 }
 0x129   :  { %976 = vmatpush2.msra.mxu0 %v721_v3  ;;  %1047 = vmatpush2.msra.mxu1 %v849_v4 }
 0x12a   :  { %1055 = vmatprep.subr.mxu0 %v720_v5  ;;  %1126 = vmatprep.subr.mxu1 %v848_v6 }
 0x1a9   :  { %v4339_v7 = vpop.f32.mrf.mxu0  ;;  %v4341_v8 = vpop.f32.mrf.mxu1 }
 0x1aa   :  { %v457_v9 = vsel %vm456_vm0, %v4339_v7, 0.0  ;;  %v471_v10 = vsel %vm456_vm0, %v4341_v8, 0.0 }
 0x1ab   :  { %v458_v11 = vrot.slane %v457_v9, 4  ;;  %v472_v12 = vrot.slane %v471_v10, 4  ;;  %v4347_v13 = vpop.f32.mrf.mxu0  ;;  %v4349_v14 = vpop.f32.mrf.mxu1 }
 0x1ac   :  { %v464_v15 = vsel %vm456_vm0, %v4347_v13, 0.0  ;;  %v478_v16 = vsel %vm456_vm0, %v4349_v14, 0.0 }
 0x1ad   :  { %v459_v17 = vadd.f32 %v458_v11, %v457_v9  ;;  %v473_v18 = vadd.f32 %v472_v12, %v471_v10  ;;  %v465_v19 = vrot.slane %v464_v15, 4  ;;  %v479_v20 = vrot.slane %v478_v16, 4 }
 0x1af   :  { %v460_v21 = vrot.slane %v459_v17, 2  ;;  %v474_v22 = vrot.slane %v473_v18, 2  ;;  %v466_v23 = vadd.f32 %v465_v19, %v464_v15  ;;  %v480_v24 = vadd.f32 %v479_v20, %v478_v16 }
 0x1b1   :  { %v461_v25 = vadd.f32 %v460_v21, %v459_v17  ;;  %v475_v26 = vadd.f32 %v474_v22, %v473_v18  ;;  %v467_v27 = vrot.slane %v466_v23, 2  ;;  %v481_v28 = vrot.slane %v480_v24, 2 }
 0x1b3   :  { %v462_v29 = vrot.slane %v461_v25, 1  ;;  %v476_v30 = vrot.slane %v475_v26, 1  ;;  %v468_v31 = vadd.f32 %v467_v27, %v466_v23  ;;  %v482_v32 = vadd.f32 %v481_v28, %v480_v24 }
 0x1b4   :  { %v4187_v28 = vmov 1966171168  }
 0x1b5   :  { %v463_v33 = vadd.f32 %v462_v29, %v461_v25  ;;  %v477_v34 = vadd.f32 %v476_v30, %v475_v26  ;;  %v469_v35 = vrot.slane %v468_v31, 1  ;;  %v483_v36 = vrot.slane %v482_v32, 1 }
 0x1b6   :  { %v545_v29 = vunpack.c.l.s4 %v4187_v28  ;;  %v547_v30 = vlaneseq  ;;  %v839_v28 = vld [vmem:[#allocation10 + $0xb60] sm:$0xff] }
 0x1b7   :  { %v4355_v37 = vmul.f32 0.5, %v463_v33  ;;  %v4357_v38 = vmul.f32 0.5, %v477_v34  ;;  %v470_v39 = vadd.f32 %v469_v35, %v468_v31  ;;  %v484_v40 = vadd.f32 %v483_v36, %v482_v32 }
 0x1b8   :  { %v546_v31 = vunpack.c.0.s8 %v545_v29  ;;  %v4375_v32 = vshrl.u32 %v547_v30, 7  ;;  %v708_v29 = vld [vmem:[#allocation10 + $0x328] sm:$0xff] }
 0x1b9   :  { %v489_v41 = vsub.f32 %v4339_v7, %v4355_v37  ;;  %v491_v42 = vsub.f32 %v4341_v8, %v4357_v38  ;;  %v4363_v43 = vmul.f32 0.5, %v470_v39  ;;  %v4365_v44 = vmul.f32 0.5, %v484_v40  ;;  %v836_v30 = vld [vmem:[#allocation10 + $0xb28] sm:$0xff] }
 0x1ba   :  { %v4378_v35 = vsub.s32 %v546_v31, %v4375_v32  ;;  %v707_v31 = vld [vmem:[#allocation10 + $0x320] sm:$0xff] }
 0x1bb   :  { %v493_v45 = vmul.f32 %v489_v41, %v489_v41  ;;  %v495_v46 = vmul.f32 %v491_v42, %v491_v42  ;;  %v490_v47 = vsub.f32 %v4347_v13, %v4363_v43  ;;  %v492_v48 = vsub.f32 %v4349_v14, %v4365_v44 }
 0x1bd   :  { %v497_v49 = vsel %vm456_vm0, %v493_v45, 0.0  ;;  %v511_v50 = vsel %vm456_vm0, %v495_v46, 0.0  ;;  %v494_v51 = vmul.f32 %v490_v47, %v490_v47  ;;  %v496_v52 = vmul.f32 %v492_v48, %v492_v48  ;;  %v529_v47 = vld [vmem:[#allocation7] sm:$0xf] }
 0x1be   :  { %v498_v53 = vrot.slane %v497_v49, 4  ;;  %v512_v54 = vrot.slane %v511_v50, 4  ;;  %v4383_v48 = vsub.s32 0, %v4375_v32 }
 0x1bf   :  { %v504_v55 = vsel %vm456_vm0, %v494_v51, 0.0  ;;  %v518_v56 = vsel %vm456_vm0, %v496_v52, 0.0  ;;  %v584_v51 = vsub.s32 3, %v4375_v32  ;;  %v4389_v52 = vsub.s32 1, %v4375_v32 }
 0x1c0   :  { %v499_v57 = vadd.f32 %v498_v53, %v497_v49  ;;  %v513_v58 = vadd.f32 %v512_v54, %v511_v50  ;;  %v505_v59 = vrot.slane %v504_v55, 4  ;;  %v519_v60 = vrot.slane %v518_v56, 4 }
 0x1c1   :  { %v580_v50 = vsub.s32 2, %v4375_v32 }
 0x1c2   :  { %v500_v61 = vrot.slane %v499_v57, 2  ;;  %v514_v62 = vrot.slane %v513_v58, 2  ;;  %v506_v63 = vadd.f32 %v505_v59, %v504_v55  ;;  %v520_v1 = vadd.f32 %v519_v60, %v518_v56 }
 0x1c4   :  { %v501_v2 = vadd.f32 %v500_v61, %v499_v57  ;;  %v515_v3 = vadd.f32 %v514_v62, %v513_v58  ;;  %v507_v4 = vrot.slane %v506_v63, 2  ;;  %v521_v5 = vrot.slane %v520_v1, 2 }
 0x1c6   :  { %v502_v6 = vrot.slane %v501_v2, 1  ;;  %v516_v9 = vrot.slane %v515_v3, 1  ;;  %v508_v10 = vadd.f32 %v507_v4, %v506_v63  ;;  %v522_v11 = vadd.f32 %v521_v5, %v520_v1  ;;  %v568_v4 = vld [vmem:[#allocation8] sm:$0xf] }
 0x1c8   :  { %v503_v12 = vadd.f32 %v502_v6, %v501_v2  ;;  %v517_v15 = vadd.f32 %v516_v9, %v515_v3  ;;  %v509_v16 = vrot.slane %v508_v10, 1  ;;  %v523_v17 = vrot.slane %v522_v11, 1 }
 0x1ca   :  { %v525_v18 = vmul.f32 0.5, %v503_v12  ;;  %v527_v19 = vmul.f32 0.5, %v517_v15  ;;  %v510_v20 = vadd.f32 %v509_v16, %v508_v10  ;;  %v524_v21 = vadd.f32 %v523_v17, %v522_v11 }
 0x1cc   :  { %v530_v22 = vadd.f32 1e-05, %v525_v18  ;;  %v532_v23 = vadd.f32 1e-05, %v527_v19  ;;  %v526_v24 = vmul.f32 0.5, %v510_v20  ;;  %v528_v25 = vmul.f32 0.5, %v524_v21 }
 0x1cd   :  { %v719_v20 = vld [vmem:[#allocation10 + $0x3e0] sm:$0xff]  ;;  %v716_v21 = vld [vmem:[#allocation10 + $0x3a8] sm:$0xff] }
 0x1ce   :  { %3756 = vrsqrt.f32 %v530_v22  ;;  %v531_v26 = vadd.f32 1e-05, %v526_v24  ;;  %v533_v27 = vadd.f32 1e-05, %v528_v25  ;;  %v844_v22 = vld [vmem:[#allocation10 + $0xba8] sm:$0xff]  ;;  %v843_v24 = vld [vmem:[#allocation10 + $0xba0] sm:$0xff] }
 0x1cf   :  { %3758 = vrsqrt.f32 %v532_v23  ;;  %v715_v23 = vld [vmem:[#allocation10 + $0x3a0] sm:$0xff]  ;;  %v712_v25 = vld [vmem:[#allocation10 + $0x368] sm:$0xff] }
 0x1d0   :  { %3760 = vrsqrt.f32 %v531_v26  ;;  %v840_v26 = vld [vmem:[#allocation10 + $0xb68] sm:$0xff] }
 0x1d1   :  { %3762 = vrsqrt.f32 %v533_v27  ;;  %v711_v27 = vld [vmem:[#allocation10 + $0x360] sm:$0xff] }
 0x1db   :  { %v3757_v33 = vpop.eup %3756 }
 0x1dc   :  { %v3759_v34 = vpop.eup %3758 }
 0x1dd   :  { %v3761_v36 = vpop.eup %3760 }
 0x1de   :  { %v3763_v39 = vpop.eup %3762  ;;  %v542_v40 = vcombine.low %v3757_v33, %v3761_v36  ;;  %v835_v33 = vld [vmem:[#allocation10 + $0xb20] sm:$0xff]  ;;  %v832_v36 = vld [vmem:[#allocation10 + $0xae8] sm:$0xff] }
 0x1df   :  { %v543_v41 = vcombine.low %v3759_v34, %v3763_v39  ;;  %v704_v34 = vld [vmem:[#allocation10 + $0x2e8] sm:$0xff]  ;;  %v703_v39 = vld [vmem:[#allocation10 + $0x2e0] sm:$0xff] }
 0x1e0   :  { %v550_v42 = vrot.slane %v542_v40, %v4378_v35  ;;  %v831_v40 = vld [vmem:[#allocation10 + $0xae0] sm:$0xff] }
 0x1e1   :  { %v557_v45 = vrot.slane %v543_v41, %v4378_v35  ;;  %v700_v41 = vld [vmem:[#allocation10 + $0x2a8] sm:$0xff] }
 0x1e3   :  { %v558_v46 = vcombine.low %v550_v42, %v557_v45  ;;  %v828_v42 = vld [vmem:[#allocation10 + $0xaa8] sm:$0xff]  ;;  %v699_v45 = vld [vmem:[#allocation10 + $0x2a0] sm:$0xff] }
 0x1e5   :  { %v565_v49 = vrot.slane %v558_v46, %v4378_v35  ;;  %v827_v46 = vld [vmem:[#allocation10 + $0xaa0] sm:$0xff] }
 0x1e7   :  { %v567_v53 = vmul.f32 %v565_v49, %v529_v47  ;;  %v696_v47 = vld [vmem:[#allocation10 + $0x268] sm:$0xff] }
 0x1e8   :  { %v824_v49 = vld [vmem:[#allocation10 + $0xa68] sm:$0xff] }
 0x1e9   :  { %v581_v54 = vrot.slane %v567_v53, %v580_v50  ;;  %v585_v55 = vrot.slane %v567_v53, %v584_v51  ;;  %v573_v56 = vrot.slane %v567_v53, %v4383_v48  ;;  %v577_v57 = vrot.slane %v567_v53, %v4389_v52  ;;  %v692_v53 = vld [vmem:[#allocation10 + $0x228] sm:$0xff] }
 0x1eb   :  { %v592_v58 = vmul.f32 %v581_v54, %v4357_v38  ;;  %v593_v59 = vmul.f32 %v585_v55, %v4365_v44  ;;  %v590_v60 = vmul.f32 %v573_v56, %v4355_v37  ;;  %v591_v61 = vmul.f32 %v577_v57, %v4363_v43 }
 0x1ec   :  { %v627_v9 = vmul.f32 %v585_v55, %v4349_v14  ;;  %v625_v38 = vmul.f32 %v577_v57, %v4347_v13  ;;  %v624_v44 = vmul.f32 %v573_v56, %v4339_v7  ;;  %v626_v37 = vmul.f32 %v581_v54, %v4341_v8  ;;  %v847_v8 = vld [vmem:[#allocation10 + $0xbe0] sm:$0xff]  ;;  %v820_v54 = vld [vmem:[#allocation10 + $0xa28] sm:$0xff] }
 0x1ed   :  { %v599_v62 = vcombine.low %v592_v58, %v593_v59  ;;  %v598_v63 = vcombine.low %v590_v60, %v591_v61  ;;  %v691_v55 = vld [vmem:[#allocation10 + $0x220] sm:$0xff]  ;;  %v688_v57 = vld [vmem:[#allocation10 + $0x1e8] sm:$0xff] }
 0x1ee   :  { %v819_v56 = vld [vmem:[#allocation10 + $0xa20] sm:$0xff]  ;;  %v816_v58 = vld [vmem:[#allocation10 + $0x9e8] sm:$0xff] }
 0x1ef   :  { %v613_v1 = vrot.slane %v599_v62, %v4378_v35  ;;  %v606_v2 = vrot.slane %v598_v63, %v4378_v35  ;;  %v687_v59 = vld [vmem:[#allocation10 + $0x1e0] sm:$0xff]  ;;  %v684_v61 = vld [vmem:[#allocation10 + $0x1a8] sm:$0xff] }
 0x1f0   :  { %v815_v60 = vld [vmem:[#allocation10 + $0x9e0] sm:$0xff]  ;;  %v812_v62 = vld [vmem:[#allocation10 + $0x9a8] sm:$0xff] }
 0x1f1   :  { %v614_v3 = vcombine.low %v606_v2, %v613_v1  ;;  %v683_v63 = vld [vmem:[#allocation10 + $0x1a0] sm:$0xff]  ;;  %v680_v2 = vld [vmem:[#allocation10 + $0x168] sm:$0xff] }
 0x1f2   :  { %v811_v1 = vld [vmem:[#allocation10 + $0x9a0] sm:$0xff] }
 0x1f3   :  { %v621_v5 = vrot.slane %v614_v3, %v4378_v35  ;;  %v808_v3 = vld [vmem:[#allocation10 + $0x968] sm:$0xff] }
 0x1f5   :  { %v623_v6 = vsub.f32 %v568_v4, %v621_v5  ;;  %v679_v4 = vld [vmem:[#allocation10 + $0x160] sm:$0xff] }
 0x1f6   :  { %v807_v5 = vld [vmem:[#allocation10 + $0x960] sm:$0xff] }
 0x1f7   :  { %v636_v43 = vrot.slane %v623_v6, %v4389_v52  ;;  %v644_v10 = vrot.slane %v623_v6, %v584_v51  ;;  %v632_v11 = vrot.slane %v623_v6, %v4383_v48  ;;  %v640_v12 = vrot.slane %v623_v6, %v580_v50  ;;  %v695_v50 = vld [vmem:[#allocation10 + $0x260] sm:$0xff]  ;;  %v676_v6 = vld [vmem:[#allocation10 + $0x128] sm:$0xff] }
 0x1f8   :  { %v823_v51 = vld [vmem:[#allocation10 + $0xa60] sm:$0xff] }
 0x1f9   :  { %v650_v15 = vadd.f32 %v636_v43, %v625_v38  ;;  %v652_v16 = vadd.f32 %v644_v10, %v627_v9  ;;  %v4406_v17 = vadd.f32 %v632_v11, %v624_v44  ;;  %v4408_v18 = vadd.f32 %v640_v12, %v626_v37  ;;  %v804_v9 = vld [vmem:[#allocation10 + $0x928] sm:$0xff]  ;;  %v675_v38 = vld [vmem:[#allocation10 + $0x120] sm:$0xff] }
 0x1fa   :  { %v803_v44 = vld [vmem:[#allocation10 + $0x920] sm:$0xff]  ;;  %v672_v37 = vld [vmem:[#allocation10 + $0xe8] sm:$0xff] }
 0x1fb   :  { %v654_v19 = vmax.f32 %v650_v15, 0.0  ;;  %v656_v14 = vmax.f32 %v652_v16, 0.0  ;;  %v653_v13 = vmax.f32 %v4406_v17, 0.0  ;;  %v655_v7 = vmax.f32 %v4408_v18, 0.0  ;;  %v800_v43 = vld [vmem:[#allocation10 + $0x8e8] sm:$0xff]  ;;  %v671_v10 = vld [vmem:[#allocation10 + $0xe0] sm:$0xff] }
 0x1fc   :  { %v799_v11 = vld [vmem:[#allocation10 + $0x8e0] sm:$0xff]  ;;  %v668_v12 = vld [vmem:[#allocation10 + $0xa8] sm:$0xff] }
 0x1fd   :  { %977 = vmatprep.mubr.f32.mxu0 %v654_v19  ;;  %1048 = vmatprep.mubr.f32.mxu1 %v656_v14  ;;  %v796_v15 = vld [vmem:[#allocation10 + $0x8a8] sm:$0xff]  ;;  %v667_v16 = vld [vmem:[#allocation10 + $0xa0] sm:$0xff] }
 0x1fe   :  { %978 = vmatmul.mubr.f32.vlgmr.msra.gmra.mxu0 %v653_v13  ;;  %1049 = vmatmul.mubr.f32.vlgmr.msra.gmra.mxu1 %v655_v7  ;;  %v1535_v17 = vld [vmem:[#allocation14 + $0x1a8] sm:$0xff]  ;;  %v1534_v18 = vld [vmem:[#allocation14 + $0x1a0] sm:$0xff] }
 0x1ff   :  { %1056 = vmatpush1.msra.mxu0 %v719_v20  ;;  %1127 = vmatpush1.msra.mxu1 %v847_v8  ;;  %v792_v20 = vld [vmem:[#allocation10 + $0x868] sm:$0xff]  ;;  %v663_v8 = vld [vmem:[#allocation10 + $0x60] sm:$0xff] }
 0x200   :  { %1057 = vmatprep.subr.mxu0 %v716_v21  ;;  %1119 = vmatprep.mubr.f32.mxu0 %v654_v19  ;;  %v795_v19 = vld [vmem:[#allocation10 + $0x8a0] sm:$0xff] }
 0x201   :  { %1128 = vmatprep.subr.mxu1 %v844_v22  ;;  %1190 = vmatprep.mubr.f32.mxu1 %v656_v14  ;;  %v664_v14 = vld [vmem:[#allocation10 + $0x68] sm:$0xff]  ;;  %v791_v21 = vld [vmem:[#allocation10 + $0x860] sm:$0xff] }
 0x202   :  { %1058 = vmatpush1.msra.mxu0 %v715_v23  ;;  %1129 = vmatpush1.msra.mxu1 %v843_v24  ;;  %v660_v22 = vld [vmem:[#allocation10 + $0x28] sm:$0xff]  ;;  %v659_v24 = vld [vmem:[#allocation10 + $0x20] sm:$0xff] }
 0x203   :  { %1059 = vmatprep.subr.mxu0 %v712_v25  ;;  %1130 = vmatprep.subr.mxu1 %v840_v26  ;;  %v788_v23 = vld [vmem:[#allocation10 + $0x828] sm:$0xff]  ;;  %v787_v25 = vld [vmem:[#allocation10 + $0x820] sm:$0xff] }
 0x204   :  { %1060 = vmatpush1.msra.mxu0 %v711_v27  ;;  %1131 = vmatpush1.msra.mxu1 %v839_v28  ;;  %v784_v26 = vld [vmem:[#allocation10 + $0x7e8] sm:$0xff]  ;;  %v783_v28 = vld [vmem:[#allocation10 + $0x7e0] sm:$0xff] }
 0x205   :  { %1061 = vmatprep.subr.mxu0 %v708_v29  ;;  %1132 = vmatprep.subr.mxu1 %v836_v30  ;;  %v912_v27 = vld [vmem:[#allocation10 + $0xfe8] sm:$0xff]  ;;  %v911_v29 = vld [vmem:[#allocation10 + $0xfe0] sm:$0xff] }
 0x206   :  { %1062 = vmatpush1.msra.mxu0 %v707_v31  ;;  %1133 = vmatpush1.msra.mxu1 %v835_v33  ;;  %v780_v30 = vld [vmem:[#allocation10 + $0x7a8] sm:$0xff]  ;;  %v779_v33 = vld [vmem:[#allocation10 + $0x7a0] sm:$0xff] }
 0x207   :  { %1063 = vmatprep.subr.mxu0 %v704_v34  ;;  %1134 = vmatprep.subr.mxu1 %v832_v36  ;;  %v908_v31 = vld [vmem:[#allocation10 + $0xfa8] sm:$0xff]  ;;  %v907_v34 = vld [vmem:[#allocation10 + $0xfa0] sm:$0xff] }
 0x208   :  { %1064 = vmatpush1.msra.mxu0 %v703_v39  ;;  %1135 = vmatpush1.msra.mxu1 %v831_v40  ;;  %v776_v36 = vld [vmem:[#allocation10 + $0x768] sm:$0xff]  ;;  %v775_v40 = vld [vmem:[#allocation10 + $0x760] sm:$0xff] }
 0x209   :  { %1065 = vmatprep.subr.mxu0 %v700_v41  ;;  %1136 = vmatprep.subr.mxu1 %v828_v42  ;;  %v904_v39 = vld [vmem:[#allocation10 + $0xf68] sm:$0xff]  ;;  %v903_v41 = vld [vmem:[#allocation10 + $0xf60] sm:$0xff] }
 0x20a   :  { %1066 = vmatpush1.msra.mxu0 %v699_v45  ;;  %1137 = vmatpush1.msra.mxu1 %v827_v46  ;;  %v772_v42 = vld [vmem:[#allocation10 + $0x728] sm:$0xff]  ;;  %v771_v46 = vld [vmem:[#allocation10 + $0x720] sm:$0xff] }
 0x20b   :  { %1067 = vmatprep.subr.mxu0 %v696_v47  ;;  %1138 = vmatprep.subr.mxu1 %v824_v49  ;;  %v900_v45 = vld [vmem:[#allocation10 + $0xf28] sm:$0xff]  ;;  %v899_v47 = vld [vmem:[#allocation10 + $0xf20] sm:$0xff] }
 0x20c   :  { %1068 = vmatpush1.msra.mxu0 %v695_v50  ;;  %1139 = vmatpush1.msra.mxu1 %v823_v51  ;;  %v768_v49 = vld [vmem:[#allocation10 + $0x6e8] sm:$0xff]  ;;  %v767_v51 = vld [vmem:[#allocation10 + $0x6e0] sm:$0xff] }
 0x20d   :  { %1069 = vmatprep.subr.mxu0 %v692_v53  ;;  %1140 = vmatprep.subr.mxu1 %v820_v54  ;;  %v896_v50 = vld [vmem:[#allocation10 + $0xee8] sm:$0xff]  ;;  %v895_v53 = vld [vmem:[#allocation10 + $0xee0] sm:$0xff] }
 0x20e   :  { %1070 = vmatpush1.msra.mxu0 %v691_v55  ;;  %1141 = vmatpush1.msra.mxu1 %v819_v56  ;;  %v764_v54 = vld [vmem:[#allocation10 + $0x6a8] sm:$0xff]  ;;  %v763_v56 = vld [vmem:[#allocation10 + $0x6a0] sm:$0xff] }
 0x20f   :  { %1071 = vmatprep.subr.mxu0 %v688_v57  ;;  %1142 = vmatprep.subr.mxu1 %v816_v58  ;;  %v892_v55 = vld [vmem:[#allocation10 + $0xea8] sm:$0xff]  ;;  %v891_v57 = vld [vmem:[#allocation10 + $0xea0] sm:$0xff] }
 0x210   :  { %1072 = vmatpush1.msra.mxu0 %v687_v59  ;;  %1143 = vmatpush1.msra.mxu1 %v815_v60  ;;  %v760_v58 = vld [vmem:[#allocation10 + $0x668] sm:$0xff]  ;;  %v759_v60 = vld [vmem:[#allocation10 + $0x660] sm:$0xff] }
 0x211   :  { %1073 = vmatprep.subr.mxu0 %v684_v61  ;;  %1144 = vmatprep.subr.mxu1 %v812_v62  ;;  %v888_v59 = vld [vmem:[#allocation10 + $0xe68] sm:$0xff]  ;;  %v887_v61 = vld [vmem:[#allocation10 + $0xe60] sm:$0xff] }
 0x212   :  { %1074 = vmatpush1.msra.mxu0 %v683_v63  ;;  %1145 = vmatpush1.msra.mxu1 %v811_v1  ;;  %v756_v62 = vld [vmem:[#allocation10 + $0x628] sm:$0xff]  ;;  %v755_v1 = vld [vmem:[#allocation10 + $0x620] sm:$0xff] }
 0x213   :  { %1075 = vmatprep.subr.mxu0 %v680_v2  ;;  %1146 = vmatprep.subr.mxu1 %v808_v3  ;;  %v884_v63 = vld [vmem:[#allocation10 + $0xe28] sm:$0xff]  ;;  %v883_v2 = vld [vmem:[#allocation10 + $0xe20] sm:$0xff] }
 0x214   :  { %1076 = vmatpush1.msra.mxu0 %v679_v4  ;;  %1147 = vmatpush1.msra.mxu1 %v807_v5  ;;  %v752_v3 = vld [vmem:[#allocation10 + $0x5e8] sm:$0xff]  ;;  %v751_v5 = vld [vmem:[#allocation10 + $0x5e0] sm:$0xff] }
 0x215   :  { %1077 = vmatprep.subr.mxu0 %v676_v6  ;;  %1148 = vmatprep.subr.mxu1 %v804_v9  ;;  %v880_v4 = vld [vmem:[#allocation10 + $0xde8] sm:$0xff]  ;;  %v879_v6 = vld [vmem:[#allocation10 + $0xde0] sm:$0xff] }
 0x216   :  { %1078 = vmatpush1.msra.mxu0 %v675_v38  ;;  %1149 = vmatpush1.msra.mxu1 %v803_v44  ;;  %v748_v9 = vld [vmem:[#allocation10 + $0x5a8] sm:$0xff]  ;;  %v747_v44 = vld [vmem:[#allocation10 + $0x5a0] sm:$0xff] }
 0x217   :  { %1079 = vmatprep.subr.mxu0 %v672_v37  ;;  %1150 = vmatprep.subr.mxu1 %v800_v43  ;;  %v876_v38 = vld [vmem:[#allocation10 + $0xda8] sm:$0xff]  ;;  %v875_v37 = vld [vmem:[#allocation10 + $0xda0] sm:$0xff] }
 0x218   :  { %1080 = vmatpush1.msra.mxu0 %v671_v10  ;;  %1151 = vmatpush1.msra.mxu1 %v799_v11  ;;  %v744_v43 = vld [vmem:[#allocation10 + $0x568] sm:$0xff]  ;;  %v743_v11 = vld [vmem:[#allocation10 + $0x560] sm:$0xff] }
 0x219   :  { %1081 = vmatprep.subr.mxu0 %v668_v12  ;;  %1152 = vmatprep.subr.mxu1 %v796_v15  ;;  %v872_v10 = vld [vmem:[#allocation10 + $0xd68] sm:$0xff]  ;;  %v871_v12 = vld [vmem:[#allocation10 + $0xd60] sm:$0xff] }
 0x21a   :  { %1082 = vmatpush1.msra.mxu0 %v667_v16  ;;  %1153 = vmatpush1.msra.mxu1 %v795_v19  ;;  %v740_v15 = vld [vmem:[#allocation10 + $0x528] sm:$0xff]  ;;  %v739_v19 = vld [vmem:[#allocation10 + $0x520] sm:$0xff] }
 0x21b   :  { %1083 = vmatprep.subr.mxu0 %v664_v14  ;;  %1154 = vmatprep.subr.mxu1 %v792_v20  ;;  %v868_v16 = vld [vmem:[#allocation10 + $0xd28] sm:$0xff]  ;;  %v867_v14 = vld [vmem:[#allocation10 + $0xd20] sm:$0xff] }
 0x21c   :  { %1084 = vmatpush1.msra.mxu0 %v663_v8  ;;  %1155 = vmatpush1.msra.mxu1 %v791_v21  ;;  %v736_v20 = vld [vmem:[#allocation10 + $0x4e8] sm:$0xff]  ;;  %v735_v21 = vld [vmem:[#allocation10 + $0x4e0] sm:$0xff] }
 0x21d   :  { %1085 = vmatprep.subr.mxu0 %v660_v22  ;;  %1156 = vmatprep.subr.mxu1 %v788_v23  ;;  %v864_v8 = vld [vmem:[#allocation10 + $0xce8] sm:$0xff]  ;;  %v863_v22 = vld [vmem:[#allocation10 + $0xce0] sm:$0xff] }
 0x21e   :  { %1086 = vmatpush1.msra.mxu0 %v659_v24  ;;  %1157 = vmatpush1.msra.mxu1 %v787_v25  ;;  %v732_v23 = vld [vmem:[#allocation10 + $0x4a8] sm:$0xff]  ;;  %v731_v25 = vld [vmem:[#allocation10 + $0x4a0] sm:$0xff] }
 0x21f   :  { %1087 = vmatprep.subr.mxu0 %v784_v26  ;;  %1158 = vmatprep.subr.mxu1 %v912_v27  ;;  %v860_v24 = vld [vmem:[#allocation10 + $0xca8] sm:$0xff]  ;;  %v859_v26 = vld [vmem:[#allocation10 + $0xca0] sm:$0xff] }
 0x220   :  { %1088 = vmatpush2.msra.mxu0 %v783_v28  ;;  %1159 = vmatpush2.msra.mxu1 %v911_v29  ;;  %v728_v27 = vld [vmem:[#allocation10 + $0x468] sm:$0xff]  ;;  %v727_v29 = vld [vmem:[#allocation10 + $0x460] sm:$0xff] }
 0x221   :  { %1089 = vmatprep.subr.mxu0 %v780_v30  ;;  %1160 = vmatprep.subr.mxu1 %v908_v31  ;;  %v856_v28 = vld [vmem:[#allocation10 + $0xc68] sm:$0xff]  ;;  %v855_v30 = vld [vmem:[#allocation10 + $0xc60] sm:$0xff] }
 0x222   :  { %1090 = vmatpush2.msra.mxu0 %v779_v33  ;;  %1161 = vmatpush2.msra.mxu1 %v907_v34  ;;  %v724_v31 = vld [vmem:[#allocation10 + $0x428] sm:$0xff]  ;;  %v723_v34 = vld [vmem:[#allocation10 + $0x420] sm:$0xff] }
 0x223   :  { %1091 = vmatprep.subr.mxu0 %v776_v36  ;;  %1162 = vmatprep.subr.mxu1 %v904_v39  ;;  %v852_v33 = vld [vmem:[#allocation10 + $0xc28] sm:$0xff]  ;;  %v851_v36 = vld [vmem:[#allocation10 + $0xc20] sm:$0xff] }
 0x224   :  { %1092 = vmatpush2.msra.mxu0 %v775_v40  ;;  %1163 = vmatpush2.msra.mxu1 %v903_v41  ;;  %v1543_v39 = vld [vmem:[#allocation14 + $0x1e8] sm:$0xff]  ;;  %v1545_v40 = vld [vmem:[#allocation14 + $0x1f8] sm:$0xff]  ;;  %v1542_v41 = vld [vmem:[#allocation14 + $0x1e0] sm:$0xff] }
 0x225   :  { %1093 = vmatprep.subr.mxu0 %v772_v42  ;;  %1164 = vmatprep.subr.mxu1 %v900_v45  ;;  %v1544_v42 = vld [vmem:[#allocation14 + $0x1f0] sm:$0xff]  ;;  %v1539_v45 = vld [vmem:[#allocation14 + $0x1c8] sm:$0xff] }
 0x226   :  { %1094 = vmatpush2.msra.mxu0 %v771_v46  ;;  %1165 = vmatpush2.msra.mxu1 %v899_v47  ;;  %v1541_v46 = vld [vmem:[#allocation14 + $0x1d8] sm:$0xff]  ;;  %v1538_v47 = vld [vmem:[#allocation14 + $0x1c0] sm:$0xff] }
 0x227   :  { %1095 = vmatprep.subr.mxu0 %v768_v49  ;;  %1166 = vmatprep.subr.mxu1 %v896_v50  ;;  %v1540_v49 = vld [vmem:[#allocation14 + $0x1d0] sm:$0xff]  ;;  %v1531_v50 = vld [vmem:[#allocation14 + $0x188] sm:$0xff] }
 0x228   :  { %1096 = vmatpush2.msra.mxu0 %v767_v51  ;;  %1167 = vmatpush2.msra.mxu1 %v895_v53  ;;  %v1533_v51 = vld [vmem:[#allocation14 + $0x198] sm:$0xff]  ;;  %v1530_v53 = vld [vmem:[#allocation14 + $0x180] sm:$0xff] }
 0x229   :  { %1097 = vmatprep.subr.mxu0 %v764_v54  ;;  %1168 = vmatprep.subr.mxu1 %v892_v55  ;;  %v1532_v54 = vld [vmem:[#allocation14 + $0x190] sm:$0xff]  ;;  %v1527_v55 = vld [vmem:[#allocation14 + $0x168] sm:$0xff] }
 0x22a   :  { %1098 = vmatpush2.msra.mxu0 %v763_v56  ;;  %1169 = vmatpush2.msra.mxu1 %v891_v57  ;;  %v1529_v56 = vld [vmem:[#allocation14 + $0x178] sm:$0xff]  ;;  %v1526_v57 = vld [vmem:[#allocation14 + $0x160] sm:$0xff] }
 0x22b   :  { %1099 = vmatprep.subr.mxu0 %v760_v58  ;;  %1170 = vmatprep.subr.mxu1 %v888_v59  ;;  %v1528_v58 = vld [vmem:[#allocation14 + $0x170] sm:$0xff]  ;;  %v1523_v59 = vld [vmem:[#allocation14 + $0x148] sm:$0xff] }
 0x22c   :  { %1100 = vmatpush2.msra.mxu0 %v759_v60  ;;  %1171 = vmatpush2.msra.mxu1 %v887_v61  ;;  %v1525_v60 = vld [vmem:[#allocation14 + $0x158] sm:$0xff]  ;;  %v1522_v61 = vld [vmem:[#allocation14 + $0x140] sm:$0xff] }
 0x22d   :  { %1101 = vmatprep.subr.mxu0 %v756_v62  ;;  %1172 = vmatprep.subr.mxu1 %v884_v63  ;;  %v1524_v62 = vld [vmem:[#allocation14 + $0x150] sm:$0xff]  ;;  %v1519_v63 = vld [vmem:[#allocation14 + $0x128] sm:$0xff] }
 0x22e   :  { %1102 = vmatpush2.msra.mxu0 %v755_v1  ;;  %1173 = vmatpush2.msra.mxu1 %v883_v2  ;;  %v1521_v1 = vld [vmem:[#allocation14 + $0x138] sm:$0xff]  ;;  %v1518_v2 = vld [vmem:[#allocation14 + $0x120] sm:$0xff] }
 0x22f   :  { %1103 = vmatprep.subr.mxu0 %v752_v3  ;;  %1174 = vmatprep.subr.mxu1 %v880_v4  ;;  %v1520_v3 = vld [vmem:[#allocation14 + $0x130] sm:$0xff]  ;;  %v1515_v4 = vld [vmem:[#allocation14 + $0x108] sm:$0xff] }
 0x230   :  { %1104 = vmatpush2.msra.mxu0 %v751_v5  ;;  %1175 = vmatpush2.msra.mxu1 %v879_v6  ;;  %v1517_v5 = vld [vmem:[#allocation14 + $0x118] sm:$0xff]  ;;  %v1514_v6 = vld [vmem:[#allocation14 + $0x100] sm:$0xff] }
 0x231   :  { %1105 = vmatprep.subr.mxu0 %v748_v9  ;;  %1176 = vmatprep.subr.mxu1 %v876_v38  ;;  %v1516_v9 = vld [vmem:[#allocation14 + $0x110] sm:$0xff]  ;;  %v1511_v38 = vld [vmem:[#allocation14 + $0xe8] sm:$0xff] }
 0x232   :  { %1106 = vmatpush2.msra.mxu0 %v747_v44  ;;  %1177 = vmatpush2.msra.mxu1 %v875_v37  ;;  %v1513_v44 = vld [vmem:[#allocation14 + $0xf8] sm:$0xff]  ;;  %v1510_v37 = vld [vmem:[#allocation14 + $0xe0] sm:$0xff] }
 0x233   :  { %1107 = vmatprep.subr.mxu0 %v744_v43  ;;  %1178 = vmatprep.subr.mxu1 %v872_v10  ;;  %v1512_v43 = vld [vmem:[#allocation14 + $0xf0] sm:$0xff]  ;;  %v1507_v10 = vld [vmem:[#allocation14 + $0xc8] sm:$0xff] }
 0x234   :  { %1108 = vmatpush2.msra.mxu0 %v743_v11  ;;  %1179 = vmatpush2.msra.mxu1 %v871_v12  ;;  %v1509_v11 = vld [vmem:[#allocation14 + $0xd8] sm:$0xff]  ;;  %v1506_v12 = vld [vmem:[#allocation14 + $0xc0] sm:$0xff] }
 0x235   :  { %1109 = vmatprep.subr.mxu0 %v740_v15  ;;  %1180 = vmatprep.subr.mxu1 %v868_v16  ;;  %v1508_v15 = vld [vmem:[#allocation14 + $0xd0] sm:$0xff]  ;;  %v1503_v16 = vld [vmem:[#allocation14 + $0xa8] sm:$0xff] }
 0x236   :  { %1110 = vmatpush2.msra.mxu0 %v739_v19  ;;  %1181 = vmatpush2.msra.mxu1 %v867_v14  ;;  %v1505_v19 = vld [vmem:[#allocation14 + $0xb8] sm:$0xff]  ;;  %v1502_v14 = vld [vmem:[#allocation14 + $0xa0] sm:$0xff] }
 0x237   :  { %1111 = vmatprep.subr.mxu0 %v736_v20  ;;  %1182 = vmatprep.subr.mxu1 %v864_v8  ;;  %v1504_v20 = vld [vmem:[#allocation14 + $0xb0] sm:$0xff]  ;;  %v1499_v8 = vld [vmem:[#allocation14 + $0x88] sm:$0xff] }
 0x238   :  { %1112 = vmatpush2.msra.mxu0 %v735_v21  ;;  %1183 = vmatpush2.msra.mxu1 %v863_v22  ;;  %v1501_v21 = vld [vmem:[#allocation14 + $0x98] sm:$0xff]  ;;  %v1498_v22 = vld [vmem:[#allocation14 + $0x80] sm:$0xff] }
 0x239   :  { %1113 = vmatprep.subr.mxu0 %v732_v23  ;;  %1184 = vmatprep.subr.mxu1 %v860_v24  ;;  %v1500_v23 = vld [vmem:[#allocation14 + $0x90] sm:$0xff]  ;;  %v1495_v24 = vld [vmem:[#allocation14 + $0x68] sm:$0xff] }
 0x23a   :  { %1114 = vmatpush2.msra.mxu0 %v731_v25  ;;  %1185 = vmatpush2.msra.mxu1 %v859_v26  ;;  %v1497_v25 = vld [vmem:[#allocation14 + $0x78] sm:$0xff]  ;;  %v1494_v26 = vld [vmem:[#allocation14 + $0x60] sm:$0xff] }
 0x23b   :  { %1115 = vmatprep.subr.mxu0 %v728_v27  ;;  %1186 = vmatprep.subr.mxu1 %v856_v28  ;;  %v1496_v27 = vld [vmem:[#allocation14 + $0x70] sm:$0xff]  ;;  %v1491_v28 = vld [vmem:[#allocation14 + $0x48] sm:$0xff] }
 0x23c   :  { %1116 = vmatpush2.msra.mxu0 %v727_v29  ;;  %1187 = vmatpush2.msra.mxu1 %v855_v30  ;;  %v1493_v29 = vld [vmem:[#allocation14 + $0x58] sm:$0xff]  ;;  %v1490_v30 = vld [vmem:[#allocation14 + $0x40] sm:$0xff] }
 0x23d   :  { %1117 = vmatprep.subr.mxu0 %v724_v31  ;;  %1188 = vmatprep.subr.mxu1 %v852_v33  ;;  %v1492_v31 = vld [vmem:[#allocation14 + $0x50] sm:$0xff]  ;;  %v1487_v33 = vld [vmem:[#allocation14 + $0x28] sm:$0xff] }
 0x23e   :  { %1118 = vmatpush2.msra.mxu0 %v723_v34  ;;  %1189 = vmatpush2.msra.mxu1 %v851_v36  ;;  %v1489_v34 = vld [vmem:[#allocation14 + $0x38] sm:$0xff]  ;;  %v1486_v36 = vld [vmem:[#allocation14 + $0x20] sm:$0xff] }
 0x23f   :  { %1120 = vmatmul.mubr.f32.vlgmr.msra.gmra.mxu0 %v653_v13  ;;  %1191 = vmatmul.mubr.f32.vlgmr.msra.gmra.mxu1 %v655_v7  ;;  %v1537_v13 = vld [vmem:[#allocation14 + $0x1b8] sm:$0xff]  ;;  %v1536_v7 = vld [vmem:[#allocation14 + $0x1b0] sm:$0xff] }
 0x240   :  { %1623 = vmatprep.subr.mxu0 %v1543_v39  ;;  %1694 = vmatprep.subr.mxu1 %v1545_v40  ;;  %v1488_v39 = vld [vmem:[#allocation14 + $0x30] sm:$0xff]  ;;  %v1483_v40 = vld [vmem:[#allocation14 + $0x8] sm:$0xff] }
 0x241   :  { %1624 = vmatpush1.msra.mxu0 %v1542_v41  ;;  %1695 = vmatpush1.msra.mxu1 %v1544_v42  ;;  %v1485_v41 = vld [vmem:[#allocation14 + $0x18] sm:$0xff]  ;;  %v1482_v42 = vld [vmem:[#allocation14] sm:$0xff] }
 0x242   :  { %1625 = vmatprep.subr.mxu0 %v1539_v45  ;;  %1696 = vmatprep.subr.mxu1 %v1541_v46  ;;  %v1484_v45 = vld [vmem:[#allocation14 + $0x10] sm:$0xff]  ;;  %v1607_v46 = vld [vmem:[#allocation14 + $0x3e8] sm:$0xff] }
 0x243   :  { %1626 = vmatpush1.msra.mxu0 %v1538_v47  ;;  %1697 = vmatpush1.msra.mxu1 %v1540_v49  ;;  %v1609_v47 = vld [vmem:[#allocation14 + $0x3f8] sm:$0xff]  ;;  %v1606_v49 = vld [vmem:[#allocation14 + $0x3e0] sm:$0xff] }
 0x244   :  { %1627 = vmatprep.subr.mxu0 %v1535_v17  ;;  %1698 = vmatprep.subr.mxu1 %v1537_v13  ;;  %v1608_v17 = vld [vmem:[#allocation14 + $0x3f0] sm:$0xff]  ;;  %v1603_v13 = vld [vmem:[#allocation14 + $0x3c8] sm:$0xff] }
 0x245   :  { %1628 = vmatpush1.msra.mxu0 %v1534_v18  ;;  %1699 = vmatpush1.msra.mxu1 %v1536_v7  ;;  %v1605_v18 = vld [vmem:[#allocation14 + $0x3d8] sm:$0xff]  ;;  %v1602_v7 = vld [vmem:[#allocation14 + $0x3c0] sm:$0xff] }
 0x246   :  { %1629 = vmatprep.subr.mxu0 %v1531_v50  ;;  %1700 = vmatprep.subr.mxu1 %v1533_v51  ;;  %v1604_v50 = vld [vmem:[#allocation14 + $0x3d0] sm:$0xff]  ;;  %v1599_v51 = vld [vmem:[#allocation14 + $0x3a8] sm:$0xff] }
 0x247   :  { %1630 = vmatpush1.msra.mxu0 %v1530_v53  ;;  %1701 = vmatpush1.msra.mxu1 %v1532_v54  ;;  %v1601_v53 = vld [vmem:[#allocation14 + $0x3b8] sm:$0xff]  ;;  %v1598_v54 = vld [vmem:[#allocation14 + $0x3a0] sm:$0xff] }
 0x248   :  { %1631 = vmatprep.subr.mxu0 %v1527_v55  ;;  %1702 = vmatprep.subr.mxu1 %v1529_v56  ;;  %v1600_v55 = vld [vmem:[#allocation14 + $0x3b0] sm:$0xff]  ;;  %v1595_v56 = vld [vmem:[#allocation14 + $0x388] sm:$0xff] }
 0x249   :  { %1632 = vmatpush1.msra.mxu0 %v1526_v57  ;;  %1703 = vmatpush1.msra.mxu1 %v1528_v58  ;;  %v1597_v57 = vld [vmem:[#allocation14 + $0x398] sm:$0xff]  ;;  %v1594_v58 = vld [vmem:[#allocation14 + $0x380] sm:$0xff] }
 0x24a   :  { %1633 = vmatprep.subr.mxu0 %v1523_v59  ;;  %1704 = vmatprep.subr.mxu1 %v1525_v60  ;;  %v1596_v59 = vld [vmem:[#allocation14 + $0x390] sm:$0xff]  ;;  %v1591_v60 = vld [vmem:[#allocation14 + $0x368] sm:$0xff] }
 0x24b   :  { %1634 = vmatpush1.msra.mxu0 %v1522_v61  ;;  %1705 = vmatpush1.msra.mxu1 %v1524_v62  ;;  %v1593_v61 = vld [vmem:[#allocation14 + $0x378] sm:$0xff]  ;;  %v1590_v62 = vld [vmem:[#allocation14 + $0x360] sm:$0xff] }
 0x24c   :  { %1635 = vmatprep.subr.mxu0 %v1519_v63  ;;  %1706 = vmatprep.subr.mxu1 %v1521_v1  ;;  %v1592_v63 = vld [vmem:[#allocation14 + $0x370] sm:$0xff]  ;;  %v1587_v1 = vld [vmem:[#allocation14 + $0x348] sm:$0xff] }
 0x24d   :  { %1636 = vmatpush1.msra.mxu0 %v1518_v2  ;;  %1707 = vmatpush1.msra.mxu1 %v1520_v3  ;;  %v1589_v2 = vld [vmem:[#allocation14 + $0x358] sm:$0xff]  ;;  %v1586_v3 = vld [vmem:[#allocation14 + $0x340] sm:$0xff] }
 0x24e   :  { %1637 = vmatprep.subr.mxu0 %v1515_v4  ;;  %1708 = vmatprep.subr.mxu1 %v1517_v5  ;;  %v1588_v4 = vld [vmem:[#allocation14 + $0x350] sm:$0xff]  ;;  %v1583_v5 = vld [vmem:[#allocation14 + $0x328] sm:$0xff] }
 0x24f   :  { %1638 = vmatpush1.msra.mxu0 %v1514_v6  ;;  %1709 = vmatpush1.msra.mxu1 %v1516_v9  ;;  %v1585_v6 = vld [vmem:[#allocation14 + $0x338] sm:$0xff]  ;;  %v1582_v9 = vld [vmem:[#allocation14 + $0x320] sm:$0xff] }
 0x250   :  { %1639 = vmatprep.subr.mxu0 %v1511_v38  ;;  %1710 = vmatprep.subr.mxu1 %v1513_v44  ;;  %v1584_v38 = vld [vmem:[#allocation14 + $0x330] sm:$0xff]  ;;  %v1579_v44 = vld [vmem:[#allocation14 + $0x308] sm:$0xff] }
 0x251   :  { %1640 = vmatpush1.msra.mxu0 %v1510_v37  ;;  %1711 = vmatpush1.msra.mxu1 %v1512_v43  ;;  %v1581_v37 = vld [vmem:[#allocation14 + $0x318] sm:$0xff]  ;;  %v1578_v43 = vld [vmem:[#allocation14 + $0x300] sm:$0xff] }
 0x252   :  { %1641 = vmatprep.subr.mxu0 %v1507_v10  ;;  %1712 = vmatprep.subr.mxu1 %v1509_v11  ;;  %v1580_v10 = vld [vmem:[#allocation14 + $0x310] sm:$0xff]  ;;  %v1575_v11 = vld [vmem:[#allocation14 + $0x2e8] sm:$0xff] }
 0x253   :  { %1642 = vmatpush1.msra.mxu0 %v1506_v12  ;;  %1713 = vmatpush1.msra.mxu1 %v1508_v15  ;;  %v1577_v12 = vld [vmem:[#allocation14 + $0x2f8] sm:$0xff]  ;;  %v1574_v15 = vld [vmem:[#allocation14 + $0x2e0] sm:$0xff] }
 0x254   :  { %1643 = vmatprep.subr.mxu0 %v1503_v16  ;;  %1714 = vmatprep.subr.mxu1 %v1505_v19  ;;  %v1576_v16 = vld [vmem:[#allocation14 + $0x2f0] sm:$0xff]  ;;  %v1571_v19 = vld [vmem:[#allocation14 + $0x2c8] sm:$0xff] }
 0x255   :  { %1644 = vmatpush1.msra.mxu0 %v1502_v14  ;;  %1715 = vmatpush1.msra.mxu1 %v1504_v20  ;;  %v1573_v14 = vld [vmem:[#allocation14 + $0x2d8] sm:$0xff]  ;;  %v1570_v20 = vld [vmem:[#allocation14 + $0x2c0] sm:$0xff] }
 0x256   :  { %1645 = vmatprep.subr.mxu0 %v1499_v8  ;;  %1716 = vmatprep.subr.mxu1 %v1501_v21  ;;  %v1572_v8 = vld [vmem:[#allocation14 + $0x2d0] sm:$0xff]  ;;  %v1567_v21 = vld [vmem:[#allocation14 + $0x2a8] sm:$0xff] }
 0x257   :  { %1646 = vmatpush1.msra.mxu0 %v1498_v22  ;;  %1717 = vmatpush1.msra.mxu1 %v1500_v23  ;;  %v1569_v22 = vld [vmem:[#allocation14 + $0x2b8] sm:$0xff] }
 0x258   :  { %1647 = vmatprep.subr.mxu0 %v1495_v24  ;;  %1718 = vmatprep.subr.mxu1 %v1497_v25  ;;  %v1566_v25 = vld [vmem:[#allocation14 + $0x2a0] sm:$0xff] }
 0x259   :  { %1648 = vmatpush1.msra.mxu0 %v1494_v26  ;;  %1719 = vmatpush1.msra.mxu1 %v1496_v27  ;;  %v1568_v26 = vld [vmem:[#allocation14 + $0x2b0] sm:$0xff]  ;;  %v1563_v27 = vld [vmem:[#allocation14 + $0x288] sm:$0xff] }
 0x25a   :  { %1649 = vmatprep.subr.mxu0 %v1491_v28  ;;  %1720 = vmatprep.subr.mxu1 %v1493_v29  ;;  %v1565_v28 = vld [vmem:[#allocation14 + $0x298] sm:$0xff]  ;;  %v1562_v29 = vld [vmem:[#allocation14 + $0x280] sm:$0xff] }
 0x25b   :  { %1650 = vmatpush1.msra.mxu0 %v1490_v30  ;;  %1721 = vmatpush1.msra.mxu1 %v1492_v31  ;;  %v1564_v30 = vld [vmem:[#allocation14 + $0x290] sm:$0xff]  ;;  %v1559_v31 = vld [vmem:[#allocation14 + $0x268] sm:$0xff] }
 0x25c   :  { %1651 = vmatprep.subr.mxu0 %v1487_v33  ;;  %1722 = vmatprep.subr.mxu1 %v1489_v34  ;;  %v1561_v33 = vld [vmem:[#allocation14 + $0x278] sm:$0xff] }
 0x25d   :  { %1652 = vmatpush1.msra.mxu0 %v1486_v36  ;;  %1723 = vmatpush1.msra.mxu1 %v1488_v39  ;;  %v1558_v39 = vld [vmem:[#allocation14 + $0x260] sm:$0xff] }
 0x25e   :  { %1653 = vmatprep.subr.mxu0 %v1483_v40  ;;  %1724 = vmatprep.subr.mxu1 %v1485_v41  ;;  %v1560_v40 = vld [vmem:[#allocation14 + $0x270] sm:$0xff]  ;;  %v1555_v41 = vld [vmem:[#allocation14 + $0x248] sm:$0xff] }
 0x25f   :  { %1654 = vmatpush1.msra.mxu0 %v1482_v42  ;;  %1725 = vmatpush1.msra.mxu1 %v1484_v45  ;;  %v1557_v42 = vld [vmem:[#allocation14 + $0x258] sm:$0xff]  ;;  %v1554_v45 = vld [vmem:[#allocation14 + $0x240] sm:$0xff] }
 0x260   :  { %1655 = vmatprep.subr.mxu0 %v1607_v46  ;;  %1726 = vmatprep.subr.mxu1 %v1609_v47  ;;  %v1556_v46 = vld [vmem:[#allocation14 + $0x250] sm:$0xff] }
 0x261   :  { %1656 = vmatpush2.msra.mxu0 %v1606_v49  ;;  %1727 = vmatpush2.msra.mxu1 %v1608_v17  ;;  %v1551_v49 = vld [vmem:[#allocation14 + $0x228] sm:$0xff]  ;;  %v1553_v17 = vld [vmem:[#allocation14 + $0x238] sm:$0xff] }
 0x262   :  { %1657 = vmatprep.subr.mxu0 %v1603_v13  ;;  %1728 = vmatprep.subr.mxu1 %v1605_v18  ;;  %v1550_v13 = vld [vmem:[#allocation14 + $0x220] sm:$0xff]  ;;  %v1552_v18 = vld [vmem:[#allocation14 + $0x230] sm:$0xff] }
 0x263   :  { %1658 = vmatpush2.msra.mxu0 %v1602_v7  ;;  %1729 = vmatpush2.msra.mxu1 %v1604_v50  ;;  %v1547_v50 = vld [vmem:[#allocation14 + $0x208] sm:$0xff] }
 0x264   :  { %1659 = vmatprep.subr.mxu0 %v1599_v51  ;;  %1730 = vmatprep.subr.mxu1 %v1601_v53  ;;  %v1549_v51 = vld [vmem:[#allocation14 + $0x218] sm:$0xff]  ;;  %v1546_v53 = vld [vmem:[#allocation14 + $0x200] sm:$0xff] }
 0x265   :  { %1660 = vmatpush2.msra.mxu0 %v1598_v54  ;;  %1731 = vmatpush2.msra.mxu1 %v1600_v55  ;;  %v1548_v55 = vld [vmem:[#allocation14 + $0x210] sm:$0xff] }
 0x266   :  { %1661 = vmatprep.subr.mxu0 %v1595_v56  ;;  %1732 = vmatprep.subr.mxu1 %v1597_v57 }
 0x267   :  { %1662 = vmatpush2.msra.mxu0 %v1594_v58  ;;  %1733 = vmatpush2.msra.mxu1 %v1596_v59 }
 0x268   :  { %1663 = vmatprep.subr.mxu0 %v1591_v60  ;;  %1734 = vmatprep.subr.mxu1 %v1593_v61 }
 0x269   :  { %1664 = vmatpush2.msra.mxu0 %v1590_v62  ;;  %1735 = vmatpush2.msra.mxu1 %v1592_v63 }
 0x26a   :  { %1665 = vmatprep.subr.mxu0 %v1587_v1  ;;  %1736 = vmatprep.subr.mxu1 %v1589_v2  ;;  %v4188_v2 = vmov 1983009808  }
 0x26b   :  { %1666 = vmatpush2.msra.mxu0 %v1586_v3  ;;  %1737 = vmatpush2.msra.mxu1 %v1588_v4  ;;  %v1298_v3 = vunpack.c.l.s4 %v4188_v2 }
 0x26c   :  { %1667 = vmatprep.subr.mxu0 %v1583_v5  ;;  %1738 = vmatprep.subr.mxu1 %v1585_v6 }
 0x26d   :  { %1668 = vmatpush2.msra.mxu0 %v1582_v9  ;;  %1739 = vmatpush2.msra.mxu1 %v1584_v38 }
 0x26e   :  { %1669 = vmatprep.subr.mxu0 %v1579_v44  ;;  %1740 = vmatprep.subr.mxu1 %v1581_v37  ;;  %v1299_v44 = vunpack.c.0.s8 %v1298_v3 }
 0x26f   :  { %1670 = vmatpush2.msra.mxu0 %v1578_v43  ;;  %1741 = vmatpush2.msra.mxu1 %v1580_v10 }
 0x270   :  { %1671 = vmatprep.subr.mxu0 %v1575_v11  ;;  %1742 = vmatprep.subr.mxu1 %v1577_v12 }
 0x271   :  { %1672 = vmatpush2.msra.mxu0 %v1574_v15  ;;  %1743 = vmatpush2.msra.mxu1 %v1576_v16 }
 0x272   :  { %1673 = vmatprep.subr.mxu0 %v1571_v19  ;;  %1744 = vmatprep.subr.mxu1 %v1573_v14 }
 0x273   :  { %1674 = vmatpush2.msra.mxu0 %v1570_v20  ;;  %1745 = vmatpush2.msra.mxu1 %v1572_v8 }
 0x274   :  { %1675 = vmatprep.subr.mxu0 %v1567_v21  ;;  %1746 = vmatprep.subr.mxu1 %v1569_v22  ;;  %v4437_v21 = vsub.s32 %v1299_v44, %v4375_v32 }
 0x275   :  { %1676 = vmatpush2.msra.mxu0 %v1566_v25  ;;  %1747 = vmatpush2.msra.mxu1 %v1568_v26 }
 0x276   :  { %1677 = vmatprep.subr.mxu0 %v1563_v27  ;;  %1748 = vmatprep.subr.mxu1 %v1565_v28 }
 0x277   :  { %1678 = vmatpush2.msra.mxu0 %v1562_v29  ;;  %1749 = vmatpush2.msra.mxu1 %v1564_v30 }
 0x278   :  { %1679 = vmatprep.subr.mxu0 %v1559_v31  ;;  %1750 = vmatprep.subr.mxu1 %v1561_v33 }
 0x279   :  { %1680 = vmatpush2.msra.mxu0 %v1558_v39  ;;  %1751 = vmatpush2.msra.mxu1 %v1560_v40 }
 0x27a   :  { %1681 = vmatprep.subr.mxu0 %v1555_v41  ;;  %1752 = vmatprep.subr.mxu1 %v1557_v42 }
 0x27b   :  { %1682 = vmatpush2.msra.mxu0 %v1554_v45  ;;  %1753 = vmatpush2.msra.mxu1 %v1556_v46 }
 0x27c   :  { %1683 = vmatprep.subr.mxu0 %v1551_v49  ;;  %1754 = vmatprep.subr.mxu1 %v1553_v17 }
 0x27d   :  { %1684 = vmatpush2.msra.mxu0 %v1550_v13  ;;  %1755 = vmatpush2.msra.mxu1 %v1552_v18 }
 0x27e   :  { %1685 = vmatprep.subr.mxu0 %v1547_v50  ;;  %1756 = vmatprep.subr.mxu1 %v1549_v51 }
 0x27f   :  { %1686 = vmatpush2.msra.mxu0 %v1546_v53  ;;  %1757 = vmatpush2.msra.mxu1 %v1548_v55 }
 0x2be   :  { %v979_v23 = vpop.f32.mrf.mxu0  ;;  %v1050_v24 = vpop.f32.mrf.mxu1 }
 0x2bf   :  { %v1051_v7 = vadd.f32 %v1050_v24, %v979_v23 }
 0x2c0   :  { %v981_v34 = vpop.f32.mrf.mxu0  ;;  %v1052_v36 = vpop.f32.mrf.mxu1 }
 0x2c1   :  { %v1053_v47 = vadd.f32 %v1052_v36, %v981_v34 }
 0x2c3   :  { %v1199_v54 = vcombine.low %v1051_v7, %v1053_v47 }
 0x2c5   :  { %v1206_v56 = vrot.slane %v1199_v54, %v4378_v35 }
 0x2c7   :  { %v1207_v63 = vcombine.high %v1206_v56, %v1206_v56  ;;  %v1214_v4 = vrot.slane %v1206_v56, %v4378_v35 }
 0x2c9   :  { %v1221_v6 = vrot.slane %v1207_v63, %v4378_v35  ;;  %v1250_v37 = vrot.slane %v1214_v4, %v4383_v48  ;;  %v1254_v43 = vrot.slane %v1214_v4, %v4389_v52 }
 0x2cb   :  { %v1258_v15 = vrot.slane %v1221_v6, %v4383_v48  ;;  %v1262_v16 = vrot.slane %v1221_v6, %v4389_v52 }
 0x2ff   :  { %v1121_v57 = vpop.f32.mrf.mxu0  ;;  %v1192_v58 = vpop.f32.mrf.mxu1 }
 0x300   :  { %v1193_v61 = vadd.f32 %v1192_v58, %v1121_v57 }
 0x301   :  { %v1123_v59 = vpop.f32.mrf.mxu0  ;;  %v1194_v60 = vpop.f32.mrf.mxu1 }
 0x302   :  { %v1195_v62 = vadd.f32 %v1194_v60, %v1123_v59 }
 0x304   :  { %v1224_v1 = vcombine.low %v1193_v61, %v1195_v62 }
 0x306   :  { %v1231_v5 = vrot.slane %v1224_v1, %v4378_v35 }
 0x308   :  { %v1232_v9 = vcombine.high %v1231_v5, %v1231_v5  ;;  %v1239_v38 = vrot.slane %v1231_v5, %v4378_v35 }
 0x30a   :  { %v1246_v10 = vrot.slane %v1232_v9, %v4378_v35  ;;  %v1270_v11 = vrot.slane %v1239_v38, %v4383_v48  ;;  %v1274_v12 = vrot.slane %v1239_v38, %v4389_v52 }
 0x30c   :  { %v1278_v19 = vrot.slane %v1246_v10, %v4383_v48  ;;  %v1282_v14 = vrot.slane %v1246_v10, %v4389_v52  ;;  %v1288_v20 = vsel %vm1287_vm1, %v1250_v37, %v1270_v11  ;;  %v1289_v8 = vsel %vm1287_vm1, %v1254_v43, %v1274_v12 }
 0x30d   :  { %v1296_v22 = vcombine.low %v1288_v20, %v1289_v8  ;;  %v1388_v8 = vld [vmem:[#allocation11] sm:$0x3] }
 0x30e   :  { %v1290_v23 = vsel %vm1287_vm1, %v1258_v15, %v1278_v19  ;;  %v1291_v24 = vsel %vm1287_vm1, %v1262_v16, %v1282_v14 }
 0x30f   :  { %v1304_v25 = vcombine.low %v1290_v23, %v1291_v24  ;;  %v4442_v26 = vrot.slane %v1296_v22, %v4437_v21 }
 0x311   :  { %v4445_v27 = vrot.slane %v1304_v25, %v4437_v21 }
 0x313   :  { %v1314_v28 = vcombine.low %v4442_v26, %v4445_v27 }
 0x315   :  { %v1321_v29 = vrot.slane %v1314_v28, %v4437_v21 }
 0x317   :  { %v1322_v30 = vcombine.high %v1321_v29, %v1321_v29  ;;  %v1326_v31 = vsel %vm1325_vm2, %v1321_v29, 0.0 }
 0x318   :  { %v1327_v33 = vrot.slane %v1326_v31, 4 }
 0x319   :  { %v1333_v34 = vsel %vm1325_vm2, %v1322_v30, 0.0 }
 0x31a   :  { %v1328_v36 = vadd.f32 %v1327_v33, %v1326_v31  ;;  %v1334_v39 = vrot.slane %v1333_v34, 4 }
 0x31c   :  { %v1329_v40 = vrot.slane %v1328_v36, 2  ;;  %v1335_v41 = vadd.f32 %v1334_v39, %v1333_v34  ;;  %v1412_v34 = vld [vmem:[#allocation13] sm:$0x3] }
 0x31e   :  { %v1330_v42 = vadd.f32 %v1329_v40, %v1328_v36  ;;  %v1336_v45 = vrot.slane %v1335_v41, 2 }
 0x320   :  { %v1331_v46 = vrot.slane %v1330_v42, 1  ;;  %v1337_v47 = vadd.f32 %v1336_v45, %v1335_v41 }
 0x322   :  { %v1332_v49 = vadd.f32 %v1331_v46, %v1330_v42  ;;  %v1338_v17 = vrot.slane %v1337_v47, 1 }
 0x324   :  { %v1339_v13 = vadd.f32 %v1338_v17, %v1337_v47  ;;  %v1340_v18 = vmul.f32 0.25, %v1332_v49 }
 0x326   :  { %v1341_v7 = vmul.f32 0.25, %v1339_v13 }
 0x328   :  { %v1344_v50 = vcombine.low %v1340_v18, %v1341_v7 }
 0x32a   :  { %v1351_v51 = vrot.slane %v1344_v50, %v4437_v21 }
 0x32c   :  { %v1352_v53 = vcombine.high %v1351_v51, %v1351_v51  ;;  %v1355_v54 = vsub.f32 %v4442_v26, %v1351_v51 }
 0x32e   :  { %v1356_v55 = vsub.f32 %v4445_v27, %v1352_v53  ;;  %v1357_v56 = vmul.f32 %v1355_v54, %v1355_v54 }
 0x330   :  { %v1358_v57 = vmul.f32 %v1356_v55, %v1356_v55 }
 0x332   :  { %v1361_v58 = vcombine.low %v1357_v56, %v1358_v57  ;;  %v2086_v56 = vld [vmem:[#allocation19 + $0x1f0] sm:$0xff]  ;;  %v2081_v57 = vld [vmem:[#allocation19 + $0x1c8] sm:$0xff] }
 0x334   :  { %v1368_v59 = vrot.slane %v1361_v58, %v4437_v21  ;;  %v2083_v58 = vld [vmem:[#allocation19 + $0x1d8] sm:$0xff] }
 0x336   :  { %v1369_v60 = vcombine.high %v1368_v59, %v1368_v59  ;;  %v1372_v61 = vsel %vm1325_vm2, %v1368_v59, 0.0  ;;  %v2080_v59 = vld [vmem:[#allocation19 + $0x1c0] sm:$0xff] }
 0x337   :  { %v1373_v62 = vrot.slane %v1372_v61, 4 }
 0x338   :  { %v1379_v63 = vsel %vm1325_vm2, %v1369_v60, 0.0  ;;  %v2082_v60 = vld [vmem:[#allocation19 + $0x1d0] sm:$0xff] }
 0x339   :  { %v1374_v1 = vadd.f32 %v1373_v62, %v1372_v61  ;;  %v1380_v2 = vrot.slane %v1379_v63, 4  ;;  %v2077_v61 = vld [vmem:[#allocation19 + $0x1a8] sm:$0xff]  ;;  %v2079_v62 = vld [vmem:[#allocation19 + $0x1b8] sm:$0xff] }
 0x33b   :  { %v1375_v3 = vrot.slane %v1374_v1, 2  ;;  %v1381_v4 = vadd.f32 %v1380_v2, %v1379_v63  ;;  %v2076_v63 = vld [vmem:[#allocation19 + $0x1a0] sm:$0xff]  ;;  %v2073_v2 = vld [vmem:[#allocation19 + $0x188] sm:$0xff] }
 0x33d   :  { %v1376_v5 = vadd.f32 %v1375_v3, %v1374_v1  ;;  %v1382_v6 = vrot.slane %v1381_v4, 2  ;;  %v2078_v1 = vld [vmem:[#allocation19 + $0x1b0] sm:$0xff]  ;;  %v2075_v3 = vld [vmem:[#allocation19 + $0x198] sm:$0xff] }
 0x33f   :  { %v1377_v9 = vrot.slane %v1376_v5, 1  ;;  %v1383_v38 = vadd.f32 %v1382_v6, %v1381_v4  ;;  %v2072_v4 = vld [vmem:[#allocation19 + $0x180] sm:$0xff]  ;;  %v2069_v6 = vld [vmem:[#allocation19 + $0x168] sm:$0xff] }
 0x341   :  { %v1378_v44 = vadd.f32 %v1377_v9, %v1376_v5  ;;  %v1384_v37 = vrot.slane %v1383_v38, 1  ;;  %v2074_v5 = vld [vmem:[#allocation19 + $0x190] sm:$0xff]  ;;  %v2071_v9 = vld [vmem:[#allocation19 + $0x178] sm:$0xff] }
 0x343   :  { %v1385_v43 = vadd.f32 %v1384_v37, %v1383_v38  ;;  %v1386_v10 = vmul.f32 0.25, %v1378_v44  ;;  %v2068_v38 = vld [vmem:[#allocation19 + $0x160] sm:$0xff]  ;;  %v2070_v44 = vld [vmem:[#allocation19 + $0x170] sm:$0xff]  ;;  %v2065_v37 = vld [vmem:[#allocation19 + $0x148] sm:$0xff] }
 0x345   :  { %v1387_v11 = vmul.f32 0.25, %v1385_v43  ;;  %v1389_v12 = vadd.f32 1e-05, %v1386_v10  ;;  %v2067_v43 = vld [vmem:[#allocation19 + $0x158] sm:$0xff]  ;;  %v2064_v10 = vld [vmem:[#allocation19 + $0x140] sm:$0xff] }
 0x347   :  { %v1390_v15 = vadd.f32 1e-05, %v1387_v11  ;;  %3764 = vrsqrt.f32 %v1389_v12  ;;  %v2066_v11 = vld [vmem:[#allocation19 + $0x150] sm:$0xff]  ;;  %v2061_v12 = vld [vmem:[#allocation19 + $0x128] sm:$0xff] }
 0x349   :  { %3766 = vrsqrt.f32 %v1390_v15  ;;  %v2063_v15 = vld [vmem:[#allocation19 + $0x138] sm:$0xff] }
 0x354   :  { %v3765_v16 = vpop.eup %3764 }
 0x356   :  { %v3767_v19 = vpop.eup %3766 }
 0x357   :  { %v1395_v14 = vcombine.low %v3765_v16, %v3767_v19  ;;  %v2060_v16 = vld [vmem:[#allocation19 + $0x120] sm:$0xff]  ;;  %v2062_v19 = vld [vmem:[#allocation19 + $0x130] sm:$0xff] }
 0x359   :  { %v1402_v20 = vrot.slane %v1395_v14, %v4378_v35  ;;  %v2057_v14 = vld [vmem:[#allocation19 + $0x108] sm:$0xff] }
 0x35b   :  { %v1409_v22 = vrot.slane %v1402_v20, %v4378_v35  ;;  %v2059_v20 = vld [vmem:[#allocation19 + $0x118] sm:$0xff] }
 0x35d   :  { %v1411_v23 = vmul.f32 %v1409_v22, %v1388_v8  ;;  %v2056_v8 = vld [vmem:[#allocation19 + $0x100] sm:$0xff]  ;;  %v2058_v22 = vld [vmem:[#allocation19 + $0x110] sm:$0xff] }
 0x35f   :  { %v1417_v24 = vrot.slane %v1411_v23, %v4383_v48  ;;  %v1421_v25 = vrot.slane %v1411_v23, %v4389_v52  ;;  %v2053_v23 = vld [vmem:[#allocation19 + $0xe8] sm:$0xff] }
 0x361   :  { %v1424_v28 = vmul.f32 %v1417_v24, %v1340_v18  ;;  %v1425_v29 = vmul.f32 %v1421_v25, %v1341_v7  ;;  %v1445_v33 = vcombine.low %v1417_v24, %v1421_v25  ;;  %v2055_v24 = vld [vmem:[#allocation19 + $0xf8] sm:$0xff]  ;;  %v2052_v25 = vld [vmem:[#allocation19 + $0xe0] sm:$0xff] }
 0x363   :  { %v1428_v30 = vcombine.low %v1424_v28, %v1425_v29  ;;  %v1452_v40 = vrot.slane %v1445_v33, %v4437_v21  ;;  %v2054_v28 = vld [vmem:[#allocation19 + $0xf0] sm:$0xff]  ;;  %v2049_v29 = vld [vmem:[#allocation19 + $0xc8] sm:$0xff] }
 0x364   :  { %v2050_v33 = vld [vmem:[#allocation19 + $0xd0] sm:$0xff] }
 0x365   :  { %v1435_v31 = vrot.slane %v1428_v30, %v4378_v35  ;;  %v1453_v45 = vcombine.high %v1452_v40, %v1452_v40  ;;  %v1456_v47 = vmul.f32 %v1452_v40, %v4442_v26  ;;  %v2087_v26 = vld [vmem:[#allocation19 + $0x1f8] sm:$0xff]  ;;  %v2046_v40 = vld [vmem:[#allocation19 + $0xb0] sm:$0xff] }
 0x366   :  { %2181 = vmatprep.subr.mxu1 %v2087_v26  ;;  %v2051_v30 = vld [vmem:[#allocation19 + $0xd8] sm:$0xff]  ;;  %v2025_v26 = vld [vmem:[#allocation19 + $0x8] sm:$0xff] }
 0x367   :  { %v1442_v36 = vrot.slane %v1435_v31, %v4378_v35  ;;  %v1457_v17 = vmul.f32 %v1453_v45, %v4445_v27  ;;  %v2084_v27 = vld [vmem:[#allocation19 + $0x1e0] sm:$0xff] }
 0x368   :  { %v2048_v31 = vld [vmem:[#allocation19 + $0xc0] sm:$0xff] }
 0x369   :  { %v1444_v39 = vsub.f32 %v1412_v34, %v1442_v36  ;;  %v2045_v34 = vld [vmem:[#allocation19 + $0xa8] sm:$0xff]  ;;  %v2047_v36 = vld [vmem:[#allocation19 + $0xb8] sm:$0xff]  ;;  %v2040_v45 = vld [vmem:[#allocation19 + $0x80] sm:$0xff] }
 0x36b   :  { %v1462_v41 = vrot.slane %v1444_v39, %v4383_v48  ;;  %v1466_v42 = vrot.slane %v1444_v39, %v4389_v52  ;;  %v2085_v52 = vld [vmem:[#allocation19 + $0x1e8] sm:$0xff]  ;;  %v2044_v39 = vld [vmem:[#allocation19 + $0xa0] sm:$0xff] }
 0x36c   :  { %2110 = vmatprep.subr.mxu0 %v2085_v52  ;;  %v2030_v52 = vld [vmem:[#allocation19 + $0x30] sm:$0xff] }
 0x36d   :  { %v1467_v46 = vcombine.low %v1462_v41, %v1466_v42  ;;  %v2041_v41 = vld [vmem:[#allocation19 + $0x88] sm:$0xff]  ;;  %v2043_v42 = vld [vmem:[#allocation19 + $0x98] sm:$0xff] }
 0x36f   :  { %v1474_v49 = vrot.slane %v1467_v46, %v4437_v21  ;;  %v2042_v46 = vld [vmem:[#allocation19 + $0x90] sm:$0xff] }
 0x371   :  { %v1475_v13 = vcombine.high %v1474_v49, %v1474_v49  ;;  %v1478_v18 = vadd.f32 %v1474_v49, %v1456_v47  ;;  %v2037_v47 = vld [vmem:[#allocation19 + $0x68] sm:$0xff]  ;;  %v2039_v49 = vld [vmem:[#allocation19 + $0x78] sm:$0xff] }
 0x373   :  { %v1479_v7 = vadd.f32 %v1475_v13, %v1457_v17  ;;  %v1480_v50 = vmax.f32 %v1478_v18, 0.0  ;;  %v2036_v17 = vld [vmem:[#allocation19 + $0x60] sm:$0xff]  ;;  %v2038_v13 = vld [vmem:[#allocation19 + $0x70] sm:$0xff]  ;;  %v2033_v18 = vld [vmem:[#allocation19 + $0x48] sm:$0xff] }
 0x375   :  { %v1481_v51 = vmax.f32 %v1479_v7, 0.0  ;;  %v2035_v7 = vld [vmem:[#allocation19 + $0x58] sm:$0xff] }
 0x377   :  { %v1612_v53 = vcombine.low %v1480_v50, %v1481_v51  ;;  %v2032_v50 = vld [vmem:[#allocation19 + $0x40] sm:$0xff]  ;;  %v2034_v51 = vld [vmem:[#allocation19 + $0x50] sm:$0xff] }
 0x379   :  { %v1619_v54 = vrot.slane %v1612_v53, %v4437_v21  ;;  %v2029_v53 = vld [vmem:[#allocation19 + $0x28] sm:$0xff] }
 0x37b   :  { %v1620_v55 = vcombine.high %v1619_v54, %v1619_v54 }
 0x37d   :  { %1687 = vmatprep.mubr.f32.mxu0 %v1620_v55  ;;  %1758 = vmatprep.mubr.f32.mxu1 %v1620_v55  ;;  %v2028_v55 = vld [vmem:[#allocation19 + $0x20] sm:$0xff] }
 0x37e   :  { %1688 = vmatmul.mubr.f32.vlgmr.msra.gmra.mxu0 %v1619_v54  ;;  %1759 = vmatmul.mubr.f32.vlgmr.msra.gmra.mxu1 %v1619_v54  ;;  %v2031_v54 = vld [vmem:[#allocation19 + $0x38] sm:$0xff] }
 0x37f   :  { %2174 = vmatprep.mubr.f32.mxu0 %v4186_v0  ;;  %2245 = vmatprep.mubr.f32.mxu1 %v4186_v0 }
 0x380   :  { %2111 = vmatpush1.msra.mxu0 %v2084_v27  ;;  %2182 = vmatpush1.msra.mxu1 %v2086_v56  ;;  %v2027_v27 = vld [vmem:[#allocation19 + $0x18] sm:$0xff]  ;;  %v2024_v56 = vld [vmem:[#allocation19] sm:$0xff] }
 0x381   :  { %2112 = vmatprep.subr.mxu0 %v2081_v57  ;;  %2183 = vmatprep.subr.mxu1 %v2083_v58  ;;  %v2026_v57 = vld [vmem:[#allocation19 + $0x10] sm:$0xff]  ;;  %v1767_v58 = vand.u32 1, %v4375_v32 }
 0x382   :  { %2113 = vmatpush1.msra.mxu0 %v2080_v59  ;;  %2184 = vmatpush1.msra.mxu1 %v2082_v60 }
 0x383   :  { %2114 = vmatprep.subr.mxu0 %v2077_v61  ;;  %2185 = vmatprep.subr.mxu1 %v2079_v62  ;;  %vm1784_vm4 = vcmp.eq.s32.totalorder %v1767_v58, 1  ;;  %vm1781_vm5 = vcmp.eq.s32.totalorder %v1767_v58, 0 }
 0x384   :  { %2115 = vmatpush1.msra.mxu0 %v2076_v63  ;;  %2186 = vmatpush1.msra.mxu1 %v2078_v1 }
 0x385   :  { %2116 = vmatprep.subr.mxu0 %v2073_v2  ;;  %2187 = vmatprep.subr.mxu1 %v2075_v3 }
 0x386   :  { %2117 = vmatpush1.msra.mxu0 %v2072_v4  ;;  %2188 = vmatpush1.msra.mxu1 %v2074_v5 }
 0x387   :  { %2118 = vmatprep.subr.mxu0 %v2069_v6  ;;  %2189 = vmatprep.subr.mxu1 %v2071_v9 }
 0x388   :  { %2119 = vmatpush1.msra.mxu0 %v2068_v38  ;;  %2190 = vmatpush1.msra.mxu1 %v2070_v44 }
 0x389   :  { %2120 = vmatprep.subr.mxu0 %v2065_v37  ;;  %2191 = vmatprep.subr.mxu1 %v2067_v43 }
 0x38a   :  { %2121 = vmatpush1.msra.mxu0 %v2064_v10  ;;  %2192 = vmatpush1.msra.mxu1 %v2066_v11 }
 0x38b   :  { %2122 = vmatprep.subr.mxu0 %v2061_v12  ;;  %2193 = vmatprep.subr.mxu1 %v2063_v15 }
 0x38c   :  { %2123 = vmatpush1.msra.mxu0 %v2060_v16  ;;  %2194 = vmatpush1.msra.mxu1 %v2062_v19 }
 0x38d   :  { %2124 = vmatprep.subr.mxu0 %v2057_v14  ;;  %2195 = vmatprep.subr.mxu1 %v2059_v20 }
 0x38e   :  { %2125 = vmatpush1.msra.mxu0 %v2056_v8  ;;  %2196 = vmatpush1.msra.mxu1 %v2058_v22 }
 0x38f   :  { %2126 = vmatprep.subr.mxu0 %v2053_v23  ;;  %2197 = vmatprep.subr.mxu1 %v2055_v24 }
 0x390   :  { %2127 = vmatpush1.msra.mxu0 %v2052_v25  ;;  %2198 = vmatpush1.msra.mxu1 %v2054_v28 }
 0x391   :  { %2128 = vmatprep.subr.mxu0 %v2049_v29  ;;  %2199 = vmatprep.subr.mxu1 %v2051_v30 }
 0x392   :  { %2129 = vmatpush1.msra.mxu0 %v2048_v31  ;;  %2200 = vmatpush1.msra.mxu1 %v2050_v33 }
 0x393   :  { %2130 = vmatprep.subr.mxu0 %v2045_v34  ;;  %2201 = vmatprep.subr.mxu1 %v2047_v36 }
 0x394   :  { %2131 = vmatpush1.msra.mxu0 %v2044_v39  ;;  %2202 = vmatpush1.msra.mxu1 %v2046_v40 }
 0x395   :  { %2132 = vmatprep.subr.mxu0 %v2041_v41  ;;  %2203 = vmatprep.subr.mxu1 %v2043_v42 }
 0x396   :  { %2133 = vmatpush1.msra.mxu0 %v2040_v45  ;;  %2204 = vmatpush1.msra.mxu1 %v2042_v46 }
 0x397   :  { %2134 = vmatprep.subr.mxu0 %v2037_v47  ;;  %2205 = vmatprep.subr.mxu1 %v2039_v49 }
 0x398   :  { %2135 = vmatpush1.msra.mxu0 %v2036_v17  ;;  %2206 = vmatpush1.msra.mxu1 %v2038_v13 }
 0x399   :  { %2136 = vmatprep.subr.mxu0 %v2033_v18  ;;  %2207 = vmatprep.subr.mxu1 %v2035_v7 }
 0x39a   :  { %2137 = vmatpush1.msra.mxu0 %v2032_v50  ;;  %2208 = vmatpush1.msra.mxu1 %v2034_v51 }
 0x39b   :  { %2138 = vmatprep.subr.mxu0 %v2029_v53  ;;  %2209 = vmatprep.subr.mxu1 %v2031_v54 }
 0x39c   :  { %2139 = vmatpush1.msra.mxu0 %v2028_v55  ;;  %2210 = vmatpush1.msra.mxu1 %v2030_v52 }
 0x39d   :  { %2140 = vmatprep.subr.mxu0 %v2025_v26  ;;  %2211 = vmatprep.subr.mxu1 %v2027_v27 }
 0x39e   :  { %2141 = vmatpush1.msra.mxu0 %v2024_v56  ;;  %2212 = vmatpush1.msra.mxu1 %v2026_v57 }
 0x43e   :  { %v1689_v59 = vpop.f32.mrf.mxu0  ;;  %v1760_v60 = vpop.f32.mrf.mxu1 }
 0x43f   :  { %v1775_v61 = vrot.slane %v1689_v59, 1  ;;  %v1777_v62 = vrot.slane %v1689_v59, 5 }
 0x440   :  { %v1762_v63 = vpop.f32.mrf.mxu1  ;;  %v1691_v9 = vpop.f32.mrf.mxu0 }
 0x441   :  { %v1780_v1 = vsel %vm1779_vm3, %v1775_v61, %v1777_v62  ;;  %v1769_v2 = vrot.slane %v1762_v63, 3  ;;  %v1771_v3 = vrot.slane %v1762_v63, 7 }
 0x442   :  { %v1785_v4 = vsel %vm1784_vm4, 0.0, %v1780_v1 }
 0x443   :  { %v1786_v5 = vadd.f32 %v1785_v4, %v1760_v60  ;;  %v1773_v6 = vsel %vm1287_vm1, %v1769_v2, %v1771_v3 }
 0x444   :  { %v1782_v38 = vsel %vm1781_vm5, 0.0, %v1773_v6 }
 0x445   :  { %v1823_v44 = vrot.slane %v1786_v5, %v4378_v35  ;;  %v1783_v37 = vadd.f32 %v1782_v38, %v1691_v9 }
 0x447   :  { %v1824_v43 = vcombine.high %v1823_v44, %v1823_v44  ;;  %v1831_v10 = vrot.slane %v1823_v44, %v4378_v35  ;;  %v1794_v11 = vrot.slane %v1783_v37, %v4378_v35  ;;  %v1953_v44 = vld [vmem:[#allocation16] sm:$0x1] }
 0x449   :  { %v1838_v12 = vrot.slane %v1824_v43, %v4378_v35  ;;  %v1839_v15 = vcombine.high %v1831_v10, %v1831_v10  ;;  %v1844_v16 = vrot.slane %v1831_v10, %v4383_v48  ;;  %v1795_v19 = vcombine.high %v1794_v11, %v1794_v11  ;;  %v1957_v10 = vld [vmem:[#allocation17] sm:$0x1] }
 0x44a   :  { %v1802_v14 = vrot.slane %v1794_v11, %v4378_v35 }
 0x44b   :  { %v1840_v20 = vcombine.high %v1838_v12, %v1838_v12  ;;  %v1848_v8 = vrot.slane %v1838_v12, %v4383_v48  ;;  %v1852_v22 = vrot.slane %v1839_v15, %v4383_v48  ;;  %v1809_v23 = vrot.slane %v1795_v19, %v4378_v35 }
 0x44c   :  { %v1810_v24 = vcombine.high %v1802_v14, %v1802_v14  ;;  %v1861_v29 = vsel %vm1287_vm1, %v1802_v14, %v1844_v16 }
 0x44d   :  { %v1856_v25 = vrot.slane %v1840_v20, %v4383_v48  ;;  %v1811_v28 = vcombine.high %v1809_v23, %v1809_v23  ;;  %v1862_v30 = vsel %vm1287_vm1, %v1809_v23, %v1848_v8 }
 0x44e   :  { %v1869_v31 = vcombine.low %v1861_v29, %v1862_v30  ;;  %v1863_v33 = vsel %vm1287_vm1, %v1810_v24, %v1852_v22 }
 0x44f   :  { %v1864_v34 = vsel %vm1287_vm1, %v1811_v28, %v1856_v25 }
 0x450   :  { %v1870_v36 = vcombine.low %v1863_v33, %v1864_v34  ;;  %v1877_v39 = vrot.slane %v1869_v31, %v4437_v21 }
 0x452   :  { %v1884_v40 = vrot.slane %v1870_v36, %v4437_v21 }
 0x454   :  { %v1885_v41 = vcombine.low %v1877_v39, %v1884_v40 }
 0x456   :  { %v1887_v42 = vrot.slane %v1885_v41, 4 }
 0x458   :  { %v1888_v45 = vadd.f32 %v1887_v42, %v1885_v41 }
 0x45a   :  { %v1889_v46 = vrot.slane %v1888_v45, 2 }
 0x45c   :  { %v1890_v47 = vadd.f32 %v1889_v46, %v1888_v45 }
 0x45e   :  { %v1891_v49 = vrot.slane %v1890_v47, 1 }
 0x460   :  { %v1892_v17 = vadd.f32 %v1891_v49, %v1890_v47 }
 0x462   :  { %v1893_v13 = vmul.f32 0.125, %v1892_v17 }
 0x464   :  { %v1895_v18 = vcombine.high %v1893_v13, %v1893_v13  ;;  %v1902_v7 = vrot.slane %v1893_v13, %v4437_v21 }
 0x466   :  { %v1909_v50 = vrot.slane %v1895_v18, %v4437_v21  ;;  %v1910_v51 = vcombine.high %v1902_v7, %v1902_v7  ;;  %v1916_v53 = vsub.f32 %v1861_v29, %v1902_v7 }
 0x468   :  { %v1911_v54 = vcombine.high %v1909_v50, %v1909_v50  ;;  %v1917_v55 = vsub.f32 %v1862_v30, %v1910_v51  ;;  %v1918_v52 = vsub.f32 %v1863_v33, %v1909_v50  ;;  %v1920_v27 = vmul.f32 %v1916_v53, %v1916_v53  ;;  %v2709_v53 = vld [vmem:[#allocation23 + $0x1e0] sm:$0xff] }
 0x46a   :  { %v1919_v26 = vsub.f32 %v1864_v34, %v1911_v54  ;;  %v1921_v56 = vmul.f32 %v1917_v55, %v1917_v55  ;;  %v1922_v57 = vmul.f32 %v1918_v52, %v1918_v52  ;;  %v2711_v54 = vld [vmem:[#allocation23 + $0x1f0] sm:$0xff]  ;;  %v2706_v55 = vld [vmem:[#allocation23 + $0x1c8] sm:$0xff]  ;;  %v2708_v52 = vld [vmem:[#allocation23 + $0x1d8] sm:$0xff] }
 0x46c   :  { %v1923_v58 = vmul.f32 %v1919_v26, %v1919_v26  ;;  %v1928_v59 = vcombine.low %v1920_v27, %v1921_v56  ;;  %v2705_v26 = vld [vmem:[#allocation23 + $0x1c0] sm:$0xff]  ;;  %v2707_v27 = vld [vmem:[#allocation23 + $0x1d0] sm:$0xff]  ;;  %v2702_v56 = vld [vmem:[#allocation23 + $0x1a8] sm:$0xff] }
 0x46e   :  { %v1929_v60 = vcombine.low %v1922_v57, %v1923_v58  ;;  %v1936_v61 = vrot.slane %v1928_v59, %v4437_v21  ;;  %v2704_v57 = vld [vmem:[#allocation23 + $0x1b8] sm:$0xff]  ;;  %v2701_v58 = vld [vmem:[#allocation23 + $0x1a0] sm:$0xff]  ;;  %v2703_v59 = vld [vmem:[#allocation23 + $0x1b0] sm:$0xff] }
 0x470   :  { %v1943_v62 = vrot.slane %v1929_v60, %v4437_v21  ;;  %v2698_v60 = vld [vmem:[#allocation23 + $0x188] sm:$0xff] }
 0x472   :  { %v1944_v63 = vcombine.low %v1936_v61, %v1943_v62  ;;  %v2700_v61 = vld [vmem:[#allocation23 + $0x198] sm:$0xff]  ;;  %v2697_v62 = vld [vmem:[#allocation23 + $0x180] sm:$0xff] }
 0x474   :  { %v1946_v1 = vrot.slane %v1944_v63, 4 }
 0x476   :  { %v1947_v2 = vadd.f32 %v1946_v1, %v1944_v63  ;;  %v2699_v63 = vld [vmem:[#allocation23 + $0x190] sm:$0xff]  ;;  %v2694_v1 = vld [vmem:[#allocation23 + $0x168] sm:$0xff] }
 0x478   :  { %v1948_v3 = vrot.slane %v1947_v2, 2 }
 0x47a   :  { %v1949_v4 = vadd.f32 %v1948_v3, %v1947_v2  ;;  %v2696_v2 = vld [vmem:[#allocation23 + $0x178] sm:$0xff]  ;;  %v2693_v3 = vld [vmem:[#allocation23 + $0x160] sm:$0xff] }
 0x47c   :  { %v1950_v5 = vrot.slane %v1949_v4, 1 }
 0x47e   :  { %v1951_v6 = vadd.f32 %v1950_v5, %v1949_v4  ;;  %v2695_v4 = vld [vmem:[#allocation23 + $0x170] sm:$0xff]  ;;  %v2690_v5 = vld [vmem:[#allocation23 + $0x148] sm:$0xff] }
 0x480   :  { %v1952_v9 = vmul.f32 0.125, %v1951_v6  ;;  %v2692_v6 = vld [vmem:[#allocation23 + $0x158] sm:$0xff] }
 0x482   :  { %v1954_v38 = vadd.f32 1e-05, %v1952_v9  ;;  %v2689_v9 = vld [vmem:[#allocation23 + $0x140] sm:$0xff] }
 0x484   :  { %3768 = vrsqrt.f32 %v1954_v38  ;;  %v2691_v38 = vld [vmem:[#allocation23 + $0x150] sm:$0xff] }
 0x491   :  { %v3769_v37 = vpop.eup %3768 }
 0x492   :  { %v1956_v43 = vmul.f32 %v3769_v37, %v1953_v44  ;;  %v2686_v44 = vld [vmem:[#allocation23 + $0x128] sm:$0xff]  ;;  %v2688_v37 = vld [vmem:[#allocation23 + $0x138] sm:$0xff] }
 0x494   :  { %v1958_v11 = vmul.f32 %v1956_v43, %v1893_v13  ;;  %v1964_v12 = vrot.slane %v1956_v43, %v4383_v48  ;;  %v2685_v43 = vld [vmem:[#allocation23 + $0x120] sm:$0xff] }
 0x496   :  { %v1959_v15 = vsub.f32 %v1957_v10, %v1958_v11  ;;  %v1965_v16 = vcombine.high %v1964_v12, %v1964_v12  ;;  %v1972_v19 = vrot.slane %v1964_v12, %v4437_v21  ;;  %v2687_v10 = vld [vmem:[#allocation23 + $0x130] sm:$0xff]  ;;  %v2682_v11 = vld [vmem:[#allocation23 + $0x108] sm:$0xff]  ;;  %v2684_v12 = vld [vmem:[#allocation23 + $0x118] sm:$0xff] }
 0x498   :  { %v1979_v14 = vrot.slane %v1965_v16, %v4437_v21  ;;  %v1994_v20 = vrot.slane %v1959_v15, %v4383_v48  ;;  %v1980_v8 = vcombine.high %v1972_v19, %v1972_v19  ;;  %v1986_v24 = vmul.f32 %v1972_v19, %v1861_v29  ;;  %v2681_v15 = vld [vmem:[#allocation23 + $0x100] sm:$0xff]  ;;  %v2683_v16 = vld [vmem:[#allocation23 + $0x110] sm:$0xff]  ;;  %v2678_v19 = vld [vmem:[#allocation23 + $0xe8] sm:$0xff] }
 0x49a   :  { %v1981_v22 = vcombine.high %v1979_v14, %v1979_v14  ;;  %v1995_v23 = vcombine.high %v1994_v20, %v1994_v20  ;;  %v2002_v25 = vrot.slane %v1994_v20, %v4437_v21  ;;  %v1988_v28 = vmul.f32 %v1979_v14, %v1863_v33  ;;  %v2680_v14 = vld [vmem:[#allocation23 + $0xf8] sm:$0xff]  ;;  %v2677_v20 = vld [vmem:[#allocation23 + $0xe0] sm:$0xff] }
 0x49b   :  { %v1987_v36 = vmul.f32 %v1980_v8, %v1862_v30  ;;  %v2710_v30 = vld [vmem:[#allocation23 + $0x1e8] sm:$0xff]  ;;  %v2679_v8 = vld [vmem:[#allocation23 + $0xf0] sm:$0xff] }
 0x49c   :  { %v2009_v31 = vrot.slane %v1995_v23, %v4437_v21  ;;  %v2010_v39 = vcombine.high %v2002_v25, %v2002_v25  ;;  %v2016_v40 = vadd.f32 %v2002_v25, %v1986_v24  ;;  %v1989_v41 = vmul.f32 %v1981_v22, %v1864_v34  ;;  %v2712_v34 = vld [vmem:[#allocation23 + $0x1f8] sm:$0xff]  ;;  %2757 = vmatprep.subr.mxu0 %v2710_v30  ;;  %v2674_v22 = vld [vmem:[#allocation23 + $0xc8] sm:$0xff]  ;;  %v2673_v24 = vld [vmem:[#allocation23 + $0xc0] sm:$0xff] }
 0x49d   :  { %2834 = vmatprep.subr.mxu1 %v2712_v34  ;;  %v2676_v23 = vld [vmem:[#allocation23 + $0xd8] sm:$0xff]  ;;  %v2675_v25 = vld [vmem:[#allocation23 + $0xd0] sm:$0xff]  ;;  %v2650_v34 = vld [vmem:[#allocation23 + $0x8] sm:$0xff] }
 0x49e   :  { %v2011_v42 = vcombine.high %v2009_v31, %v2009_v31  ;;  %v2018_v45 = vadd.f32 %v2009_v31, %v1988_v28  ;;  %v2017_v46 = vadd.f32 %v2010_v39, %v1987_v36  ;;  %v2020_v49 = vmax.f32 %v2016_v40, 0.0  ;;  %v2670_v28 = vld [vmem:[#allocation23 + $0xa8] sm:$0xff]  ;;  %v2672_v31 = vld [vmem:[#allocation23 + $0xb8] sm:$0xff]  ;;  %v2669_v36 = vld [vmem:[#allocation23 + $0xa0] sm:$0xff] }
 0x49f   :  { %v2671_v39 = vld [vmem:[#allocation23 + $0xb0] sm:$0xff]  ;;  %v2666_v40 = vld [vmem:[#allocation23 + $0x88] sm:$0xff] }
 0x4a0   :  { %v2019_v47 = vadd.f32 %v2011_v42, %v1989_v41  ;;  %v2021_v17 = vmax.f32 %v2017_v46, 0.0  ;;  %v2022_v13 = vmax.f32 %v2018_v45, 0.0  ;;  %v2668_v41 = vld [vmem:[#allocation23 + $0x98] sm:$0xff]  ;;  %v2665_v42 = vld [vmem:[#allocation23 + $0x80] sm:$0xff]  ;;  %v2667_v45 = vld [vmem:[#allocation23 + $0x90] sm:$0xff] }
 0x4a1   :  { %v2662_v46 = vld [vmem:[#allocation23 + $0x68] sm:$0xff]  ;;  %v2655_v30 = vld [vmem:[#allocation23 + $0x30] sm:$0xff] }
 0x4a2   :  { %v2023_v18 = vmax.f32 %v2019_v47, 0.0  ;;  %v2092_v7 = vcombine.low %v2020_v49, %v2021_v17  ;;  %v2664_v47 = vld [vmem:[#allocation23 + $0x78] sm:$0xff]  ;;  %v2661_v49 = vld [vmem:[#allocation23 + $0x60] sm:$0xff]  ;;  %v2663_v17 = vld [vmem:[#allocation23 + $0x70] sm:$0xff] }
 0x4a4   :  { %v2093_v50 = vcombine.low %v2022_v13, %v2023_v18  ;;  %v2100_v29 = vrot.slane %v2092_v7, %v4437_v21  ;;  %v2658_v13 = vld [vmem:[#allocation23 + $0x48] sm:$0xff]  ;;  %v2660_v18 = vld [vmem:[#allocation23 + $0x58] sm:$0xff]  ;;  %v2657_v7 = vld [vmem:[#allocation23 + $0x40] sm:$0xff] }
 0x4a6   :  { %v2107_v33 = vrot.slane %v2093_v50, %v4437_v21  ;;  %v2659_v50 = vld [vmem:[#allocation23 + $0x50] sm:$0xff] }
 0x4a8   :  { %v2108_v51 = vcombine.low %v2100_v29, %v2107_v33  ;;  %v2654_v29 = vld [vmem:[#allocation23 + $0x28] sm:$0xff]  ;;  %v2656_v33 = vld [vmem:[#allocation23 + $0x38] sm:$0xff] }
 0x4aa   :  { %2175 = vmatmul.mubr.f32.vlgmr.msra.gmra.mxu0 %v2108_v51  ;;  %2246 = vmatmul.mubr.f32.vlgmr.msra.gmra.mxu1 %v2108_v51  ;;  %v2653_v51 = vld [vmem:[#allocation23 + $0x20] sm:$0xff] }
 0x4ab   :  { %2821 = vmatprep.mubr.f32.mxu0 %v4186_v0  ;;  %2898 = vmatprep.mubr.f32.mxu1 %v4186_v0 }
 0x4ac   :  { %2758 = vmatpush1.msra.mxu0 %v2709_v53  ;;  %2835 = vmatpush1.msra.mxu1 %v2711_v54  ;;  %v2652_v53 = vld [vmem:[#allocation23 + $0x18] sm:$0xff]  ;;  %v2649_v54 = vld [vmem:[#allocation23] sm:$0xff] }
 0x4ad   :  { %2759 = vmatprep.subr.mxu0 %v2706_v55  ;;  %2836 = vmatprep.subr.mxu1 %v2708_v52  ;;  %v2651_v55 = vld [vmem:[#allocation23 + $0x10] sm:$0xff]  ;;  %v2252_v52 = vand.u32 3, %v4375_v32 }
 0x4ae   :  { %2760 = vmatpush1.msra.mxu0 %v2705_v26  ;;  %2837 = vmatpush1.msra.mxu1 %v2707_v27 }
 0x4af   :  { %2761 = vmatprep.subr.mxu0 %v2702_v56  ;;  %2838 = vmatprep.subr.mxu1 %v2704_v57  ;;  %vm2265_vm6 = vcmp.eq.s32.totalorder %v2252_v52, 3  ;;  %vm2262_vm7 = vcmp.eq.s32.totalorder %v2252_v52, 0 }
 0x4b0   :  { %2762 = vmatpush1.msra.mxu0 %v2701_v58  ;;  %2839 = vmatpush1.msra.mxu1 %v2703_v59 }
 0x4b1   :  { %2763 = vmatprep.subr.mxu0 %v2698_v60  ;;  %2840 = vmatprep.subr.mxu1 %v2700_v61 }
 0x4b2   :  { %2764 = vmatpush1.msra.mxu0 %v2697_v62  ;;  %2841 = vmatpush1.msra.mxu1 %v2699_v63 }
 0x4b3   :  { %2765 = vmatprep.subr.mxu0 %v2694_v1  ;;  %2842 = vmatprep.subr.mxu1 %v2696_v2 }
 0x4b4   :  { %2766 = vmatpush1.msra.mxu0 %v2693_v3  ;;  %2843 = vmatpush1.msra.mxu1 %v2695_v4 }
 0x4b5   :  { %2767 = vmatprep.subr.mxu0 %v2690_v5  ;;  %2844 = vmatprep.subr.mxu1 %v2692_v6 }
 0x4b6   :  { %2768 = vmatpush1.msra.mxu0 %v2689_v9  ;;  %2845 = vmatpush1.msra.mxu1 %v2691_v38 }
 0x4b7   :  { %2769 = vmatprep.subr.mxu0 %v2686_v44  ;;  %2846 = vmatprep.subr.mxu1 %v2688_v37 }
 0x4b8   :  { %2770 = vmatpush1.msra.mxu0 %v2685_v43  ;;  %2847 = vmatpush1.msra.mxu1 %v2687_v10 }
 0x4b9   :  { %2771 = vmatprep.subr.mxu0 %v2682_v11  ;;  %2848 = vmatprep.subr.mxu1 %v2684_v12 }
 0x4ba   :  { %2772 = vmatpush1.msra.mxu0 %v2681_v15  ;;  %2849 = vmatpush1.msra.mxu1 %v2683_v16 }
 0x4bb   :  { %2773 = vmatprep.subr.mxu0 %v2678_v19  ;;  %2850 = vmatprep.subr.mxu1 %v2680_v14 }
 0x4bc   :  { %2774 = vmatpush1.msra.mxu0 %v2677_v20  ;;  %2851 = vmatpush1.msra.mxu1 %v2679_v8 }
 0x4bd   :  { %2775 = vmatprep.subr.mxu0 %v2674_v22  ;;  %2852 = vmatprep.subr.mxu1 %v2676_v23 }
 0x4be   :  { %2776 = vmatpush1.msra.mxu0 %v2673_v24  ;;  %2853 = vmatpush1.msra.mxu1 %v2675_v25 }
 0x4bf   :  { %2777 = vmatprep.subr.mxu0 %v2670_v28  ;;  %2854 = vmatprep.subr.mxu1 %v2672_v31 }
 0x4c0   :  { %2778 = vmatpush1.msra.mxu0 %v2669_v36  ;;  %2855 = vmatpush1.msra.mxu1 %v2671_v39 }
 0x4c1   :  { %2779 = vmatprep.subr.mxu0 %v2666_v40  ;;  %2856 = vmatprep.subr.mxu1 %v2668_v41 }
 0x4c2   :  { %2780 = vmatpush1.msra.mxu0 %v2665_v42  ;;  %2857 = vmatpush1.msra.mxu1 %v2667_v45 }
 0x4c3   :  { %2781 = vmatprep.subr.mxu0 %v2662_v46  ;;  %2858 = vmatprep.subr.mxu1 %v2664_v47 }
 0x4c4   :  { %2782 = vmatpush1.msra.mxu0 %v2661_v49  ;;  %2859 = vmatpush1.msra.mxu1 %v2663_v17 }
 0x4c5   :  { %2783 = vmatprep.subr.mxu0 %v2658_v13  ;;  %2860 = vmatprep.subr.mxu1 %v2660_v18 }
 0x4c6   :  { %2784 = vmatpush1.msra.mxu0 %v2657_v7  ;;  %2861 = vmatpush1.msra.mxu1 %v2659_v50 }
 0x4c7   :  { %2785 = vmatprep.subr.mxu0 %v2654_v29  ;;  %2862 = vmatprep.subr.mxu1 %v2656_v33 }
 0x4c8   :  { %2786 = vmatpush1.msra.mxu0 %v2653_v51  ;;  %2863 = vmatpush1.msra.mxu1 %v2655_v30 }
 0x4c9   :  { %2787 = vmatprep.subr.mxu0 %v2650_v34  ;;  %2864 = vmatprep.subr.mxu1 %v2652_v53 }
 0x4ca   :  { %2788 = vmatpush1.msra.mxu0 %v2649_v54  ;;  %2865 = vmatpush1.msra.mxu1 %v2651_v55 }
 0x56a   :  { %v2176_v26 = vpop.f32.mrf.mxu0  ;;  %v2247_v27 = vpop.f32.mrf.mxu1 }
 0x56b   :  { %v2258_v56 = vrot.slane %v2176_v26, 1 }
 0x56c   :  { %v2249_v57 = vpop.f32.mrf.mxu1  ;;  %v2178_v61 = vpop.f32.mrf.mxu0 }
 0x56d   :  { %v2266_v58 = vsel %vm2265_vm6, 0.0, %v2258_v56  ;;  %v2254_v59 = vrot.slane %v2249_v57, 7 }
 0x56e   :  { %v2267_v60 = vadd.f32 %v2266_v58, %v2247_v27 }
 0x56f   :  { %v2263_v62 = vsel %vm2262_vm7, 0.0, %v2254_v59 }
 0x570   :  { %v2327_v63 = vcombine.high %v2267_v60, %v2267_v60  ;;  %v2334_v1 = vrot.slane %v2267_v60, %v4378_v35  ;;  %v2264_v2 = vadd.f32 %v2263_v62, %v2178_v61 }
 0x572   :  { %v2341_v3 = vrot.slane %v2327_v63, %v4378_v35  ;;  %v2342_v4 = vcombine.high %v2334_v1, %v2334_v1  ;;  %v2350_v5 = vrot.slane %v2334_v1, %v4378_v35  ;;  %v2269_v6 = vcombine.high %v2264_v2, %v2264_v2 }
 0x573   :  { %v2276_v9 = vrot.slane %v2264_v2, %v4378_v35 }
 0x574   :  { %v2343_v38 = vcombine.high %v2341_v3, %v2341_v3  ;;  %v2357_v44 = vrot.slane %v2341_v3, %v4378_v35  ;;  %v2364_v37 = vrot.slane %v2342_v4, %v4378_v35  ;;  %v2372_v43 = vcombine.high %v2350_v5, %v2350_v5 }
 0x575   :  { %v2379_v10 = vrot.slane %v2350_v5, %v4383_v48  ;;  %v2283_v11 = vrot.slane %v2269_v6, %v4378_v35  ;;  %v2284_v12 = vcombine.high %v2276_v9, %v2276_v9  ;;  %v2292_v15 = vrot.slane %v2276_v9, %v4378_v35 }
 0x576   :  { %v2371_v16 = vrot.slane %v2343_v38, %v4378_v35  ;;  %v2373_v19 = vcombine.high %v2357_v44, %v2357_v44  ;;  %v2374_v14 = vcombine.high %v2364_v37, %v2364_v37  ;;  %v2383_v20 = vrot.slane %v2364_v37, %v4383_v48 }
 0x577   :  { %v2387_v8 = vrot.slane %v2372_v43, %v4383_v48  ;;  %v2395_v22 = vrot.slane %v2357_v44, %v4383_v48  ;;  %v2285_v23 = vcombine.high %v2283_v11, %v2283_v11  ;;  %v2299_v24 = vrot.slane %v2283_v11, %v4378_v35 }
 0x578   :  { %v2375_v25 = vcombine.high %v2371_v16, %v2371_v16  ;;  %v2391_v28 = vrot.slane %v2374_v14, %v4383_v48  ;;  %v2399_v31 = vrot.slane %v2371_v16, %v4383_v48  ;;  %v2403_v36 = vrot.slane %v2373_v19, %v4383_v48 }
 0x579   :  { %v2306_v39 = vrot.slane %v2284_v12, %v4378_v35  ;;  %v2313_v40 = vrot.slane %v2285_v23, %v4378_v35  ;;  %v2314_v41 = vcombine.high %v2292_v15, %v2292_v15  ;;  %v2315_v42 = vcombine.high %v2299_v24, %v2299_v24 }
 0x57a   :  { %v2407_v45 = vrot.slane %v2375_v25, %v4383_v48  ;;  %v4527_v49 = vsel %vm1287_vm1, %v2292_v15, %v2379_v10  ;;  %v4536_v18 = vsel %vm1287_vm1, %v2299_v24, %v2395_v22 }
 0x57b   :  { %v2316_v46 = vcombine.high %v2306_v39, %v2306_v39  ;;  %v2317_v47 = vcombine.high %v2313_v40, %v2313_v40  ;;  %v4530_v17 = vsel %vm1287_vm1, %v2306_v39, %v2383_v20  ;;  %v4533_v13 = vsel %vm1287_vm1, %v2314_v41, %v2387_v8 }
 0x57c   :  { %v4539_v7 = vsel %vm1287_vm1, %v2313_v40, %v2399_v31  ;;  %v2432_v50 = vcombine.low %v4527_v49, %v4530_v17  ;;  %v4547_v33 = vsel %vm1287_vm1, %v2315_v42, %v2403_v36 }
 0x57d   :  { %v4544_v29 = vsel %vm1287_vm1, %v2316_v46, %v2391_v28  ;;  %v4550_v51 = vsel %vm1287_vm1, %v2317_v47, %v2407_v45  ;;  %v2449_v30 = vcombine.low %v4536_v18, %v4539_v7 }
 0x57e   :  { %v2433_v34 = vcombine.low %v4533_v13, %v4544_v29  ;;  %v2450_v53 = vcombine.low %v4547_v33, %v4550_v51  ;;  %v2440_v54 = vrot.slane %v2432_v50, %v4437_v21 }
 0x57f   :  { %v2457_v52 = vrot.slane %v2449_v30, %v4437_v21 }
 0x580   :  { %v2447_v55 = vrot.slane %v2433_v34, %v4437_v21  ;;  %v2464_v26 = vrot.slane %v2450_v53, %v4437_v21 }
 0x582   :  { %v2448_v27 = vcombine.low %v2440_v54, %v2447_v55  ;;  %v2465_v56 = vcombine.low %v2457_v52, %v2464_v26  ;;  %v2566_v26 = vld [vmem:[#allocation20] sm:$0x1] }
 0x584   :  { %v2468_v57 = vadd.f32 %v2465_v56, %v2448_v27 }
 0x586   :  { %v2469_v58 = vrot.slane %v2468_v57, 4 }
 0x588   :  { %v2470_v59 = vadd.f32 %v2469_v58, %v2468_v57  ;;  %v2570_v57 = vld [vmem:[#allocation22] sm:$0x1] }
 0x58a   :  { %v2471_v60 = vrot.slane %v2470_v59, 2 }
 0x58c   :  { %v2472_v61 = vadd.f32 %v2471_v60, %v2470_v59 }
 0x58e   :  { %v2473_v62 = vrot.slane %v2472_v61, 1 }
 0x590   :  { %v2474_v63 = vadd.f32 %v2473_v62, %v2472_v61 }
 0x592   :  { %v2475_v1 = vmul.f32 0.0625, %v2474_v63 }
 0x594   :  { %v2477_v2 = vcombine.high %v2475_v1, %v2475_v1  ;;  %v2484_v3 = vrot.slane %v2475_v1, %v4437_v21 }
 0x596   :  { %v2491_v4 = vrot.slane %v2477_v2, %v4437_v21  ;;  %v2492_v5 = vcombine.high %v2484_v3, %v2484_v3  ;;  %v2498_v6 = vsub.f32 %v4527_v49, %v2484_v3  ;;  %v2502_v9 = vsub.f32 %v4536_v18, %v2484_v3 }
 0x598   :  { %v2493_v38 = vcombine.high %v2491_v4, %v2491_v4  ;;  %v2499_v44 = vsub.f32 %v4530_v17, %v2492_v5  ;;  %v2500_v37 = vsub.f32 %v4533_v13, %v2491_v4  ;;  %v2503_v43 = vsub.f32 %v4539_v7, %v2492_v5 }
 0x599   :  { %v2504_v10 = vsub.f32 %v4547_v33, %v2491_v4  ;;  %v2506_v15 = vmul.f32 %v2498_v6, %v2498_v6  ;;  %v2510_v14 = vmul.f32 %v2502_v9, %v2502_v9 }
 0x59a   :  { %v2501_v11 = vsub.f32 %v4544_v29, %v2493_v38  ;;  %v2505_v12 = vsub.f32 %v4550_v51, %v2493_v38  ;;  %v2507_v16 = vmul.f32 %v2499_v44, %v2499_v44  ;;  %v2508_v19 = vmul.f32 %v2500_v37, %v2500_v37 }
 0x59b   :  { %v2511_v20 = vmul.f32 %v2503_v43, %v2503_v43  ;;  %v2512_v22 = vmul.f32 %v2504_v10, %v2504_v10 }
 0x59c   :  { %v2509_v8 = vmul.f32 %v2501_v11, %v2501_v11  ;;  %v2513_v23 = vmul.f32 %v2505_v12, %v2505_v12  ;;  %v2522_v24 = vcombine.low %v2506_v15, %v2507_v16 }
 0x59d   :  { %v2539_v25 = vcombine.low %v2510_v14, %v2511_v20 }
 0x59e   :  { %v2523_v28 = vcombine.low %v2508_v19, %v2509_v8  ;;  %v2540_v31 = vcombine.low %v2512_v22, %v2513_v23  ;;  %v2530_v36 = vrot.slane %v2522_v24, %v4437_v21 }
 0x59f   :  { %v2547_v40 = vrot.slane %v2539_v25, %v4437_v21 }
 0x5a0   :  { %v2537_v39 = vrot.slane %v2523_v28, %v4437_v21  ;;  %v2554_v41 = vrot.slane %v2540_v31, %v4437_v21 }
 0x5a2   :  { %v2538_v42 = vcombine.low %v2530_v36, %v2537_v39  ;;  %v2555_v45 = vcombine.low %v2547_v40, %v2554_v41 }
 0x5a4   :  { %v2558_v46 = vadd.f32 %v2555_v45, %v2538_v42 }
 0x5a6   :  { %v2559_v47 = vrot.slane %v2558_v46, 4 }
 0x5a8   :  { %v2560_v50 = vadd.f32 %v2559_v47, %v2558_v46 }
 0x5aa   :  { %v2561_v30 = vrot.slane %v2560_v50, 2 }
 0x5ac   :  { %v2562_v34 = vadd.f32 %v2561_v30, %v2560_v50  ;;  %v2911_v50 = vadd.s32 8, %v4375_v32 }
 0x5ae   :  { %v2563_v53 = vrot.slane %v2562_v34, 1 }
 0x5b0   :  { %v2564_v54 = vadd.f32 %v2563_v53, %v2562_v34  ;;  %v2912_v53 = vand.u32 7, %v4375_v32 }
 0x5b2   :  { %v2565_v55 = vmul.f32 0.0625, %v2564_v54  ;;  %v2913_v54 = vand.u32 7, %v2911_v50  ;;  %vm2938_vm9 = vcmp.eq.s32.totalorder %v2912_v53, 7  ;;  %vm4598_vm11 = vcmp.eq.s32.totalorder %v2912_v53, 0 }
 0x5b4   :  { %v2567_v52 = vadd.f32 1e-05, %v2565_v55  ;;  %vm2939_vm10 = vcmp.eq.s32.totalorder %v2913_v54, 7  ;;  %vm4604_vm12 = vcmp.eq.s32.totalorder %v2913_v54, 0 }
 0x5b6   :  { %3770 = vrsqrt.f32 %v2567_v52 }
 0x5c3   :  { %v3771_v27 = vpop.eup %3770 }
 0x5c4   :  { %v2569_v56 = vmul.f32 %v3771_v27, %v2566_v26 }
 0x5c6   :  { %v2577_v58 = vrot.slane %v2569_v56, %v4383_v48  ;;  %v2571_v59 = vmul.f32 %v2569_v56, %v2475_v1 }
 0x5c8   :  { %v2585_v60 = vrot.slane %v2577_v58, %v4437_v21  ;;  %v2572_v61 = vsub.f32 %v2570_v57, %v2571_v59  ;;  %v2578_v62 = vcombine.high %v2577_v58, %v2577_v58 }
 0x5ca   :  { %v2592_v63 = vrot.slane %v2578_v62, %v4437_v21  ;;  %v2593_v2 = vcombine.high %v2585_v60, %v2585_v60  ;;  %v2611_v3 = vrot.slane %v2572_v61, %v4383_v48  ;;  %v2599_v6 = vmul.f32 %v2585_v60, %v4527_v49 }
 0x5cb   :  { %v2603_v38 = vmul.f32 %v2585_v60, %v4536_v18 }
 0x5cc   :  { %v2594_v4 = vcombine.high %v2592_v63, %v2592_v63  ;;  %v2612_v5 = vcombine.high %v2611_v3, %v2611_v3  ;;  %v2619_v9 = vrot.slane %v2611_v3, %v4437_v21  ;;  %v2600_v44 = vmul.f32 %v2593_v2, %v4530_v17 }
 0x5cd   :  { %v2601_v1 = vmul.f32 %v2592_v63, %v4533_v13  ;;  %v2605_v43 = vmul.f32 %v2592_v63, %v4547_v33  ;;  %v2604_v15 = vmul.f32 %v2593_v2, %v4539_v7 }
 0x5ce   :  { %v2626_v37 = vrot.slane %v2612_v5, %v4437_v21  ;;  %v2602_v10 = vmul.f32 %v2594_v4, %v4544_v29  ;;  %v2627_v11 = vcombine.high %v2619_v9, %v2619_v9  ;;  %v2633_v12 = vadd.f32 %v2619_v9, %v2599_v6 }
 0x5cf   :  { %v2606_v19 = vmul.f32 %v2594_v4, %v4550_v51  ;;  %v2637_v8 = vadd.f32 %v2619_v9, %v2603_v38 }
 0x5d0   :  { %v2628_v16 = vcombine.high %v2626_v37, %v2626_v37  ;;  %v2635_v49 = vadd.f32 %v2626_v37, %v2601_v1  ;;  %v2639_v14 = vadd.f32 %v2626_v37, %v2605_v43  ;;  %v2634_v18 = vadd.f32 %v2627_v11, %v2600_v44 }
 0x5d1   :  { %v2638_v20 = vadd.f32 %v2627_v11, %v2604_v15  ;;  %v2641_v22 = vmax.f32 %v2633_v12, 0.0  ;;  %v2645_v7 = vmax.f32 %v2637_v8, 0.0 }
 0x5d2   :  { %v2636_v17 = vadd.f32 %v2628_v16, %v2602_v10  ;;  %v2640_v13 = vadd.f32 %v2628_v16, %v2606_v19  ;;  %v2642_v23 = vmax.f32 %v2634_v18, 0.0  ;;  %v2643_v24 = vmax.f32 %v2635_v49, 0.0 }
 0x5d3   :  { %v2646_v25 = vmax.f32 %v2638_v20, 0.0  ;;  %v2647_v29 = vmax.f32 %v2639_v14, 0.0 }
 0x5d4   :  { %v2644_v33 = vmax.f32 %v2636_v17, 0.0  ;;  %v2648_v28 = vmax.f32 %v2640_v13, 0.0  ;;  %v2721_v31 = vcombine.low %v2641_v22, %v2642_v23 }
 0x5d5   :  { %v2738_v41 = vcombine.low %v2645_v7, %v2646_v25 }
 0x5d6   :  { %v2722_v36 = vcombine.low %v2643_v24, %v2644_v33  ;;  %v2739_v39 = vcombine.low %v2647_v29, %v2648_v28  ;;  %v2729_v40 = vrot.slane %v2721_v31, %v4437_v21 }
 0x5d7   :  { %v2746_v46 = vrot.slane %v2738_v41, %v4437_v21 }
 0x5d8   :  { %v2736_v51 = vrot.slane %v2722_v36, %v4437_v21  ;;  %v2753_v45 = vrot.slane %v2739_v39, %v4437_v21 }
 0x5da   :  { %v2737_v42 = vcombine.low %v2729_v40, %v2736_v51  ;;  %v2754_v47 = vcombine.low %v2746_v46, %v2753_v45 }
 0x5dc   :  { %2822 = vmatmul.mubr.f32.vlgmr.msra.gmra.mxu0 %v2737_v42  ;;  %2899 = vmatmul.mubr.f32.vlgmr.msra.gmra.mxu1 %v2737_v42 }
 0x5dd   :  { %2827 = vmatprep.mubr.f32.mxu0 %v4186_v0  ;;  %2904 = vmatprep.mubr.f32.mxu1 %v4186_v0 }
 0x5e0   :  { %2828 = vmatmul.mubr.f32.gmra.mxu0 %v2754_v47  ;;  %2905 = vmatmul.mubr.f32.gmra.mxu1 %v2754_v47 }
 0x69c   :  { %v2823_v30 = vpop.f32.mrf.mxu0  ;;  %v2900_v34 = vpop.f32.mrf.mxu1 }
 0x69d   :  { %v2925_v56 = vrot.slane %v2823_v30, 1 }
 0x69e   :  { %v2825_v55 = vpop.f32.mrf.mxu0  ;;  %v2902_v52 = vpop.f32.mrf.mxu1 }
 0x69f   :  { %v2918_v59 = vrot.slane %v2902_v52, 7 }
 0x6a0   :  { %v2829_v26 = vpop.f32.mrf.mxu0  ;;  %v2906_v27 = vpop.f32.mrf.mxu1 }
 0x6a1   :  { %v2926_v57 = vrot.slane %v2829_v26, 1 }
 0x6a2   :  { %v2908_v0 = vpop.f32.mrf.mxu1  ;;  %v2831_v23 = vpop.f32.mrf.mxu0 }
 0x6a3   :  { %v2927_v60 = vsel %vm2260_vm8, %v2925_v56, %v2926_v57  ;;  %v2931_v61 = vsel %vm2260_vm8, %v2926_v57, %v2925_v56  ;;  %v2915_v62 = vrot.slane %v2908_v0, 7 }
 0x6a4   :  { %v2940_v32 = vsel %vm2938_vm9, 0.0, %v2927_v60  ;;  %v2941_v63 = vsel %vm2939_vm10, 0.0, %v2931_v61 }
 0x6a5   :  { %v2942_v2 = vadd.f32 %v2940_v32, %v2900_v34  ;;  %v2943_v3 = vadd.f32 %v2941_v63, %v2906_v27  ;;  %v2922_v4 = vsel %vm1287_vm1, %v2915_v62, %v2918_v59  ;;  %v2919_v5 = vsel %vm1287_vm1, %v2918_v59, %v2915_v62 }
 0x6a6   :  { %v2934_v9 = vsel %vm4598_vm11, 0.0, %v2922_v4  ;;  %v2935_v49 = vsel %vm4604_vm12, 0.0, %v2919_v5 }
 0x6a7   :  { %v3062_v38 = vcombine.high %v2942_v2, %v2942_v2  ;;  %v3069_v44 = vrot.slane %v2942_v2, %v4378_v35  ;;  %v3111_v1 = vcombine.high %v2943_v3, %v2943_v3  ;;  %v3118_v37 = vrot.slane %v2943_v3, %v4378_v35 }
 0x6a8   :  { %v2936_v19 = vadd.f32 %v2934_v9, %v2825_v55  ;;  %v2937_v29 = vadd.f32 %v2935_v49, %v2831_v23 }
 0x6a9   :  { %v3076_v43 = vrot.slane %v3062_v38, %v4378_v35  ;;  %v3077_v10 = vcombine.high %v3069_v44, %v3069_v44  ;;  %v3085_v11 = vrot.slane %v3069_v44, %v4378_v35  ;;  %v3125_v12 = vrot.slane %v3111_v1, %v4378_v35 }
 0x6aa   :  { %v3126_v15 = vcombine.high %v3118_v37, %v3118_v37  ;;  %v4616_v16 = vrot.slane %v3118_v37, %v4378_v35  ;;  %v2946_v7 = vcombine.high %v2936_v19, %v2936_v19  ;;  %v2953_v41 = vrot.slane %v2936_v19, %v4378_v35 }
 0x6ab   :  { %v3078_v14 = vcombine.high %v3076_v43, %v3076_v43  ;;  %v4621_v18 = vrot.slane %v3076_v43, %v4378_v35  ;;  %v3099_v20 = vrot.slane %v3077_v10, %v4378_v35  ;;  %v3107_v17 = vcombine.high %v3085_v11, %v3085_v11 }
 0x6ac   :  { %v3127_v8 = vcombine.high %v3125_v12, %v3125_v12  ;;  %v4625_v13 = vrot.slane %v3125_v12, %v4378_v35  ;;  %v4628_v22 = vrot.slane %v3126_v15, %v4378_v35  ;;  %v3156_v31 = vcombine.high %v4616_v16, %v4616_v16 }
 0x6ad   :  { %v3106_v24 = vrot.slane %v3078_v14, %v4378_v35  ;;  %v3108_v33 = vcombine.high %v4621_v18, %v4621_v18  ;;  %v3109_v25 = vcombine.high %v3099_v20, %v3099_v20  ;;  %v3163_v51 = vrot.slane %v3085_v11, %v4383_v48 }
 0x6ae   :  { %v4634_v28 = vrot.slane %v3127_v8, %v4378_v35  ;;  %v3158_v36 = vcombine.high %v4628_v22, %v4628_v22  ;;  %v3157_v40 = vcombine.high %v4625_v13, %v4625_v13  ;;  %v3167_v42 = vrot.slane %v3099_v20, %v4383_v48 }
 0x6af   :  { %v3110_v39 = vcombine.high %v3106_v24, %v3106_v24  ;;  %v3171_v45 = vrot.slane %v3107_v17, %v4383_v48  ;;  %v3175_v46 = vrot.slane %v3109_v25, %v4383_v48  ;;  %v3179_v47 = vrot.slane %v4621_v18, %v4383_v48 }
 0x6b0   :  { %v3159_v50 = vcombine.high %v4634_v28, %v4634_v28  ;;  %v3183_v30 = vrot.slane %v3106_v24, %v4383_v48  ;;  %v3187_v34 = vrot.slane %v3108_v33, %v4383_v48  ;;  %v3195_v53 = vrot.slane %v4616_v16, %v4383_v48 }
 0x6b1   :  { %v3191_v54 = vrot.slane %v3110_v39, %v4383_v48  ;;  %v3199_v55 = vrot.slane %v4628_v22, %v4383_v48  ;;  %v3203_v52 = vrot.slane %v3156_v31, %v4383_v48  ;;  %v3207_v26 = vrot.slane %v3158_v36, %v4383_v48 }
 0x6b2   :  { %v2960_v27 = vrot.slane %v2946_v7, %v4378_v35  ;;  %v2961_v56 = vcombine.high %v2953_v41, %v2953_v41  ;;  %v2969_v57 = vrot.slane %v2953_v41, %v4378_v35  ;;  %v2995_v0 = vcombine.high %v2937_v29, %v2937_v29 }
 0x6b3   :  { %v3211_v58 = vrot.slane %v4625_v13, %v4383_v48  ;;  %v3215_v59 = vrot.slane %v4634_v28, %v4383_v48  ;;  %v3219_v60 = vrot.slane %v3157_v40, %v4383_v48  ;;  %v3002_v61 = vrot.slane %v2937_v29, %v4378_v35 }
 0x6b4   :  { %v2962_v62 = vcombine.high %v2960_v27, %v2960_v27  ;;  %v2976_v32 = vrot.slane %v2960_v27, %v4378_v35  ;;  %v2983_v63 = vrot.slane %v2961_v56, %v4378_v35  ;;  %v2991_v2 = vcombine.high %v2969_v57, %v2969_v57 }
 0x6b5   :  { %v3223_v3 = vrot.slane %v3159_v50, %v4383_v48  ;;  %v3009_v4 = vrot.slane %v2995_v0, %v4378_v35  ;;  %v3010_v5 = vcombine.high %v3002_v61, %v3002_v61  ;;  %v3018_v6 = vrot.slane %v3002_v61, %v4378_v35 }
 0x6b6   :  { %v2990_v9 = vrot.slane %v2962_v62, %v4378_v35  ;;  %v2992_v38 = vcombine.high %v2976_v32, %v2976_v32  ;;  %v2993_v44 = vcombine.high %v2983_v63, %v2983_v63  ;;  %v4675_v1 = vsel %vm1287_vm1, %v2969_v57, %v3163_v51 }
 0x6b7   :  { %v3011_v37 = vcombine.high %v3009_v4, %v3009_v4  ;;  %v3025_v43 = vrot.slane %v3009_v4, %v4378_v35  ;;  %v3032_v10 = vrot.slane %v3010_v5, %v4378_v35  ;;  %v3040_v11 = vcombine.high %v3018_v6, %v3018_v6 }
 0x6b8   :  { %v2994_v12 = vcombine.high %v2990_v9, %v2990_v9  ;;  %v4680_v15 = vsel %vm1287_vm1, %v2983_v63, %v3167_v42  ;;  %v4683_v16 = vsel %vm1287_vm1, %v2991_v2, %v3171_v45  ;;  %v4686_v49 = vsel %vm1287_vm1, %v2993_v44, %v3175_v46 }
 0x6b9   :  { %v3039_v19 = vrot.slane %v3011_v37, %v4378_v35  ;;  %v3041_v14 = vcombine.high %v3025_v43, %v3025_v43  ;;  %v3042_v18 = vcombine.high %v3032_v10, %v3032_v10  ;;  %v4690_v20 = vsel %vm1287_vm1, %v2976_v32, %v3179_v47 }
 0x6ba   :  { %v4693_v17 = vsel %vm1287_vm1, %v2990_v9, %v3183_v30  ;;  %v4696_v8 = vsel %vm1287_vm1, %v2992_v38, %v3187_v34  ;;  %v4699_v13 = vsel %vm1287_vm1, %v2994_v12, %v3191_v54  ;;  %v4702_v22 = vsel %vm1287_vm1, %v3032_v10, %v3199_v55 }
 0x6bb   :  { %v3043_v23 = vcombine.high %v3039_v19, %v3039_v19  ;;  %v4705_v35 = vsel %vm1287_vm1, %v3018_v6, %v3195_v53  ;;  %v4708_v24 = vsel %vm1287_vm1, %v3040_v11, %v3203_v52  ;;  %v4711_v33 = vsel %vm1287_vm1, %v3042_v18, %v3207_v26 }
 0x6bc   :  { %v4714_v25 = vsel %vm1287_vm1, %v3025_v43, %v3211_v58  ;;  %v4717_v29 = vsel %vm1287_vm1, %v3039_v19, %v3215_v59  ;;  %v3272_v28 = vcombine.low %v4675_v1, %v4680_v15  ;;  %v3273_v31 = vcombine.low %v4683_v16, %v4686_v49 }
 0x6bd   :  { %v4724_v36 = vsel %vm1287_vm1, %v3043_v23, %v3223_v3  ;;  %v3289_v7 = vcombine.low %v4690_v20, %v4693_v17  ;;  %v3290_v39 = vcombine.low %v4696_v8, %v4699_v13  ;;  %v3306_v40 = vcombine.low %v4705_v35, %v4702_v22 }
 0x6be   :  { %v4733_v51 = vsel %vm1287_vm1, %v3041_v14, %v3219_v60  ;;  %v3280_v41 = vrot.slane %v3272_v28, %v4437_v21  ;;  %v3287_v42 = vrot.slane %v3273_v31, %v4437_v21  ;;  %v3307_v45 = vcombine.low %v4708_v24, %v4711_v33 }
 0x6bf   :  { %v3297_v46 = vrot.slane %v3289_v7, %v4437_v21  ;;  %v3304_v47 = vrot.slane %v3290_v39, %v4437_v21  ;;  %v3323_v50 = vcombine.low %v4714_v25, %v4717_v29  ;;  %v3324_v30 = vcombine.low %v4733_v51, %v4724_v36 }
 0x6c0   :  { %v3321_v34 = vrot.slane %v3307_v45, %v4437_v21  ;;  %v3288_v53 = vcombine.low %v3280_v41, %v3287_v42  ;;  %v3314_v55 = vrot.slane %v3306_v40, %v4437_v21 }
 0x6c1   :  { %v3305_v54 = vcombine.low %v3297_v46, %v3304_v47  ;;  %v3338_v52 = vrot.slane %v3324_v30, %v4437_v21  ;;  %v3331_v27 = vrot.slane %v3323_v50, %v4437_v21 }
 0x6c2   :  { %v3322_v26 = vcombine.low %v3314_v55, %v3321_v34 }
 0x6c3   :  { %v3344_v56 = vadd.f32 %v3305_v54, %v3288_v53  ;;  %v3339_v57 = vcombine.low %v3331_v27, %v3338_v52 }
 0x6c5   :  { %v3345_v0 = vadd.f32 %v3344_v56, %v3322_v26 }
 0x6c7   :  { %v3346_v58 = vadd.f32 %v3345_v0, %v3339_v57 }
 0x6c9   :  { %v3347_v59 = vrot.slane %v3346_v58, 4 }
 0x6cb   :  { %v3348_v60 = vadd.f32 %v3347_v59, %v3346_v58 }
 0x6cd   :  { %v3349_v61 = vrot.slane %v3348_v60, 2 }
 0x6cf   :  { %v3350_v62 = vadd.f32 %v3349_v61, %v3348_v60 }
 0x6d1   :  { %v3351_v32 = vrot.slane %v3350_v62, 1 }
 0x6d3   :  { %v3352_v63 = vadd.f32 %v3351_v32, %v3350_v62 }
 0x6d5   :  { %v4749_v2 = vmul.f32 0.03125, %v3352_v63 }
 0x6d7   :  { %v3355_v3 = vcombine.high %v4749_v2, %v4749_v2  ;;  %v3362_v4 = vrot.slane %v4749_v2, %v4437_v21 }
 0x6d9   :  { %v3369_v5 = vrot.slane %v3355_v3, %v4437_v21  ;;  %v3370_v6 = vcombine.high %v3362_v4, %v3362_v4  ;;  %v3376_v9 = vsub.f32 %v4675_v1, %v3362_v4  ;;  %v3380_v38 = vsub.f32 %v4690_v20, %v3362_v4 }
 0x6da   :  { %v3384_v44 = vsub.f32 %v4705_v35, %v3362_v4  ;;  %v3388_v39 = vsub.f32 %v4714_v25, %v3362_v4 }
 0x6db   :  { %v3371_v37 = vcombine.high %v3369_v5, %v3369_v5  ;;  %v3377_v43 = vsub.f32 %v4680_v15, %v3370_v6  ;;  %v3378_v10 = vsub.f32 %v4683_v16, %v3369_v5  ;;  %v3381_v11 = vsub.f32 %v4693_v17, %v3370_v6 }
 0x6dc   :  { %v3382_v12 = vsub.f32 %v4696_v8, %v3369_v5  ;;  %v3385_v19 = vsub.f32 %v4702_v22, %v3370_v6  ;;  %v3386_v14 = vsub.f32 %v4708_v24, %v3369_v5  ;;  %v3389_v18 = vsub.f32 %v4717_v29, %v3370_v6 }
 0x6dd   :  { %v3379_v23 = vsub.f32 %v4686_v49, %v3371_v37  ;;  %v3383_v28 = vsub.f32 %v4699_v13, %v3371_v37  ;;  %v3387_v31 = vsub.f32 %v4711_v33, %v3371_v37  ;;  %v3390_v7 = vsub.f32 %v4733_v51, %v3369_v5 }
 0x6de   :  { %v3391_v40 = vsub.f32 %v4724_v36, %v3371_v37  ;;  %v3392_v41 = vmul.f32 %v3376_v9, %v3376_v9  ;;  %v3393_v42 = vmul.f32 %v3377_v43, %v3377_v43  ;;  %v3394_v45 = vmul.f32 %v3378_v10, %v3378_v10 }
 0x6df   :  { %v3395_v46 = vmul.f32 %v3379_v23, %v3379_v23  ;;  %v3396_v47 = vmul.f32 %v3380_v38, %v3380_v38  ;;  %v3397_v50 = vmul.f32 %v3381_v11, %v3381_v11  ;;  %v3398_v30 = vmul.f32 %v3382_v12, %v3382_v12 }
 0x6e0   :  { %v3399_v34 = vmul.f32 %v3383_v28, %v3383_v28  ;;  %v3400_v53 = vmul.f32 %v3384_v44, %v3384_v44  ;;  %v3401_v54 = vmul.f32 %v3385_v19, %v3385_v19  ;;  %v3402_v55 = vmul.f32 %v3386_v14, %v3386_v14 }
 0x6e1   :  { %v3403_v52 = vmul.f32 %v3387_v31, %v3387_v31  ;;  %v3405_v26 = vmul.f32 %v3389_v18, %v3389_v18  ;;  %v3406_v27 = vmul.f32 %v3390_v7, %v3390_v7  ;;  %v3407_v56 = vmul.f32 %v3391_v40, %v3391_v40 }
 0x6e2   :  { %v3424_v57 = vcombine.low %v3392_v41, %v3393_v42  ;;  %v3425_v0 = vcombine.low %v3394_v45, %v3395_v46  ;;  %v3441_v58 = vcombine.low %v3396_v47, %v3397_v50  ;;  %v3404_v59 = vmul.f32 %v3388_v39, %v3388_v39  ;;  %v3506_v45 = vld [vmem:[#allocation25] sm:$0x1]  ;;  %v3510_v50 = vld [vmem:[#allocation26] sm:$0x1] }
 0x6e3   :  { %v3442_v60 = vcombine.low %v3398_v30, %v3399_v34  ;;  %v3458_v61 = vcombine.low %v3400_v53, %v3401_v54  ;;  %v3459_v62 = vcombine.low %v3402_v55, %v3403_v52  ;;  %v3476_v3 = vcombine.low %v3406_v27, %v3407_v56 }
 0x6e4   :  { %v3432_v32 = vrot.slane %v3424_v57, %v4437_v21  ;;  %v3439_v63 = vrot.slane %v3425_v0, %v4437_v21  ;;  %v3449_v4 = vrot.slane %v3441_v58, %v4437_v21  ;;  %v3475_v9 = vcombine.low %v3404_v59, %v3405_v26 }
 0x6e5   :  { %v3456_v5 = vrot.slane %v3442_v60, %v4437_v21  ;;  %v3473_v6 = vrot.slane %v3459_v62, %v4437_v21  ;;  %v3466_v37 = vrot.slane %v3458_v61, %v4437_v21  ;;  %v3490_v43 = vrot.slane %v3476_v3, %v4437_v21 }
 0x6e6   :  { %v3440_v38 = vcombine.low %v3432_v32, %v3439_v63  ;;  %v3483_v11 = vrot.slane %v3475_v9, %v4437_v21 }
 0x6e7   :  { %v3457_v44 = vcombine.low %v3449_v4, %v3456_v5  ;;  %v3474_v10 = vcombine.low %v3466_v37, %v3473_v6 }
 0x6e8   :  { %v3491_v19 = vcombine.low %v3483_v11, %v3490_v43 }
 0x6e9   :  { %v3496_v12 = vadd.f32 %v3457_v44, %v3440_v38 }
 0x6eb   :  { %v3497_v14 = vadd.f32 %v3496_v12, %v3474_v10 }
 0x6ed   :  { %v3498_v18 = vadd.f32 %v3497_v14, %v3491_v19 }
 0x6ef   :  { %v3499_v23 = vrot.slane %v3498_v18, 4 }
 0x6f1   :  { %v3500_v28 = vadd.f32 %v3499_v23, %v3498_v18 }
 0x6f3   :  { %v3501_v31 = vrot.slane %v3500_v28, 2 }
 0x6f5   :  { %v3502_v7 = vadd.f32 %v3501_v31, %v3500_v28 }
 0x6f7   :  { %v3503_v39 = vrot.slane %v3502_v7, 1 }
 0x6f9   :  { %v3504_v40 = vadd.f32 %v3503_v39, %v3502_v7 }
 0x6fb   :  { %v3505_v41 = vmul.f32 0.03125, %v3504_v40 }
 0x6fd   :  { %v3507_v42 = vadd.f32 1e-05, %v3505_v41 }
 0x6ff   :  { %3772 = vrsqrt.f32 %v3507_v42 }
 0x70c   :  { %v3773_v46 = vpop.eup %3772 }
 0x70d   :  { %v3509_v47 = vmul.f32 %v3773_v46, %v3506_v45 }
 0x70f   :  { %v3511_v30 = vmul.f32 %v3509_v47, %v4749_v2  ;;  %v3517_v34 = vrot.slane %v3509_v47, %v4383_v48 }
 0x711   :  { %v3512_v53 = vsub.f32 %v3510_v50, %v3511_v30  ;;  %v3518_v54 = vcombine.high %v3517_v34, %v3517_v34  ;;  %v3525_v55 = vrot.slane %v3517_v34, %v4437_v21 }
 0x713   :  { %v3532_v52 = vrot.slane %v3518_v54, %v4437_v21  ;;  %v3559_v26 = vrot.slane %v3512_v53, %v4383_v48  ;;  %v3533_v27 = vcombine.high %v3525_v55, %v3525_v55  ;;  %v3539_v58 = vmul.f32 %v3525_v55, %v4675_v1 }
 0x714   :  { %v3543_v48 = vmul.f32 %v3525_v55, %v4690_v20 }
 0x715   :  { %v3534_v56 = vcombine.high %v3532_v52, %v3532_v52  ;;  %v3560_v57 = vcombine.high %v3559_v26, %v3559_v26  ;;  %v3567_v0 = vrot.slane %v3559_v26, %v4437_v21  ;;  %v3540_v59 = vmul.f32 %v3533_v27, %v4680_v15 }
 0x716   :  { %v3541_v61 = vmul.f32 %v3532_v52, %v4683_v16  ;;  %v3544_v5 = vmul.f32 %v3533_v27, %v4693_v17  ;;  %v3545_v1 = vmul.f32 %v3532_v52, %v4696_v8  ;;  %v3547_v16 = vmul.f32 %v3525_v55, %v4705_v35 }
 0x717   :  { %v3574_v2 = vrot.slane %v3560_v57, %v4437_v21  ;;  %v3575_v60 = vcombine.high %v3567_v0, %v3567_v0  ;;  %v3581_v62 = vadd.f32 %v3567_v0, %v3539_v58  ;;  %v3542_v32 = vmul.f32 %v3534_v56, %v4686_v49 }
 0x718   :  { %v3585_v9 = vadd.f32 %v3567_v0, %v3543_v48  ;;  %v3546_v15 = vmul.f32 %v3534_v56, %v4699_v13  ;;  %v3548_v49 = vmul.f32 %v3533_v27, %v4702_v22  ;;  %v3549_v20 = vmul.f32 %v3532_v52, %v4708_v24 }
 0x719   :  { %v3576_v63 = vcombine.high %v3574_v2, %v3574_v2  ;;  %v3582_v3 = vadd.f32 %v3575_v60, %v3540_v59  ;;  %v3583_v4 = vadd.f32 %v3574_v2, %v3541_v61  ;;  %3774 = vtanh.f32 %v3581_v62 }
 0x71a   :  { %v3586_v38 = vadd.f32 %v3575_v60, %v3544_v5  ;;  %v3587_v44 = vadd.f32 %v3574_v2, %v3545_v1  ;;  %v3589_v17 = vadd.f32 %v3567_v0, %v3547_v16  ;;  %v3550_v8 = vmul.f32 %v3534_v56, %v4711_v33 }
 0x71b   :  { %v3584_v6 = vadd.f32 %v3576_v63, %v3542_v32  ;;  %3776 = vtanh.f32 %v3582_v3  ;;  %v3588_v37 = vadd.f32 %v3576_v63, %v3546_v15  ;;  %v3590_v43 = vadd.f32 %v3575_v60, %v3548_v49 }
 0x71c   :  { %3778 = vtanh.f32 %v3583_v4  ;;  %v3551_v13 = vmul.f32 %v3525_v55, %v4714_v25  ;;  %v3591_v10 = vadd.f32 %v3574_v2, %v3549_v20  ;;  %v3552_v35 = vmul.f32 %v3533_v27, %v4717_v29 }
 0x71d   :  { %3780 = vtanh.f32 %v3584_v6  ;;  %v3592_v11 = vadd.f32 %v3576_v63, %v3550_v8  ;;  %v3553_v22 = vmul.f32 %v3532_v52, %v4733_v51  ;;  %v3554_v24 = vmul.f32 %v3534_v56, %v4724_v36 }
 0x71e   :  { %3782 = vtanh.f32 %v3585_v9  ;;  %v3593_v12 = vadd.f32 %v3567_v0, %v3551_v13  ;;  %v3594_v19 = vadd.f32 %v3575_v60, %v3552_v35 }
 0x71f   :  { %3784 = vtanh.f32 %v3586_v38  ;;  %v3595_v14 = vadd.f32 %v3574_v2, %v3553_v22  ;;  %v3596_v33 = vadd.f32 %v3576_v63, %v3554_v24 }
 0x720   :  { %3786 = vtanh.f32 %v3587_v44 }
 0x721   :  { %3788 = vtanh.f32 %v3588_v37 }
 0x722   :  { %3790 = vtanh.f32 %v3589_v17 }
 0x723   :  { %3792 = vtanh.f32 %v3590_v43 }
 0x724   :  { %3794 = vtanh.f32 %v3591_v10 }
 0x725   :  { %3796 = vtanh.f32 %v3592_v11 }
 0x726   :  { %3798 = vtanh.f32 %v3593_v12  ;;  %v3775_v25 = vpop.eup %3774 }
 0x727   :  { %3800 = vtanh.f32 %v3594_v19 }
 0x728   :  { %v3777_v18 = vpop.eup %3776  ;;  %3802 = vtanh.f32 %v3595_v14 }
 0x729   :  { %v3779_v29 = vpop.eup %3778  ;;  %3804 = vtanh.f32 %v3596_v33  ;;  %v3629_v23 = vcombine.low %v3775_v25, %v3777_v18 }
 0x72a   :  { %v3781_v28 = vpop.eup %3780 }
 0x72b   :  { %v3783_v51 = vpop.eup %3782  ;;  %v3630_v31 = vcombine.low %v3779_v29, %v3781_v28  ;;  %v3637_v36 = vrot.slane %v3629_v23, %v4437_v21 }
 0x72c   :  { %v3785_v7 = vpop.eup %3784 }
 0x72d   :  { %v3787_v39 = vpop.eup %3786  ;;  %v3644_v40 = vrot.slane %v3630_v31, %v4437_v21  ;;  %v3646_v41 = vcombine.low %v3783_v51, %v3785_v7 }
 0x72e   :  { %v3789_v42 = vpop.eup %3788 }
 0x72f   :  { %v3791_v45 = vpop.eup %3790  ;;  %v3645_v46 = vcombine.low %v3637_v36, %v3644_v40  ;;  %v3647_v47 = vcombine.low %v3787_v39, %v3789_v42  ;;  %v3654_v34 = vrot.slane %v3646_v41, %v4437_v21 }
 0x730   :  { %v3793_v50 = vpop.eup %3792 }
 0x731   :  { %v3795_v30 = vpop.eup %3794  ;;  %v3661_v53 = vrot.slane %v3647_v47, %v4437_v21  ;;  %v3663_v54 = vcombine.low %v3791_v45, %v3793_v50  ;;  %3701 = vst [vmem:[#allocation28] sm:$0xff] %v3645_v46 }
 0x732   :  { %v3797_v55 = vpop.eup %3796 }
 0x733   :  { %v3799_v52 = vpop.eup %3798  ;;  %v3662_v26 = vcombine.low %v3654_v34, %v3661_v53  ;;  %v3664_v27 = vcombine.low %v3795_v30, %v3797_v55  ;;  %v3671_v0 = vrot.slane %v3663_v54, %v4437_v21 }
 0x734   :  { %v3801_v56 = vpop.eup %3800 }
 0x735   :  { %v3803_v57 = vpop.eup %3802  ;;  %v3678_v58 = vrot.slane %v3664_v27, %v4437_v21  ;;  %v3680_v59 = vcombine.low %v3799_v52, %v3801_v56  ;;  %3702 = vst [vmem:[#allocation28 + $0x8] sm:$0xff] %v3662_v26 }
 0x736   :  { %v3805_v2 = vpop.eup %3804 }
 0x737   :  { %v3679_v60 = vcombine.low %v3671_v0, %v3678_v58  ;;  %v3681_v61 = vcombine.low %v3803_v57, %v3805_v2  ;;  %v3688_v62 = vrot.slane %v3680_v59, %v4437_v21 }
 0x739   :  { %v3695_v32 = vrot.slane %v3681_v61, %v4437_v21  ;;  %3703 = vst [vmem:[#allocation28 + $0x10] sm:$0xff] %v3679_v60 }
 0x73b   :  { %v3696_v63 = vcombine.low %v3688_v62, %v3695_v32 }
 0x73d   :  { %3704 = vst [vmem:[#allocation28 + $0x18] sm:$0xff] %v3696_v63 }
 0x73e   :  { %4137 = shalt.err (!%p4134_p0)
}
 0x73f   :  { %s4190_s5 = smov 128   ;;  %s4191_s4 = smov 8  }
 0x740   :  { %3716 = dma.vmem_to_hbm [thread:$0]  %s3711_s15, 512, %s4830_s16, [#allocation4], %s4190_s5, %s4190_s5, %s4191_s4  }
 0x741   :  { %4164 = dma.done.wait [#allocation4], 512  }
 0x742   :  { %4165 = vsyncadd [#allocation4], 4294966784 }
 0x743   :  { %3720 = vsyncpa [#allocation3], 1 }
 0x744   :  { %3721 = vsyncpa [#allocation6], 1 }
 0x745   :  { %3722 = vsyncpa [#allocation9], 1 }
 0x746   :  { %3723 = vsyncpa [#allocation12], 1 }
 0x747   :  { %3724 = vsyncpa [#allocation15], 1 }
 0x748   :  { %3725 = vsyncpa [#allocation18], 1 }
 0x749   :  { %3726 = vsyncpa [#allocation21], 1 }
 0x74a   :  { %3727 = vsyncpa [#allocation24], 1 }
 0x74b   :  { %3728 = vsyncpa [#allocation27], 1 }
 0x74c   :  { %3729 = vsyncpa [#allocation4], 1 }

</bundles_post_ra>
